<compile_context>
chip_gen: v7x
topology: tpu7x:2x2x1
jax: 0.10.0
libtpu: 0.0.40
codegen_flags: <defaults>
</compile_context>

<pallas_src>
import jax
import jax.numpy as jnp
from jax import lax
from jax.experimental import pallas as pl
from jax.experimental.pallas import tpu as pltpu


def _round_up(x, m):
    return ((x + m - 1) // m) * m


def _tpu_budget():
    """(max point-tile, vmem_limit_bytes), generation aware (v7x: 64 MiB VMEM)."""
    try:
        cap = int(pltpu.get_tpu_info().vmem_capacity_bytes)
    except Exception:                      # conservative fallback (assume v7x)
        cap = 64 * 1024 * 1024
    if cap >= 96 * 1024 * 1024:            # v5e / v6e: 128 MiB physical VMEM
        return 4096, 64 * 1024 * 1024
    return 2048, 40 * 1024 * 1024          # v7x: 64 MiB physical VMEM


# ----------------------------------------------------------------------------
# Kernel 1: fused PointNet point-wise MLP + global max over points.
# Channel-major orientation: h = W @ x, point axis = lane axis, max over lanes.
# ----------------------------------------------------------------------------
_L3_OUT = 1024
_L3_CHUNK = 256


def _pointnet_mlp_max_kernel(x_ref, w1_ref, b1_ref, w2_ref, b2_ref, w3_ref,
                             o_ref):
    t = pl.program_id(1)

    @pl.when(t == 0)
    def _():
        o_ref[...] = jnp.full(o_ref.shape, -jnp.inf, dtype=o_ref.dtype)

    x = x_ref[0]                                             # (Dp_pad, tile_np) bf16
    h = jnp.dot(w1_ref[...], x, preferred_element_type=jnp.float32)
    h = jnp.maximum(h + b1_ref[...], 0.0)                    # (64, tile_np)
    h = jnp.dot(w2_ref[...], h.astype(jnp.bfloat16),
                preferred_element_type=jnp.float32)
    h = jnp.maximum(h + b2_ref[...], 0.0)                    # (128, tile_np)
    h = h.astype(jnp.bfloat16)

    # Layer 3 (128 -> 1024) chunked over output channels; per-chunk max over
    # the point (lane) axis so the (1024, tile_np) f32 temp never exists.
    # b3 is hoisted into the fusion head: max_t(h) + b3 == max_t(h + b3).
    for c0 in range(0, _L3_OUT, _L3_CHUNK):
        wc = w3_ref[c0:c0 + _L3_CHUNK, :]                    # (256, 128) bf16
        hc = jnp.dot(wc, h, preferred_element_type=jnp.float32)
        mc = jnp.max(hc, axis=1, keepdims=True)              # (256, 1)
        o_ref[0, c0:c0 + _L3_CHUNK, :] = jnp.maximum(
            o_ref[0, c0:c0 + _L3_CHUNK, :], mc)


def pallas_pointnet_global_features(points, params, *, tile_np_max=None,
                                    vmem_limit_bytes=None):
    """points: (B, point_dim, N) f32 -> (B, 1024) global max feature (b3 NOT added)."""
    if tile_np_max is None or vmem_limit_bytes is None:
        cap_tile, cap_vmem = _tpu_budget()
        tile_np_max = tile_np_max or cap_tile
        vmem_limit_bytes = vmem_limit_bytes or cap_vmem

    B, Dp, Np = points.shape
    w1, b1 = params["pn_conv1"]           # (64, Dp) bf16, (64, 1) f32
    w2, b2 = params["pn_conv2"]           # (128, 64), (128, 1)
    w3, _b3 = params["pn_conv3"]          # (1024, 128); bias hoisted to the head

    x = points.astype(jnp.bfloat16)       # pre-cast: halves the x DMA bytes

    # Pad the channel (contraction) dim to 8; w1's padded input columns are 0.
    Dp_pad = _round_up(Dp, 8)
    if Dp_pad != Dp:
        x = jnp.pad(x, ((0, 0), (0, Dp_pad - Dp), (0, 0)))
        w1 = jnp.pad(w1, ((0, 0), (0, Dp_pad - Dp)))

    # Bounded, lane-dense point tiles (multiple of 128 lanes).  The point axis
    # is padded by EDGE REPLICATION, which is exact only because the reduction
    # is a max (would be wrong for sum/mean).
    n_tiles = max(1, -(-Np // tile_np_max))                  # ceil
    tile_np = _round_up(-(-Np // n_tiles), 128)
    np_pad = tile_np * n_tiles
    if np_pad != Np:
        pad = jnp.broadcast_to(x[:, :, -1:], (B, Dp_pad, np_pad - Np))
        x = jnp.concatenate([x, pad], axis=2)

    # TODO(synk): on v7x with B == 1 a 2-way "parallel" split of the point axis
    # (two partial-max outputs + a wrapper maximum) would occupy the 2nd core.
    out = pl.pallas_call(
        _pointnet_mlp_max_kernel,
        out_shape=jax.ShapeDtypeStruct((B, 1024, 1), jnp.float32),
        grid=(B, n_tiles),
        in_specs=[
            pl.BlockSpec((1, Dp_pad, tile_np), lambda b, t: (b, 0, t)),
            pl.BlockSpec((64, Dp_pad), lambda b, t: (0, 0)),
            pl.BlockSpec((64, 1), lambda b, t: (0, 0)),
            pl.BlockSpec((128, 64), lambda b, t: (0, 0)),
            pl.BlockSpec((128, 1), lambda b, t: (0, 0)),
            pl.BlockSpec((1024, 128), lambda b, t: (0, 0)),
        ],
        out_specs=pl.BlockSpec((1, 1024, 1), lambda b, t: (b, 0, 0)),
        compiler_params=pltpu.CompilerParams(
            dimension_semantics=("parallel", "arbitrary"),
            vmem_limit_bytes=vmem_limit_bytes),
    )(x, w1, b1, w2, b2, w3)
    return out.reshape(B, 1024)


# ----------------------------------------------------------------------------
# Kernel 2: fused fusion head (hoisted b3, pn fc, cv fc, split-W1 concat,
# fc1..fc4 with fc4 padded to 128 lanes).
# ----------------------------------------------------------------------------
def _fusion_head_kernel(pn_ref, cv_ref, pnb3_ref,
                        wpn_ref, bpn_ref, wcv_ref, bcv_ref,
                        w1a_ref, w1b_ref, b1_ref,
                        w2_ref, b2_ref, w3_ref, b3_ref,
                        w4_ref, b4_ref, o_ref):
    def dense_relu(x, w_ref, b_ref):
        y = jnp.dot(x.astype(jnp.bfloat16), w_ref[...],
                    preferred_element_type=jnp.float32)
        return jnp.maximum(y + b_ref[...], 0.0)

    # Hoisted PointNet layer-3 bias (max over points commutes with + b3).
    pn = pn_ref[...] + pnb3_ref[...]                      # (B, 1024) f32
    pn = dense_relu(pn, wpn_ref, bpn_ref)                 # (B, 512) pointnet fc
    cv = dense_relu(cv_ref[...], wcv_ref, bcv_ref)        # (B, 512) conv fc
    # fc1(concat([pn, cv])) == pn @ W1[:512] + cv @ W1[512:] -> no in-kernel concat
    h = jnp.dot(pn.astype(jnp.bfloat16), w1a_ref[...],
                preferred_element_type=jnp.float32)
    h = h + jnp.dot(cv.astype(jnp.bfloat16), w1b_ref[...],
                    preferred_element_type=jnp.float32)
    h = jnp.maximum(h + b1_ref[...], 0.0)                 # (B, 512)
    h = dense_relu(h, w2_ref, b2_ref)                     # (B, 256)
    h = dense_relu(h, w3_ref, b3_ref)                     # (B, 128)
    h = dense_relu(h, w4_ref, b4_ref)                     # (B, 128) padded fc4; ref applies ReLU
    o_ref[...] = h


def pallas_fusion_head(pn_global, cv_flat, params):
    B = pn_global.shape[0]
    _w3pn, b3pn = params["pn_conv3"]      # (1, 1024) hoisted bias
    wpn, bpn = params["pn_fc1"]
    wcv, bcv = params["cv_fc"]
    w1, b1 = params["fc1"]
    w2, b2 = params["fc2"]
    w3, b3 = params["fc3"]
    w4, b4 = params["fc4"]
    # Concat fold: fc1 weight is (in=1024, out=512); rows [0:512] multiply the
    # pointnet half of the concat.  (Porting real nn.Linear (out,in) weights
    # requires a transpose before this split.)
    w1a, w1b = w1[:512], w1[512:]
    # Zero-pad fc4 to 128 output lanes so the final store is lane-dense.
    w4p = jnp.pad(w4, ((0, 0), (0, 128 - w4.shape[1])))
    b4p = jnp.pad(b4, ((0, 0), (0, 128 - b4.shape[1])))
    # TODO(synk): for large B, grid this call over batch ("parallel") so v7x's
    # second TensorCore is used; at the tiny B here a single block is cheapest.
    out = pl.pallas_call(
        _fusion_head_kernel,
        out_shape=jax.ShapeDtypeStruct((B, 128), jnp.float32),
        compiler_params=pltpu.CompilerParams(vmem_limit_bytes=32 * 1024 * 1024),
    )(pn_global, cv_flat.astype(jnp.bfloat16), b3pn,
      wpn, bpn, wcv, bcv, w1a, w1b, b1, w2, b2, w3, b3, w4p, b4p)
    return out[:, :4]


# ----------------------------------------------------------------------------
# Tiny conv trunk (SimpleConv2d convs + pools) via XLA — no efficient Pallas
# equivalent at these tiny spatial sizes; its flatten->fc is fused in kernel 2.
# ----------------------------------------------------------------------------
def conv_branch_flatten(images, params):
    """images: (B, n_slices, R, R) NCHW -> (B, 16*(R//4)^2) flattened features."""
    w1, b1 = params["cv_conv1"]          # (8, n_slices, 3, 3), (8,)
    w2, b2 = params["cv_conv2"]          # (16, 8, 3, 3), (16,)
    dn = ("NCHW", "OIHW", "NCHW")
    y = lax.conv_general_dilated(images, w1, window_strides=(1, 1),
                                 padding="SAME", dimension_numbers=dn)
    y = jax.nn.relu(y + b1.reshape(1, -1, 1, 1))
    y = lax.reduce_window(y, -jnp.inf, lax.max, (1, 1, 2, 2), (1, 1, 2, 2), "VALID")
    y = lax.conv_general_dilated(y, w2, window_strides=(1, 1),
                                 padding="SAME", dimension_numbers=dn)
    y = jax.nn.relu(y + b2.reshape(1, -1, 1, 1))
    y = lax.reduce_window(y, -jnp.inf, lax.max, (1, 1, 2, 2), (1, 1, 2, 2), "VALID")
    return y.reshape(y.shape[0], -1)


# ----------------------------------------------------------------------------
# Deterministic parameter init (synthetic; shapes from the module __init__)
# ----------------------------------------------------------------------------
def _init_dense(key, fan_in, fan_out):
    """(in, out) bf16 weight, (1, out) f32 bias (row-major activations)."""
    kw, kb = jax.random.split(key)
    w = (jax.random.normal(kw, (fan_in, fan_out), jnp.float32)
         / jnp.sqrt(float(fan_in))).astype(jnp.bfloat16)
    b = (jax.random.normal(kb, (fan_out,), jnp.float32) * 0.01).reshape(1, fan_out)
    return w, b


def _init_pn_conv(key, fan_in, fan_out, *, bias_row=False):
    """(out, in) bf16 weight (PyTorch Conv1d layout), bias (out,1) or (1,out)."""
    kw, kb = jax.random.split(key)
    w = (jax.random.normal(kw, (fan_out, fan_in), jnp.float32)
         / jnp.sqrt(float(fan_in))).astype(jnp.bfloat16)
    b = jax.random.normal(kb, (fan_out,), jnp.float32) * 0.01
    b = b.reshape(1, fan_out) if bias_row else b.reshape(fan_out, 1)
    return w, b


def _init_conv3x3(key, cin, cout):
    kw, kb = jax.random.split(key)
    w = jax.random.normal(kw, (cout, cin, 3, 3), jnp.float32) / jnp.sqrt(float(cin * 9))
    b = jax.random.normal(kb, (cout,), jnp.float32) * 0.01
    return w, b


def init_params(key, *, point_dim, image_resolution, n_slices):
    keys = jax.random.split(key, 11)
    feat_hw = image_resolution // 4
    return {
        # PointNet branch (feature_transform=False; BN folded to identity).
        "pn_conv1": _init_pn_conv(keys[0], point_dim, 64),
        "pn_conv2": _init_pn_conv(keys[1], 64, 128),
        "pn_conv3": _init_pn_conv(keys[2], 128, 1024, bias_row=True),  # bias hoisted to head
        "pn_fc1": _init_dense(keys[3], 1024, 512),
        # SimpleConv2d branch.
        "cv_conv1": _init_conv3x3(keys[4], n_slices, 8),
        "cv_conv2": _init_conv3x3(keys[5], 8, 16),
        "cv_fc": _init_dense(keys[6], 16 * feat_hw * feat_hw, 512),
        # Fusion head (exact shapes from PointnetPlusConv.__init__).
        "fc1": _init_dense(keys[7], 1024, 512),
        "fc2": _init_dense(keys[8], 512, 256),
        "fc3": _init_dense(keys[9], 256, 128),
        "fc4": _init_dense(keys[10], 128, 4),
    }


# ----------------------------------------------------------------------------
# Forward pass
# ----------------------------------------------------------------------------
def pointnet_plus_conv_forward(params, points, images):
    pn_global = pallas_pointnet_global_features(points, params)   # (B, 1024), no b3
    cv_flat = conv_branch_flatten(images, params)                 # (B, 16*(R//4)^2)
    return pallas_fusion_head(pn_global, cv_flat, params)         # (B, 4)


# ----------------------------------------------------------------------------
if __name__ == "__main__":
    key = jax.random.PRNGKey(0)
    k_pts, k_img, k_par = jax.random.split(key, 3)

    B, point_dim, Np = 2, 3, 64
    image_resolution, n_slices = 16, 1

    points = jax.random.normal(k_pts, (B, point_dim, Np), jnp.float32)
    images = jax.random.normal(
        k_img, (B, n_slices, image_resolution, image_resolution), jnp.float32)

    params = init_params(k_par, point_dim=point_dim,
                         image_resolution=image_resolution, n_slices=n_slices)

    fwd = jax.jit(pointnet_plus_conv_forward)
    out = jax.block_until_ready(fwd(params, points, images))
    assert out.shape == (B, 4) and out.dtype == jnp.float32
    assert bool(jnp.all(jnp.isfinite(out)))
    print("KERNEL_OK")
</pallas_src>

<mosaic_0001>
module attributes {stable_mosaic.version = 11 : i64} {
  func.func @_pointnet_mlp_max_kernel(%arg0: i32, %arg1: i32, %arg2: memref<1x8x128xbf16, #tpu.memory_space<vmem>>, %arg3: memref<64x8xbf16, #tpu.memory_space<vmem>>, %arg4: memref<64x1xf32, #tpu.memory_space<vmem>>, %arg5: memref<128x64xbf16, #tpu.memory_space<vmem>>, %arg6: memref<128x1xf32, #tpu.memory_space<vmem>>, %arg7: memref<1024x128xbf16, #tpu.memory_space<vmem>>, %arg8: memref<1x1024x1xf32, #tpu.memory_space<vmem>>) attributes {dimension_semantics = [#tpu.dimension_semantics<parallel>, #tpu.dimension_semantics<arbitrary>], iteration_bounds = array<i64: 2, 1>, scalar_prefetch = 0 : i64, scratch_operands = 0 : i64, tpu.core_type = #tpu.core_type<tc>, window_params = [{transform_indices = @transform_0, window_bounds = array<i64: 1, 8, 128>}, {pipeline_mode = #tpu.pipeline_mode<synchronous>, transform_indices = @transform_1, window_bounds = array<i64: 64, 8>}, {pipeline_mode = #tpu.pipeline_mode<synchronous>, transform_indices = @transform_2, window_bounds = array<i64: 64, 1>}, {pipeline_mode = #tpu.pipeline_mode<synchronous>, transform_indices = @transform_3, window_bounds = array<i64: 128, 64>}, {pipeline_mode = #tpu.pipeline_mode<synchronous>, transform_indices = @transform_4, window_bounds = array<i64: 128, 1>}, {pipeline_mode = #tpu.pipeline_mode<synchronous>, transform_indices = @transform_5, window_bounds = array<i64: 1024, 128>}, {transform_indices = @transform_6, window_bounds = array<i64: 1, 1024, 1>}]} {
    %c0_i32 = arith.constant 0 : i32
    %0 = arith.cmpi eq, %arg1, %c0_i32 : i32
    %1 = arith.extui %0 : i1 to i32
    %c0_i32_0 = arith.constant 0 : i32
    %2 = arith.cmpi ne, %1, %c0_i32_0 : i32
    scf.if %2 {
      %cst_51 = arith.constant 0xFF800000 : f32
      %61 = vector.broadcast %cst_51 : f32 to vector<1x1024x1xf32>
      %c0_52 = arith.constant 0 : index
      %c0_53 = arith.constant 0 : index
      %c0_54 = arith.constant 0 : index
      %62 = vector.load %arg8[%c0_52, %c0_53, %c0_54] : memref<1x1024x1xf32, #tpu.memory_space<vmem>>, vector<1x1024x1xf32>
      tpu.vector_store %arg8[%c0_52, %c0_53, %c0_54], %61 {strides = array<i32>} : memref<1x1024x1xf32, #tpu.memory_space<vmem>>, vector<1x1024x1xf32>,
    } else {
    }
    %c0 = arith.constant 0 : index
    %c0_1 = arith.constant 0 : index
    %c0_2 = arith.constant 0 : index
    %3 = vector.load %arg2[%c0, %c0_1, %c0_2] : memref<1x8x128xbf16, #tpu.memory_space<vmem>>, vector<1x8x128xbf16>
    %4 = vector.shape_cast %3 : vector<1x8x128xbf16> to vector<8x128xbf16>
    %c0_3 = arith.constant 0 : index
    %c0_4 = arith.constant 0 : index
    %5 = vector.load %arg3[%c0_3, %c0_4] : memref<64x8xbf16, #tpu.memory_space<vmem>>, vector<64x8xbf16>
    %cst = arith.constant dense<0.000000e+00> : vector<64x128xf32>
    %6 = tpu.matmul %5, %4, %cst {dimension_numbers = #tpu.dot_dimension_numbers<[1], [0], [0], [1], [0, 0, 1, 1], [], []>} : vector<64x8xbf16>, vector<8x128xbf16>, vector<64x128xf32> -> vector<64x128xf32>
    %c0_5 = arith.constant 0 : index
    %c0_6 = arith.constant 0 : index
    %7 = vector.load %arg4[%c0_5, %c0_6] : memref<64x1xf32, #tpu.memory_space<vmem>>, vector<64x1xf32>
    %8 = vector.broadcast %7 : vector<64x1xf32> to vector<64x128xf32>
    %9 = arith.addf %6, %8 : vector<64x128xf32>
    %cst_7 = arith.constant 0.000000e+00 : f32
    %10 = vector.broadcast %cst_7 : f32 to vector<64x128xf32>
    %11 = arith.maximumf %9, %10 : vector<64x128xf32>
    %c0_8 = arith.constant 0 : index
    %c0_9 = arith.constant 0 : index
    %12 = vector.load %arg5[%c0_8, %c0_9] : memref<128x64xbf16, #tpu.memory_space<vmem>>, vector<128x64xbf16>
    %13 = arith.truncf %11 : vector<64x128xf32> to vector<64x128xbf16>
    %cst_10 = arith.constant dense<0.000000e+00> : vector<128x128xf32>
    %14 = tpu.matmul %12, %13, %cst_10 {dimension_numbers = #tpu.dot_dimension_numbers<[1], [0], [0], [1], [0, 0, 1, 1], [], []>} : vector<128x64xbf16>, vector<64x128xbf16>, vector<128x128xf32> -> vector<128x128xf32>
    %c0_11 = arith.constant 0 : index
    %c0_12 = arith.constant 0 : index
    %15 = vector.load %arg6[%c0_11, %c0_12] : memref<128x1xf32, #tpu.memory_space<vmem>>, vector<128x1xf32>
    %16 = vector.broadcast %15 : vector<128x1xf32> to vector<128x128xf32>
    %17 = arith.addf %14, %16 : vector<128x128xf32>
    %cst_13 = arith.constant 0.000000e+00 : f32
    %18 = vector.broadcast %cst_13 : f32 to vector<128x128xf32>
    %19 = arith.maximumf %17, %18 : vector<128x128xf32>
    %20 = arith.truncf %19 : vector<128x128xf32> to vector<128x128xbf16>
    %c0_14 = arith.constant 0 : index
    %c0_15 = arith.constant 0 : index
    %21 = vector.load %arg7[%c0_14, %c0_15] : memref<1024x128xbf16, #tpu.memory_space<vmem>>, vector<256x128xbf16>
    %cst_16 = arith.constant dense<0.000000e+00> : vector<256x128xf32>
    %22 = tpu.matmul %21, %20, %cst_16 {dimension_numbers = #tpu.dot_dimension_numbers<[1], [0], [0], [1], [0, 0, 1, 1], [], []>} : vector<256x128xbf16>, vector<128x128xbf16>, vector<256x128xf32> -> vector<256x128xf32>
    %cst_17 = arith.constant dense<0xFF800000> : vector<256xf32>
    %23 = vector.multi_reduction <maximumf>, %22, %cst_17 [1] : vector<256x128xf32> to vector<256xf32>
    %24 = vector.shape_cast %23 : vector<256xf32> to vector<256x1xf32>
    %c0_18 = arith.constant 0 : index
    %c0_19 = arith.constant 0 : index
    %c0_20 = arith.constant 0 : index
    %25 = vector.load %arg8[%c0_18, %c0_19, %c0_20] : memref<1x1024x1xf32, #tpu.memory_space<vmem>>, vector<1x256x1xf32>
    %26 = vector.shape_cast %25 : vector<1x256x1xf32> to vector<256x1xf32>
    %27 = arith.maximumf %26, %24 : vector<256x1xf32>
    %c0_21 = arith.constant 0 : index
    %c0_22 = arith.constant 0 : index
    %c0_23 = arith.constant 0 : index
    %28 = vector.load %arg8[%c0_21, %c0_22, %c0_23] : memref<1x1024x1xf32, #tpu.memory_space<vmem>>, vector<1x256x1xf32>
    %29 = vector.shape_cast %28 : vector<1x256x1xf32> to vector<256x1xf32>
    %30 = vector.shape_cast %27 : vector<256x1xf32> to vector<1x256x1xf32>
    tpu.vector_store %arg8[%c0_21, %c0_22, %c0_23], %30 {strides = array<i32>} : memref<1x1024x1xf32, #tpu.memory_space<vmem>>, vector<1x256x1xf32>,
    %c256 = arith.constant 256 : index
    %c0_24 = arith.constant 0 : index
    %31 = vector.load %arg7[%c256, %c0_24] : memref<1024x128xbf16, #tpu.memory_space<vmem>>, vector<256x128xbf16>
    %cst_25 = arith.constant dense<0.000000e+00> : vector<256x128xf32>
    %32 = tpu.matmul %31, %20, %cst_25 {dimension_numbers = #tpu.dot_dimension_numbers<[1], [0], [0], [1], [0, 0, 1, 1], [], []>} : vector<256x128xbf16>, vector<128x128xbf16>, vector<256x128xf32> -> vector<256x128xf32>
    %cst_26 = arith.constant dense<0xFF800000> : vector<256xf32>
    %33 = vector.multi_reduction <maximumf>, %32, %cst_26 [1] : vector<256x128xf32> to vector<256xf32>
    %34 = vector.shape_cast %33 : vector<256xf32> to vector<256x1xf32>
    %c0_27 = arith.constant 0 : index
    %c256_28 = arith.constant 256 : index
    %c0_29 = arith.constant 0 : index
    %35 = vector.load %arg8[%c0_27, %c256_28, %c0_29] : memref<1x1024x1xf32, #tpu.memory_space<vmem>>, vector<1x256x1xf32>
    %36 = vector.shape_cast %35 : vector<1x256x1xf32> to vector<256x1xf32>
    %37 = arith.maximumf %36, %34 : vector<256x1xf32>
    %c0_30 = arith.constant 0 : index
    %c256_31 = arith.constant 256 : index
    %c0_32 = arith.constant 0 : index
    %38 = vector.load %arg8[%c0_30, %c256_31, %c0_32] : memref<1x1024x1xf32, #tpu.memory_space<vmem>>, vector<1x256x1xf32>
    %39 = vector.shape_cast %38 : vector<1x256x1xf32> to vector<256x1xf32>
    %40 = vector.shape_cast %37 : vector<256x1xf32> to vector<1x256x1xf32>
    tpu.vector_store %arg8[%c0_30, %c256_31, %c0_32], %40 {strides = array<i32>} : memref<1x1024x1xf32, #tpu.memory_space<vmem>>, vector<1x256x1xf32>,
    %c512 = arith.constant 512 : index
    %c0_33 = arith.constant 0 : index
    %41 = vector.load %arg7[%c512, %c0_33] : memref<1024x128xbf16, #tpu.memory_space<vmem>>, vector<256x128xbf16>
    %cst_34 = arith.constant dense<0.000000e+00> : vector<256x128xf32>
    %42 = tpu.matmul %41, %20, %cst_34 {dimension_numbers = #tpu.dot_dimension_numbers<[1], [0], [0], [1], [0, 0, 1, 1], [], []>} : vector<256x128xbf16>, vector<128x128xbf16>, vector<256x128xf32> -> vector<256x128xf32>
    %cst_35 = arith.constant dense<0xFF800000> : vector<256xf32>
    %43 = vector.multi_reduction <maximumf>, %42, %cst_35 [1] : vector<256x128xf32> to vector<256xf32>
    %44 = vector.shape_cast %43 : vector<256xf32> to vector<256x1xf32>
    %c0_36 = arith.constant 0 : index
    %c512_37 = arith.constant 512 : index
    %c0_38 = arith.constant 0 : index
    %45 = vector.load %arg8[%c0_36, %c512_37, %c0_38] : memref<1x1024x1xf32, #tpu.memory_space<vmem>>, vector<1x256x1xf32>
    %46 = vector.shape_cast %45 : vector<1x256x1xf32> to vector<256x1xf32>
    %47 = arith.maximumf %46, %44 : vector<256x1xf32>
    %c0_39 = arith.constant 0 : index
    %c512_40 = arith.constant 512 : index
    %c0_41 = arith.constant 0 : index
    %48 = vector.load %arg8[%c0_39, %c512_40, %c0_41] : memref<1x1024x1xf32, #tpu.memory_space<vmem>>, vector<1x256x1xf32>
    %49 = vector.shape_cast %48 : vector<1x256x1xf32> to vector<256x1xf32>
    %50 = vector.shape_cast %47 : vector<256x1xf32> to vector<1x256x1xf32>
    tpu.vector_store %arg8[%c0_39, %c512_40, %c0_41], %50 {strides = array<i32>} : memref<1x1024x1xf32, #tpu.memory_space<vmem>>, vector<1x256x1xf32>,
    %c768 = arith.constant 768 : index
    %c0_42 = arith.constant 0 : index
    %51 = vector.load %arg7[%c768, %c0_42] : memref<1024x128xbf16, #tpu.memory_space<vmem>>, vector<256x128xbf16>
    %cst_43 = arith.constant dense<0.000000e+00> : vector<256x128xf32>
    %52 = tpu.matmul %51, %20, %cst_43 {dimension_numbers = #tpu.dot_dimension_numbers<[1], [0], [0], [1], [0, 0, 1, 1], [], []>} : vector<256x128xbf16>, vector<128x128xbf16>, vector<256x128xf32> -> vector<256x128xf32>
    %cst_44 = arith.constant dense<0xFF800000> : vector<256xf32>
    %53 = vector.multi_reduction <maximumf>, %52, %cst_44 [1] : vector<256x128xf32> to vector<256xf32>
    %54 = vector.shape_cast %53 : vector<256xf32> to vector<256x1xf32>
    %c0_45 = arith.constant 0 : index
    %c768_46 = arith.constant 768 : index
    %c0_47 = arith.constant 0 : index
    %55 = vector.load %arg8[%c0_45, %c768_46, %c0_47] : memref<1x1024x1xf32, #tpu.memory_space<vmem>>, vector<1x256x1xf32>
    %56 = vector.shape_cast %55 : vector<1x256x1xf32> to vector<256x1xf32>
    %57 = arith.maximumf %56, %54 : vector<256x1xf32>
    %c0_48 = arith.constant 0 : index
    %c768_49 = arith.constant 768 : index
    %c0_50 = arith.constant 0 : index
    %58 = vector.load %arg8[%c0_48, %c768_49, %c0_50] : memref<1x1024x1xf32, #tpu.memory_space<vmem>>, vector<1x256x1xf32>
    %59 = vector.shape_cast %58 : vector<1x256x1xf32> to vector<256x1xf32>
    %60 = vector.shape_cast %57 : vector<256x1xf32> to vector<1x256x1xf32>
    tpu.vector_store %arg8[%c0_48, %c768_49, %c0_50], %60 {strides = array<i32>} : memref<1x1024x1xf32, #tpu.memory_space<vmem>>, vector<1x256x1xf32>,
    return
  }
  func.func @transform_0(%arg0: i32, %arg1: i32) -> (i32, i32, i32) {
    %c0_i32 = arith.constant 0 : i32
    %c0_i32_0 = arith.constant 0 : i32
    return %arg0, %c0_i32, %arg1 : i32, i32, i32
  }
  func.func @transform_1(%arg0: i32, %arg1: i32) -> (i32, i32) {
    %c0_i32 = arith.constant 0 : i32
    %c0_i32_0 = arith.constant 0 : i32
    %c0_i32_1 = arith.constant 0 : i32
    return %c0_i32, %c0_i32_0 : i32, i32
  }
  func.func @transform_2(%arg0: i32, %arg1: i32) -> (i32, i32) {
    %c0_i32 = arith.constant 0 : i32
    %c0_i32_0 = arith.constant 0 : i32
    %c0_i32_1 = arith.constant 0 : i32
    return %c0_i32, %c0_i32_0 : i32, i32
  }
  func.func @transform_3(%arg0: i32, %arg1: i32) -> (i32, i32) {
    %c0_i32 = arith.constant 0 : i32
    %c0_i32_0 = arith.constant 0 : i32
    %c0_i32_1 = arith.constant 0 : i32
    return %c0_i32, %c0_i32_0 : i32, i32
  }
  func.func @transform_4(%arg0: i32, %arg1: i32) -> (i32, i32) {
    %c0_i32 = arith.constant 0 : i32
    %c0_i32_0 = arith.constant 0 : i32
    %c0_i32_1 = arith.constant 0 : i32
    return %c0_i32, %c0_i32_0 : i32, i32
  }
  func.func @transform_5(%arg0: i32, %arg1: i32) -> (i32, i32) {
    %c0_i32 = arith.constant 0 : i32
    %c0_i32_0 = arith.constant 0 : i32
    %c0_i32_1 = arith.constant 0 : i32
    return %c0_i32, %c0_i32_0 : i32, i32
  }
  func.func @transform_6(%arg0: i32, %arg1: i32) -> (i32, i32, i32) {
    %c0_i32 = arith.constant 0 : i32
    %c0_i32_0 = arith.constant 0 : i32
    %c0_i32_1 = arith.constant 0 : i32
    return %arg0, %c0_i32, %c0_i32_0 : i32, i32, i32
  }
}

module attributes {stable_mosaic.version = 11 : i64} {
  func.func @_fusion_head_kernel(%arg0: memref<2x1024xf32, #tpu.memory_space<vmem>>, %arg1: memref<2x256xbf16, #tpu.memory_space<vmem>>, %arg2: memref<1x1024xf32, #tpu.memory_space<vmem>>, %arg3: memref<1024x512xbf16, #tpu.memory_space<vmem>>, %arg4: memref<1x512xf32, #tpu.memory_space<vmem>>, %arg5: memref<256x512xbf16, #tpu.memory_space<vmem>>, %arg6: memref<1x512xf32, #tpu.memory_space<vmem>>, %arg7: memref<512x512xbf16, #tpu.memory_space<vmem>>, %arg8: memref<512x512xbf16, #tpu.memory_space<vmem>>, %arg9: memref<1x512xf32, #tpu.memory_space<vmem>>, %arg10: memref<512x256xbf16, #tpu.memory_space<vmem>>, %arg11: memref<1x256xf32, #tpu.memory_space<vmem>>, %arg12: memref<256x128xbf16, #tpu.memory_space<vmem>>, %arg13: memref<1x128xf32, #tpu.memory_space<vmem>>, %arg14: memref<128x128xbf16, #tpu.memory_space<vmem>>, %arg15: memref<1x128xf32, #tpu.memory_space<vmem>>, %arg16: memref<2x128xf32, #tpu.memory_space<vmem>>) attributes {dimension_semantics = [], scalar_prefetch = 0 : i64, scratch_operands = 0 : i64, tpu.core_type = #tpu.core_type<tc>} {
    %c0 = arith.constant 0 : index
    %c0_0 = arith.constant 0 : index
    %0 = vector.load %arg0[%c0, %c0_0] : memref<2x1024xf32, #tpu.memory_space<vmem>>, vector<2x1024xf32>
    %c0_1 = arith.constant 0 : index
    %c0_2 = arith.constant 0 : index
    %1 = vector.load %arg2[%c0_1, %c0_2] : memref<1x1024xf32, #tpu.memory_space<vmem>>, vector<1x1024xf32>
    %2 = vector.broadcast %1 : vector<1x1024xf32> to vector<2x1024xf32>
    %3 = arith.addf %0, %2 : vector<2x1024xf32>
    %4 = arith.truncf %3 : vector<2x1024xf32> to vector<2x1024xbf16>
    %c0_3 = arith.constant 0 : index
    %c0_4 = arith.constant 0 : index
    %5 = vector.load %arg3[%c0_3, %c0_4] : memref<1024x512xbf16, #tpu.memory_space<vmem>>, vector<1024x512xbf16>
    %cst = arith.constant dense<0.000000e+00> : vector<2x512xf32>
    %6 = tpu.matmul %4, %5, %cst {dimension_numbers = #tpu.dot_dimension_numbers<[1], [0], [0], [1], [0, 0, 1, 1], [], []>} : vector<2x1024xbf16>, vector<1024x512xbf16>, vector<2x512xf32> -> vector<2x512xf32>
    %c0_5 = arith.constant 0 : index
    %c0_6 = arith.constant 0 : index
    %7 = vector.load %arg4[%c0_5, %c0_6] : memref<1x512xf32, #tpu.memory_space<vmem>>, vector<1x512xf32>
    %8 = vector.broadcast %7 : vector<1x512xf32> to vector<2x512xf32>
    %9 = arith.addf %6, %8 : vector<2x512xf32>
    %cst_7 = arith.constant 0.000000e+00 : f32
    %10 = vector.broadcast %cst_7 : f32 to vector<2x512xf32>
    %11 = arith.maximumf %9, %10 : vector<2x512xf32>
    %c0_8 = arith.constant 0 : index
    %c0_9 = arith.constant 0 : index
    %12 = vector.load %arg1[%c0_8, %c0_9] : memref<2x256xbf16, #tpu.memory_space<vmem>>, vector<2x256xbf16>
    %c0_10 = arith.constant 0 : index
    %c0_11 = arith.constant 0 : index
    %13 = vector.load %arg5[%c0_10, %c0_11] : memref<256x512xbf16, #tpu.memory_space<vmem>>, vector<256x512xbf16>
    %cst_12 = arith.constant dense<0.000000e+00> : vector<2x512xf32>
    %14 = tpu.matmul %12, %13, %cst_12 {dimension_numbers = #tpu.dot_dimension_numbers<[1], [0], [0], [1], [0, 0, 1, 1], [], []>} : vector<2x256xbf16>, vector<256x512xbf16>, vector<2x512xf32> -> vector<2x512xf32>
    %c0_13 = arith.constant 0 : index
    %c0_14 = arith.constant 0 : index
    %15 = vector.load %arg6[%c0_13, %c0_14] : memref<1x512xf32, #tpu.memory_space<vmem>>, vector<1x512xf32>
    %16 = vector.broadcast %15 : vector<1x512xf32> to vector<2x512xf32>
    %17 = arith.addf %14, %16 : vector<2x512xf32>
    %cst_15 = arith.constant 0.000000e+00 : f32
    %18 = vector.broadcast %cst_15 : f32 to vector<2x512xf32>
    %19 = arith.maximumf %17, %18 : vector<2x512xf32>
    %20 = arith.truncf %11 : vector<2x512xf32> to vector<2x512xbf16>
    %c0_16 = arith.constant 0 : index
    %c0_17 = arith.constant 0 : index
    %21 = vector.load %arg7[%c0_16, %c0_17] : memref<512x512xbf16, #tpu.memory_space<vmem>>, vector<512x512xbf16>
    %cst_18 = arith.constant dense<0.000000e+00> : vector<2x512xf32>
    %22 = tpu.matmul %20, %21, %cst_18 {dimension_numbers = #tpu.dot_dimension_numbers<[1], [0], [0], [1], [0, 0, 1, 1], [], []>} : vector<2x512xbf16>, vector<512x512xbf16>, vector<2x512xf32> -> vector<2x512xf32>
    %23 = arith.truncf %19 : vector<2x512xf32> to vector<2x512xbf16>
    %c0_19 = arith.constant 0 : index
    %c0_20 = arith.constant 0 : index
    %24 = vector.load %arg8[%c0_19, %c0_20] : memref<512x512xbf16, #tpu.memory_space<vmem>>, vector<512x512xbf16>
    %cst_21 = arith.constant dense<0.000000e+00> : vector<2x512xf32>
    %25 = tpu.matmul %23, %24, %cst_21 {dimension_numbers = #tpu.dot_dimension_numbers<[1], [0], [0], [1], [0, 0, 1, 1], [], []>} : vector<2x512xbf16>, vector<512x512xbf16>, vector<2x512xf32> -> vector<2x512xf32>
    %26 = arith.addf %22, %25 : vector<2x512xf32>
    %c0_22 = arith.constant 0 : index
    %c0_23 = arith.constant 0 : index
    %27 = vector.load %arg9[%c0_22, %c0_23] : memref<1x512xf32, #tpu.memory_space<vmem>>, vector<1x512xf32>
    %28 = vector.broadcast %27 : vector<1x512xf32> to vector<2x512xf32>
    %29 = arith.addf %26, %28 : vector<2x512xf32>
    %cst_24 = arith.constant 0.000000e+00 : f32
    %30 = vector.broadcast %cst_24 : f32 to vector<2x512xf32>
    %31 = arith.maximumf %29, %30 : vector<2x512xf32>
    %32 = arith.truncf %31 : vector<2x512xf32> to vector<2x512xbf16>
    %c0_25 = arith.constant 0 : index
    %c0_26 = arith.constant 0 : index
    %33 = vector.load %arg10[%c0_25, %c0_26] : memref<512x256xbf16, #tpu.memory_space<vmem>>, vector<512x256xbf16>
    %cst_27 = arith.constant dense<0.000000e+00> : vector<2x256xf32>
    %34 = tpu.matmul %32, %33, %cst_27 {dimension_numbers = #tpu.dot_dimension_numbers<[1], [0], [0], [1], [0, 0, 1, 1], [], []>} : vector<2x512xbf16>, vector<512x256xbf16>, vector<2x256xf32> -> vector<2x256xf32>
    %c0_28 = arith.constant 0 : index
    %c0_29 = arith.constant 0 : index
    %35 = vector.load %arg11[%c0_28, %c0_29] : memref<1x256xf32, #tpu.memory_space<vmem>>, vector<1x256xf32>
    %36 = vector.broadcast %35 : vector<1x256xf32> to vector<2x256xf32>
    %37 = arith.addf %34, %36 : vector<2x256xf32>
    %cst_30 = arith.constant 0.000000e+00 : f32
    %38 = vector.broadcast %cst_30 : f32 to vector<2x256xf32>
    %39 = arith.maximumf %37, %38 : vector<2x256xf32>
    %40 = arith.truncf %39 : vector<2x256xf32> to vector<2x256xbf16>
    %c0_31 = arith.constant 0 : index
    %c0_32 = arith.constant 0 : index
    %41 = vector.load %arg12[%c0_31, %c0_32] : memref<256x128xbf16, #tpu.memory_space<vmem>>, vector<256x128xbf16>
    %cst_33 = arith.constant dense<0.000000e+00> : vector<2x128xf32>
    %42 = tpu.matmul %40, %41, %cst_33 {dimension_numbers = #tpu.dot_dimension_numbers<[1], [0], [0], [1], [0, 0, 1, 1], [], []>} : vector<2x256xbf16>, vector<256x128xbf16>, vector<2x128xf32> -> vector<2x128xf32>
    %c0_34 = arith.constant 0 : index
    %c0_35 = arith.constant 0 : index
    %43 = vector.load %arg13[%c0_34, %c0_35] : memref<1x128xf32, #tpu.memory_space<vmem>>, vector<1x128xf32>
    %44 = vector.broadcast %43 : vector<1x128xf32> to vector<2x128xf32>
    %45 = arith.addf %42, %44 : vector<2x128xf32>
    %cst_36 = arith.constant 0.000000e+00 : f32
    %46 = vector.broadcast %cst_36 : f32 to vector<2x128xf32>
    %47 = arith.maximumf %45, %46 : vector<2x128xf32>
    %48 = arith.truncf %47 : vector<2x128xf32> to vector<2x128xbf16>
    %c0_37 = arith.constant 0 : index
    %c0_38 = arith.constant 0 : index
    %49 = vector.load %arg14[%c0_37, %c0_38] : memref<128x128xbf16, #tpu.memory_space<vmem>>, vector<128x128xbf16>
    %cst_39 = arith.constant dense<0.000000e+00> : vector<2x128xf32>
    %50 = tpu.matmul %48, %49, %cst_39 {dimension_numbers = #tpu.dot_dimension_numbers<[1], [0], [0], [1], [0, 0, 1, 1], [], []>} : vector<2x128xbf16>, vector<128x128xbf16>, vector<2x128xf32> -> vector<2x128xf32>
    %c0_40 = arith.constant 0 : index
    %c0_41 = arith.constant 0 : index
    %51 = vector.load %arg15[%c0_40, %c0_41] : memref<1x128xf32, #tpu.memory_space<vmem>>, vector<1x128xf32>
    %52 = vector.broadcast %51 : vector<1x128xf32> to vector<2x128xf32>
    %53 = arith.addf %50, %52 : vector<2x128xf32>
    %cst_42 = arith.constant 0.000000e+00 : f32
    %54 = vector.broadcast %cst_42 : f32 to vector<2x128xf32>
    %55 = arith.maximumf %53, %54 : vector<2x128xf32>
    %c0_43 = arith.constant 0 : index
    %c0_44 = arith.constant 0 : index
    %56 = vector.load %arg16[%c0_43, %c0_44] : memref<2x128xf32, #tpu.memory_space<vmem>>, vector<2x128xf32>
    tpu.vector_store %arg16[%c0_43, %c0_44], %55 {strides = array<i32>} : memref<2x128xf32, #tpu.memory_space<vmem>>, vector<2x128xf32>,
    return
  }
}

</mosaic_0001>

<bundles_post_ra>
// kernel: pointnet_plus_conv_forward.2
= control target key start
LH: loop header
LB: loop body
LE: loop exit
PB: predicated region body
PF: predicated region fallthrough
CT: control target
= control target key end

     0   :  { %s3342_s21 = smov 0   ;;  %s3344_s22 = smov 0   ;;  %s4814_s0 = inlined_call_operand.vmem [shape: bf16[2,8,128], index: 0, kind: input, shape index: {}]   ;;  %s4815_s1 = inlined_call_operand.vmem [shape: bf16[64,8], index: 1, kind: input, shape index: {}]   ;;  %s4816_s2 = inlined_call_operand.vmem [shape: f32[64,1], index: 2, kind: input, shape index: {}]   ;;  %s4817_s3 = inlined_call_operand.vmem [shape: bf16[128,64], index: 3, kind: input, shape index: {}]   ;;  %s4818_s4 = inlined_call_operand.vmem [shape: f32[128,1], index: 4, kind: input, shape index: {}]   ;;  %s4819_s5 = inlined_call_operand.vmem [shape: bf16[1024,128], index: 5, kind: input, shape index: {}]   ;;  %s4820_s6 = inlined_call_operand.vmem [shape: f32[2,1024,1], index: 6, kind: output, shape index: {}]  }
   0x1   :  { %s3346_s23 = smov 0  }
   0x2 LB: > { %s28_s24 = sadd.s32 1, %s3299_s22  ;;  %p2742_p0 = scmp.ge.s32.totalorder %s3303_s23, 1  ;;  %s3303_s23 = sphi %s3346_s23, %s16_s23   ;;  %s3299_s22 = sphi %s3344_s22, %s4830_s22   ;;  %s3295_s21 = sphi %s3342_s21, %s4829_s21  }
   0x3   : > { %p30_p1 = scmp.ge.s32.totalorder %s28_s24, 2  ;;  %p228_p2 = scmp.lt.s32.totalorder %s3303_s23, 3 }
   0x5   : > { %s4832_s24 = smov (%p30_p1, %s28_s24), 0  ;;  %p229_p3 = pnand %p2742_p0, %p228_p2 }
   0x7   : > { %232 = sbr.rel (%p229_p3) target bundleno = 1127 (0x467), region = 44 }
   0xe   : > { %p260_p4 = scmp.lt.s32.totalorder %s3295_s21, 1  ;;  %v3205_v0 = vld [vmem:[%s4815_s1] sm:$0xff]   ;;  %vm483_vm0 = vcmask 64512   ;;  %vm496_vm1 = vcmask 1043456   ;;  %v3305_v1 = vmov 0   ;;  %v417_v3 = vld [vmem:[%s4816_s2 + $0x10] sm:$0xff] }
   0xf   : > { %2952 = vmatprep.mubr.msk.bf16.mxu0 %vm483_vm0, %v3205_v0  ;;  %3203 = vset.pattern.permute.xlu0 %v3305_v1  ;;  %v415_v2 = vld [vmem:[%s4816_s2] sm:$0xff]  ;;  %v416_v5 = vld [vmem:[%s4816_s2 + $0x8] sm:$0xff]  ;;  %v418_v6 = vld [vmem:[%s4816_s2 + $0x18] sm:$0xff]  ;;  %vm729_vm2 = vcmask 523264   ;;  %vm277_vm3 = vcmask 7168  }
  0x10   : > { %s4834_s21 = smov (!%p260_p4, %s3295_s21), 1  ;;  %3204 = vset.pattern.permute.xlu1 %v3305_v1  ;;  %425 = vperm.xlu0 %3203, %v415_v2   ;;  %v3206_v8 = vld [vmem:[%s4815_s1 + $0x8] sm:$0xff]   ;;  %v3207_v9 = vld [vmem:[%s4815_s1 + $0x10] sm:$0xff]   ;;  %v419_v10 = vld [vmem:[%s4816_s2 + $0x20] sm:$0xff] }
  0x11   : > { %s2743_s27 = sshll.u32 %s4834_s21, 2  ;;  %435 = vperm.xlu1 %3204, %v417_v3   ;;  %v420_v11 = vld [vmem:[%s4816_s2 + $0x28] sm:$0xff]  ;;  %v421_v12 = vld [vmem:[%s4816_s2 + $0x30] sm:$0xff]  ;;  %v422_v13 = vld [vmem:[%s4816_s2 + $0x38] sm:$0xff]  ;;  %s2836_s29 = sshll.u32 %s4834_s21, 10 }
  0x12   : > { %s266_s10 = scalar_lea.vmem %s4814_s0, %s2743_s27  ;;  %v3208_v14 = vld [vmem:[%s4815_s1 + $0x18] sm:$0xff]   ;;  %v593_v15 = vld [vmem:[%s4818_s4] sm:$0xff]  ;;  %v594_v16 = vld [vmem:[%s4818_s4 + $0x8] sm:$0xff]  ;;  %s3770_s8 = scalar_lea.vmem %s4820_s6, %s2836_s29 }
  0x13   : > { %v406_v4 = vld [vmem:[%s266_s10] sm:$0xf]  ;;  %v595_v17 = vld [vmem:[%s4818_s4 + $0x10] sm:$0xff]  ;;  %v596_v18 = vld [vmem:[%s4818_s4 + $0x18] sm:$0xff] }
  0x14   : > { %3176 = vmatprep.subr.msk.bf16.mxu0 %vm496_vm1, %v406_v4  ;;  %v498_v7 = vsel %vm496_vm1, %v406_v4, 0  ;;  %430 = vperm.xlu0 %3203, %v416_v5   ;;  %v597_v19 = vld [vmem:[%s4818_s4 + $0x20] sm:$0xff]  ;;  %v598_v20 = vld [vmem:[%s4818_s4 + $0x28] sm:$0xff]  ;;  %v599_v21 = vld [vmem:[%s4818_s4 + $0x30] sm:$0xff] }
  0x15   : > { %2951 = vmatpush3.bf16.msra.mxu0 %v498_v7  ;;  %440 = vperm.xlu1 %3204, %v418_v6   ;;  %v600_v22 = vld [vmem:[%s4818_s4 + $0x38] sm:$0xff]  ;;  %v601_v23 = vld [vmem:[%s4818_s4 + $0x40] sm:$0xff]  ;;  %v602_v24 = vld [vmem:[%s4818_s4 + $0x48] sm:$0xff] }
  0x16   : > { %v603_v25 = vld [vmem:[%s4818_s4 + $0x50] sm:$0xff]  ;;  %v604_v26 = vld [vmem:[%s4818_s4 + $0x58] sm:$0xff]  ;;  %v605_v27 = vld [vmem:[%s4818_s4 + $0x60] sm:$0xff] }
  0x17   : > { %v606_v28 = vld [vmem:[%s4818_s4 + $0x68] sm:$0xff]  ;;  %v607_v29 = vld [vmem:[%s4818_s4 + $0x70] sm:$0xff]  ;;  %v608_v30 = vld [vmem:[%s4818_s4 + $0x78] sm:$0xff] }
  0x18   : > { %2953 = vmatmul.mubr.msk.bf16.vlgmr.msra.gmra.mrb[0].mxu0 %vm483_vm0, %v3206_v8  ;;  %445 = vperm.xlu0 %3203, %v419_v10   ;;  %v3209_v31 = vld [vmem:[%s4817_s3] sm:$0xff]   ;;  %v3210_v4 = vld [vmem:[%s4817_s3 + $0x8] sm:$0xff]   ;;  %v3211_v5 = vld [vmem:[%s4817_s3 + $0x10] sm:$0xff]  }
  0x19   : > { %2956 = vmatprep.mubr.msk.bf16.mxu0 %vm483_vm0, %v3207_v9  ;;  %450 = vperm.xlu1 %3204, %v420_v11   ;;  %v3212_v6 = vld [vmem:[%s4817_s3 + $0x18] sm:$0xff]   ;;  %v3213_v7 = vld [vmem:[%s4817_s3 + $0x20] sm:$0xff]   ;;  %v3214_v8 = vld [vmem:[%s4817_s3 + $0x28] sm:$0xff]  }
  0x1a   : > { %2968 = vmatprep.mubr.msk.bf16.mxu1 %vm729_vm2, %v3209_v31  ;;  %v3215_v9 = vld [vmem:[%s4817_s3 + $0x30] sm:$0xff]   ;;  %v3216_v10 = vld [vmem:[%s4817_s3 + $0x38] sm:$0xff]   ;;  %v3217_v11 = vld [vmem:[%s4819_s5] sm:$0xff]  }
  0x1c   : > { %455 = vperm.xlu0 %3203, %v421_v12   ;;  %v3218_v12 = vld [vmem:[%s4819_s5 + $0x80] sm:$0xff]  }
  0x1d   : > { %460 = vperm.xlu1 %3204, %v422_v13  }
  0x20   : > { %2957 = vmatmul.mubr.msk.bf16.gmra.mrb[4].mxu0 %vm483_vm0, %v3208_v14  ;;  %611 = vperm.xlu0 %3203, %v593_v15  }
  0x21   : > { %616 = vperm.xlu1 %3204, %v594_v16   ;;  %3000 = vmatprep.mubr.bf16.mxu0 %v3217_v11 }
  0x24   : > { %621 = vperm.xlu0 %3203, %v595_v17  }
  0x25   : > { %626 = vperm.xlu1 %3204, %v596_v18  }
  0x28   : > { %631 = vperm.xlu0 %3203, %v597_v19  }
  0x29   : > { %636 = vperm.xlu1 %3204, %v598_v20  }
  0x2c   : > { %641 = vperm.xlu0 %3203, %v599_v21  }
  0x2d   : > { %646 = vperm.xlu1 %3204, %v600_v22  }
  0x30   : > { %651 = vperm.xlu0 %3203, %v601_v23  }
  0x31   : > { %656 = vperm.xlu1 %3204, %v602_v24  }
  0x34   : > { %661 = vperm.xlu0 %3203, %v603_v25  }
  0x35   : > { %666 = vperm.xlu1 %3204, %v604_v26  }
  0x38   : > { %671 = vperm.xlu0 %3203, %v605_v27  }
  0x39   : > { %676 = vperm.xlu1 %3204, %v606_v28  }
  0x3c   : > { %681 = vperm.xlu0 %3203, %v607_v29  }
  0x3d   : > { %686 = vperm.xlu1 %3204, %v608_v30  }
  0x8f   : > { %v426_v32 = vpop.permute.xlu0 %425 }
  0x90   : > { %v436_v33 = vpop.permute.xlu1 %435 }
  0x93   : > { %v431_v34 = vpop.permute.xlu0 %430 }
  0x94   : > { %v441_v35 = vpop.permute.xlu1 %440 }
  0x97   : > { %v446_v39 = vpop.permute.xlu0 %445 }
  0x98   : > { %v451_v44 = vpop.permute.xlu1 %450 }
  0x9b   : > { %v456_v51 = vpop.permute.xlu0 %455 }
  0x9c   : > { %v461_v56 = vpop.permute.xlu1 %460 }
  0x9f   : > { %v612_v13 = vpop.permute.xlu0 %611 }
  0xa0   : > { %v617_v14 = vpop.permute.xlu1 %616 }
  0xa3   : > { %v622_v15 = vpop.permute.xlu0 %621 }
  0xa4   : > { %v627_v16 = vpop.permute.xlu1 %626 }
  0xa7   : > { %v632_v17 = vpop.permute.xlu0 %631 }
  0xa8   : > { %v637_v18 = vpop.permute.xlu1 %636 }
  0xab   : > { %v642_v19 = vpop.permute.xlu0 %641 }
  0xac   : > { %v647_v23 = vpop.permute.xlu1 %646 }
  0xaf   : > { %v652_v31 = vpop.permute.xlu0 %651 }
  0xeb   : > { %v2954_v36 = vpop.f32.mrb[0].mxu0 }
  0xec   : > { %v543_v37 = vadd.f32 %v2954_v36, %v436_v33  ;;  %v534_v38 = vpop.f32.mrb[1].mxu0 }
  0xed   : > { %v535_v40 = vadd.f32 %v534_v38, %v426_v32  ;;  %v2955_v41 = vpop.f32.mrb[2].mxu0 }
  0xee   : > { %v546_v42 = vadd.f32 %v2955_v41, %v441_v35  ;;  %v537_v43 = vpop.f32.mrb[3].mxu0  ;;  %v567_v46 = vmax.f32 %v543_v37, 0.0  ;;  %v657_v35 = vpop.permute.xlu1 %656 }
  0xef   : > { %v538_v45 = vadd.f32 %v537_v43, %v431_v34  ;;  %v565_v48 = vmax.f32 %v535_v40, 0.0 }
  0xf0   : > { %v568_v47 = vmax.f32 %v546_v42, 0.0 }
  0xf1   : > { %v566_v49 = vmax.f32 %v538_v45, 0.0 }
  0xf2   : > { %v590_v50 = vpack.c.bf16 %v568_v47, %v567_v46 }
  0xf3   : > { %v2958_v52 = vpop.f32.mrb[4].mxu0  ;;  %v589_v53 = vpack.c.bf16 %v566_v49, %v565_v48  ;;  %v667_v48 = vpop.permute.xlu1 %666 }
  0xf4   : > { %v559_v54 = vadd.f32 %v2958_v52, %v456_v51  ;;  %v550_v55 = vpop.f32.mrb[5].mxu0 }
  0xf5   : > { %v551_v57 = vadd.f32 %v550_v55, %v446_v39  ;;  %v2959_v58 = vpop.f32.mrb[6].mxu0  ;;  %2960 = vmatprep.subr.bf16.mxu1 %v589_v53 }
  0xf6   : > { %v562_v59 = vadd.f32 %v2959_v58, %v461_v56  ;;  %v553_v60 = vpop.f32.mrb[7].mxu0  ;;  %2961 = vmatpush3.bf16.msra.mxu1 %v589_v53  ;;  %v571_v62 = vmax.f32 %v559_v54, 0.0 }
  0xf7   : > { %v554_v61 = vadd.f32 %v553_v60, %v451_v44  ;;  %2962 = vmatprep.subr.bf16.mxu1 %v590_v50  ;;  %v569_v0 = vmax.f32 %v551_v57, 0.0  ;;  %v662_v44 = vpop.permute.xlu0 %661 }
  0xf8   : > { %v572_v63 = vmax.f32 %v562_v59, 0.0 }
  0xf9   : > { %v570_v1 = vmax.f32 %v554_v61, 0.0  ;;  %v677_v61 = vpop.permute.xlu1 %676 }
  0xfa   : > { %v592_v2 = vpack.c.bf16 %v572_v63, %v571_v62  ;;  %2963 = vmatpush3.bf16.msra.mxu1 %v590_v50 }
  0xfb   : > { %v591_v3 = vpack.c.bf16 %v570_v1, %v569_v0  ;;  %v672_v56 = vpop.permute.xlu0 %671 }
  0xfd   : > { %2964 = vmatprep.subr.bf16.mxu1 %v591_v3 }
  0xfe   : > { %2965 = vmatpush3.bf16.msra.mxu1 %v591_v3 }
  0xff   : > { %2966 = vmatprep.subr.bf16.mxu1 %v592_v2 }
 0x102   : > { %2967 = vmatpush3.bf16.msra.mxu1 %v592_v2 }
 0x105   : > { %2969 = vmatmul.mubr.msk.bf16.vlgmr.msra.gmra.mrb[0].mxu1 %vm729_vm2, %v3210_v4  ;;  %v682_v4 = vpop.permute.xlu0 %681 }
 0x106   : > { %2972 = vmatprep.mubr.msk.bf16.mxu1 %vm729_vm2, %v3211_v5 }
 0x10d   : > { %2973 = vmatmul.mubr.msk.bf16.gmra.mrb[4].mxu1 %vm729_vm2, %v3212_v6 }
 0x10e   : > { %2976 = vmatprep.mubr.msk.bf16.mxu1 %vm729_vm2, %v3213_v7 }
 0x115   : > { %2977 = vmatmul.mubr.msk.bf16.gmra.mrb[8].mxu1 %vm729_vm2, %v3214_v8 }
 0x116   : > { %2980 = vmatprep.mubr.msk.bf16.mxu1 %vm729_vm2, %v3215_v9  ;;  %v687_v9 = vpop.permute.xlu1 %686 }
 0x11d   : > { %2981 = vmatmul.mubr.msk.bf16.gmra.mrb[12].mxu1 %vm729_vm2, %v3216_v10 }
 0x11e   : > { %3048 = vmatprep.mubr.bf16.mxu1 %v3218_v12 }
 0x1d8   : > { %v2970_v20 = vpop.f32.mrb[0].mxu1 }
 0x1d9   : > { %v797_v21 = vadd.f32 %v2970_v20, %v622_v15  ;;  %v788_v22 = vpop.f32.mrb[1].mxu1 }
 0x1da   : > { %v789_v24 = vadd.f32 %v788_v22, %v612_v13  ;;  %v2971_v25 = vpop.f32.mrb[2].mxu1  ;;  %v3220_v22 = vld [vmem:[%s4819_s5 + $0x88] sm:$0xff]  }
 0x1db   : > { %v800_v26 = vadd.f32 %v2971_v25, %v627_v16  ;;  %v791_v27 = vpop.f32.mrb[3].mxu1  ;;  %v853_v29 = vmax.f32 %v797_v21, 0.0  ;;  %v3219_v21 = vld [vmem:[%s4819_s5 + $0x8] sm:$0xff]   ;;  %v3222_v25 = vld [vmem:[%s4819_s5 + $0x18] sm:$0xff]  }
 0x1dc   : > { %v792_v28 = vadd.f32 %v791_v27, %v617_v14  ;;  %v851_v32 = vmax.f32 %v789_v24, 0.0  ;;  %v3223_v24 = vld [vmem:[%s4819_s5 + $0x90] sm:$0xff]   ;;  %v3225_v27 = vld [vmem:[%s4819_s5 + $0x20] sm:$0xff]  }
 0x1dd   : > { %v854_v30 = vmax.f32 %v800_v26, 0.0  ;;  %v3224_v26 = vld [vmem:[%s4819_s5 + $0x98] sm:$0xff]  }
 0x1de   : > { %v852_v33 = vmax.f32 %v792_v28, 0.0  ;;  %v3227_v28 = vld [vmem:[%s4819_s5 + $0xa0] sm:$0xff]  }
 0x1df   : > { %v3492_v34 = vpack.c.bf16 %v854_v30, %v853_v29  ;;  %v3226_v29 = vld [vmem:[%s4819_s5 + $0x28] sm:$0xff]  }
 0x1e0   : > { %v3494_v36 = vpack.c.bf16 %v852_v33, %v851_v32  ;;  %v2974_v37 = vpop.f32.mrb[4].mxu1  ;;  %v3228_v30 = vld [vmem:[%s4819_s5 + $0xa8] sm:$0xff]   ;;  %v3231_v32 = vld [vmem:[%s4819_s5 + $0xb0] sm:$0xff]   ;;  %v3230_v33 = vld [vmem:[%s4819_s5 + $0x38] sm:$0xff]  }
 0x1e1   : > { %v813_v38 = vadd.f32 %v2974_v37, %v642_v19  ;;  %v804_v39 = vpop.f32.mrb[5].mxu1  ;;  %v3234_v37 = vld [vmem:[%s4819_s5 + $0x48] sm:$0xff]  }
 0x1e2   : > { %v805_v40 = vadd.f32 %v804_v39, %v632_v17  ;;  %v2975_v41 = vpop.f32.mrb[6].mxu1  ;;  %2984 = vmatprep.subr.bf16.mxu0 %v3494_v36  ;;  %3032 = vmatprep.subr.bf16.mxu1 %v3494_v36  ;;  %v3237_v39 = vld [vmem:[%s4819_s5 + $0x50] sm:$0xff]  }
 0x1e3   : > { %v816_v42 = vadd.f32 %v2975_v41, %v647_v23  ;;  %v807_v43 = vpop.f32.mrb[7].mxu1  ;;  %2985 = vmatpush3.bf16.msra.mxu0 %v3494_v36  ;;  %3033 = vmatpush3.bf16.msra.mxu1 %v3494_v36  ;;  %v857_v46 = vmax.f32 %v813_v38, 0.0  ;;  %v3221_v23 = vld [vmem:[%s4819_s5 + $0x10] sm:$0xff]   ;;  %v3236_v38 = vld [vmem:[%s4819_s5 + $0xc8] sm:$0xff]   ;;  %v3238_v41 = vld [vmem:[%s4819_s5 + $0x58] sm:$0xff]  }
 0x1e4   : > { %v808_v45 = vadd.f32 %v807_v43, %v637_v18  ;;  %2986 = vmatprep.subr.bf16.mxu0 %v3492_v34  ;;  %3034 = vmatprep.subr.bf16.mxu1 %v3492_v34  ;;  %v855_v49 = vmax.f32 %v805_v40, 0.0  ;;  %v3239_v40 = vld [vmem:[%s4819_s5 + $0xd0] sm:$0xff]   ;;  %v3241_v43 = vld [vmem:[%s4819_s5 + $0x60] sm:$0xff]  }
 0x1e5   : > { %v858_v47 = vmax.f32 %v816_v42, 0.0  ;;  %v3240_v42 = vld [vmem:[%s4819_s5 + $0xd8] sm:$0xff]  }
 0x1e6   : > { %v856_v50 = vmax.f32 %v808_v45, 0.0  ;;  %v3242_v45 = vld [vmem:[%s4819_s5 + $0x68] sm:$0xff]  }
 0x1e7   : > { %v3502_v51 = vpack.c.bf16 %v858_v47, %v857_v46  ;;  %2987 = vmatpush3.bf16.msra.mxu0 %v3492_v34  ;;  %3035 = vmatpush3.bf16.msra.mxu1 %v3492_v34  ;;  %v3244_v46 = vld [vmem:[%s4819_s5 + $0xe8] sm:$0xff]   ;;  %v3245_v47 = vld [vmem:[%s4819_s5 + $0x70] sm:$0xff]  }
 0x1e8   : > { %v3506_v52 = vpack.c.bf16 %v856_v50, %v855_v49  ;;  %v2978_v53 = vpop.f32.mrb[8].mxu1  ;;  %v3246_v49 = vld [vmem:[%s4819_s5 + $0x78] sm:$0xff]  }
 0x1e9   : > { %v829_v54 = vadd.f32 %v2978_v53, %v662_v44  ;;  %v820_v55 = vpop.f32.mrb[9].mxu1  ;;  %v3243_v44 = vld [vmem:[%s4819_s5 + $0xe0] sm:$0xff]   ;;  %v3248_v50 = vld [vmem:[%s4819_s5 + $0xf8] sm:$0xff]   ;;  %v3250_v53 = vld [vmem:[%s4819_s5 + $0x108] sm:$0xff]  }
 0x1ea   : > { %v821_v57 = vadd.f32 %v820_v55, %v652_v31  ;;  %v2979_v58 = vpop.f32.mrb[10].mxu1  ;;  %2988 = vmatprep.subr.bf16.mxu0 %v3506_v52  ;;  %3036 = vmatprep.subr.bf16.mxu1 %v3506_v52  ;;  %v3229_v31 = vld [vmem:[%s4819_s5 + $0x30] sm:$0xff]  }
 0x1eb   : > { %v832_v59 = vadd.f32 %v2979_v58, %v667_v48  ;;  %v823_v60 = vpop.f32.mrb[11].mxu1  ;;  %2989 = vmatpush3.bf16.msra.mxu0 %v3506_v52  ;;  %3037 = vmatpush3.bf16.msra.mxu1 %v3506_v52  ;;  %v861_v63 = vmax.f32 %v829_v54, 0.0  ;;  %v3247_v48 = vld [vmem:[%s4819_s5 + $0xf0] sm:$0xff]   ;;  %v3252_v54 = vld [vmem:[%s4819_s5 + $0x188] sm:$0xff]   ;;  %v3256_v58 = vld [vmem:[%s4819_s5 + $0x198] sm:$0xff]  }
 0x1ec   : > { %v824_v62 = vadd.f32 %v823_v60, %v657_v35  ;;  %2990 = vmatprep.subr.bf16.mxu0 %v3502_v51  ;;  %3038 = vmatprep.subr.bf16.mxu1 %v3502_v51  ;;  %v859_v1 = vmax.f32 %v821_v57, 0.0  ;;  %v3233_v35 = vld [vmem:[%s4819_s5 + $0x40] sm:$0xff]   ;;  %v3253_v55 = vld [vmem:[%s4819_s5 + $0x110] sm:$0xff]   ;;  %v3254_v57 = vld [vmem:[%s4819_s5 + $0x118] sm:$0xff]  }
 0x1ed   : > { %v862_v0 = vmax.f32 %v832_v59, 0.0  ;;  %v3257_v59 = vld [vmem:[%s4819_s5 + $0x120] sm:$0xff]  }
 0x1ee   : > { %v860_v2 = vmax.f32 %v824_v62, 0.0  ;;  %v3259_v60 = vld [vmem:[%s4819_s5 + $0x1a0] sm:$0xff]   ;;  %v3260_v62 = vld [vmem:[%s4819_s5 + $0x1a8] sm:$0xff]  }
 0x1ef   : > { %v3514_v3 = vpack.c.bf16 %v862_v0, %v861_v63  ;;  %2991 = vmatpush3.bf16.msra.mxu0 %v3502_v51  ;;  %3039 = vmatpush3.bf16.msra.mxu1 %v3502_v51  ;;  %v3261_v63 = vld [vmem:[%s4819_s5 + $0x130] sm:$0xff]  }
 0x1f0   : > { %v3518_v5 = vpack.c.bf16 %v860_v2, %v859_v1  ;;  %v2982_v6 = vpop.f32.mrb[12].mxu1  ;;  %v3263_v0 = vld [vmem:[%s4819_s5 + $0x1b0] sm:$0xff]   ;;  %v3262_v1 = vld [vmem:[%s4819_s5 + $0x138] sm:$0xff]  }
 0x1f1   : > { %v845_v7 = vadd.f32 %v2982_v6, %v682_v4  ;;  %v836_v8 = vpop.f32.mrb[13].mxu1  ;;  %v3264_v2 = vld [vmem:[%s4819_s5 + $0x1b8] sm:$0xff]   ;;  %v3267_v4 = vld [vmem:[%s4819_s5 + $0x1c0] sm:$0xff]   ;;  %v3268_v6 = vld [vmem:[%s4819_s5 + $0x1c8] sm:$0xff]  }
 0x1f2   : > { %v837_v10 = vadd.f32 %v836_v8, %v672_v56  ;;  %v2983_v11 = vpop.f32.mrb[14].mxu1  ;;  %2992 = vmatprep.subr.bf16.mxu0 %v3518_v5  ;;  %3040 = vmatprep.subr.bf16.mxu1 %v3518_v5  ;;  %v3255_v56 = vld [vmem:[%s4819_s5 + $0x190] sm:$0xff]  }
 0x1f3   : > { %v848_v12 = vadd.f32 %v2983_v11, %v687_v9  ;;  %v839_v13 = vpop.f32.mrb[15].mxu1  ;;  %2993 = vmatpush3.bf16.msra.mxu0 %v3518_v5  ;;  %3041 = vmatpush3.bf16.msra.mxu1 %v3518_v5  ;;  %v865_v15 = vmax.f32 %v845_v7, 0.0  ;;  %v3269_v7 = vld [vmem:[%s4819_s5 + $0x150] sm:$0xff]   ;;  %v3270_v9 = vld [vmem:[%s4819_s5 + $0x158] sm:$0xff]   ;;  %v3273_v11 = vld [vmem:[%s4819_s5 + $0x160] sm:$0xff]  }
 0x1f4   : > { %v840_v14 = vadd.f32 %v839_v13, %v677_v61  ;;  %2994 = vmatprep.subr.bf16.mxu0 %v3514_v3  ;;  %3042 = vmatprep.subr.bf16.mxu1 %v3514_v3  ;;  %v863_v17 = vmax.f32 %v837_v10, 0.0  ;;  %v3258_v61 = vld [vmem:[%s4819_s5 + $0x128] sm:$0xff]   ;;  %v3271_v8 = vld [vmem:[%s4819_s5 + $0x1d0] sm:$0xff]   ;;  %v3272_v10 = vld [vmem:[%s4819_s5 + $0x1d8] sm:$0xff]  }
 0x1f5   : > { %v866_v16 = vmax.f32 %v848_v12, 0.0  ;;  %v3275_v12 = vld [vmem:[%s4819_s5 + $0x1e0] sm:$0xff]   ;;  %v3274_v13 = vld [vmem:[%s4819_s5 + $0x168] sm:$0xff]  }
 0x1f6   : > { %v864_v18 = vmax.f32 %v840_v14, 0.0  ;;  %v3276_v14 = vld [vmem:[%s4819_s5 + $0x1e8] sm:$0xff]  }
 0x1f7   : > { %v3526_v19 = vpack.c.bf16 %v866_v16, %v865_v15  ;;  %2995 = vmatpush3.bf16.msra.mxu0 %v3514_v3  ;;  %3043 = vmatpush3.bf16.msra.mxu1 %v3514_v3  ;;  %v3277_v15 = vld [vmem:[%s4819_s5 + $0x170] sm:$0xff]  }
 0x1f8   : > { %v3530_v20 = vpack.c.bf16 %v864_v18, %v863_v17  ;;  %v3279_v16 = vld [vmem:[%s4819_s5 + $0x1f0] sm:$0xff]   ;;  %v3278_v17 = vld [vmem:[%s4819_s5 + $0x178] sm:$0xff]  }
 0x1f9   : > { %v3280_v18 = vld [vmem:[%s4819_s5 + $0x1f8] sm:$0xff]  }
 0x1fa   : > { %2996 = vmatprep.subr.bf16.mxu0 %v3530_v20  ;;  %3044 = vmatprep.subr.bf16.mxu1 %v3530_v20 }
 0x1fb   : > { %2997 = vmatpush3.bf16.msra.mxu0 %v3530_v20  ;;  %3045 = vmatpush3.bf16.msra.mxu1 %v3530_v20 }
 0x1fc   : > { %2998 = vmatprep.subr.bf16.mxu0 %v3526_v19  ;;  %3046 = vmatprep.subr.bf16.mxu1 %v3526_v19 }
 0x1ff   : > { %2999 = vmatpush3.bf16.msra.mxu0 %v3526_v19  ;;  %3047 = vmatpush3.bf16.msra.mxu1 %v3526_v19 }
 0x200   : > { %3080 = vmatprep.subr.bf16.mxu0 %v3494_v36  ;;  %3128 = vmatprep.subr.bf16.mxu1 %v3494_v36 }
 0x202   : > { %3001 = vmatmul.mubr.bf16.vlgmr.msra.gmra.mrb[8].mxu0 %v3219_v21  ;;  %3049 = vmatmul.mubr.bf16.vlgmr.msra.gmra.mrb[16].mxu1 %v3220_v22 }
 0x203   : > { %3081 = vmatpush3.bf16.msra.mxu0 %v3494_v36  ;;  %3129 = vmatpush3.bf16.msra.mxu1 %v3494_v36  ;;  %v3235_v36 = vld [vmem:[%s4819_s5 + $0xc0] sm:$0xff]  }
 0x204   : > { %3082 = vmatprep.subr.bf16.mxu0 %v3492_v34  ;;  %3130 = vmatprep.subr.bf16.mxu1 %v3492_v34 }
 0x205   : > { %3004 = vmatprep.mubr.bf16.mxu0 %v3221_v23  ;;  %3052 = vmatprep.mubr.bf16.mxu1 %v3223_v24 }
 0x207   : > { %3083 = vmatpush3.bf16.msra.mxu0 %v3492_v34  ;;  %3131 = vmatpush3.bf16.msra.mxu1 %v3492_v34  ;;  %v3232_v34 = vld [vmem:[%s4819_s5 + $0xb8] sm:$0xff]  }
 0x208   : > { %3084 = vmatprep.subr.bf16.mxu0 %v3506_v52  ;;  %3132 = vmatprep.subr.bf16.mxu1 %v3506_v52 }
 0x20a   : > { %3005 = vmatmul.mubr.bf16.gmra.mrb[12].mxu0 %v3222_v25  ;;  %3053 = vmatmul.mubr.bf16.gmra.mrb[20].mxu1 %v3224_v26 }
 0x20b   : > { %3085 = vmatpush3.bf16.msra.mxu0 %v3506_v52  ;;  %3133 = vmatpush3.bf16.msra.mxu1 %v3506_v52  ;;  %v3251_v52 = vld [vmem:[%s4819_s5 + $0x180] sm:$0xff]  }
 0x20c   : > { %3086 = vmatprep.subr.bf16.mxu0 %v3502_v51  ;;  %3134 = vmatprep.subr.bf16.mxu1 %v3502_v51 }
 0x20d   : > { %3008 = vmatprep.mubr.bf16.mxu0 %v3225_v27  ;;  %3056 = vmatprep.mubr.bf16.mxu1 %v3227_v28  ;;  %v3306_v27 = vmov -inf  }
 0x20e   : > { %312 = vst.msk [vmem:[%s3770_s8 + $0x110] sm:$0xff] %vm277_vm3, %v3306_v27  ;;  %278 = vst.msk [vmem:[%s3770_s8] sm:$0xff] %vm277_vm3, %v3306_v27 }
 0x20f   : > { %3087 = vmatpush3.bf16.msra.mxu0 %v3502_v51  ;;  %3135 = vmatpush3.bf16.msra.mxu1 %v3502_v51  ;;  %v3249_v51 = vld [vmem:[%s4819_s5 + $0x100] sm:$0xff]   ;;  %279 = vst.msk [vmem:[%s3770_s8 + $0x8] sm:$0xff] %vm277_vm3, %v3306_v27  ;;  %280 = vst.msk [vmem:[%s3770_s8 + $0x10] sm:$0xff] %vm277_vm3, %v3306_v27 }
 0x210   : > { %3088 = vmatprep.subr.bf16.mxu0 %v3518_v5  ;;  %3136 = vmatprep.subr.bf16.mxu1 %v3518_v5  ;;  %281 = vst.msk [vmem:[%s3770_s8 + $0x18] sm:$0xff] %vm277_vm3, %v3306_v27  ;;  %282 = vst.msk [vmem:[%s3770_s8 + $0x20] sm:$0xff] %vm277_vm3, %v3306_v27 }
 0x211   : > { %283 = vst.msk [vmem:[%s3770_s8 + $0x28] sm:$0xff] %vm277_vm3, %v3306_v27  ;;  %284 = vst.msk [vmem:[%s3770_s8 + $0x30] sm:$0xff] %vm277_vm3, %v3306_v27 }
 0x212   : > { %3009 = vmatmul.mubr.bf16.gmra.mrb[16].mxu0 %v3226_v29  ;;  %3057 = vmatmul.mubr.bf16.gmra.mrb[24].mxu1 %v3228_v30  ;;  %285 = vst.msk [vmem:[%s3770_s8 + $0x38] sm:$0xff] %vm277_vm3, %v3306_v27  ;;  %286 = vst.msk [vmem:[%s3770_s8 + $0x40] sm:$0xff] %vm277_vm3, %v3306_v27 }
 0x213   : > { %3089 = vmatpush3.bf16.msra.mxu0 %v3518_v5  ;;  %3137 = vmatpush3.bf16.msra.mxu1 %v3518_v5  ;;  %v3266_v5 = vld [vmem:[%s4819_s5 + $0x148] sm:$0xff]   ;;  %287 = vst.msk [vmem:[%s3770_s8 + $0x48] sm:$0xff] %vm277_vm3, %v3306_v27  ;;  %288 = vst.msk [vmem:[%s3770_s8 + $0x50] sm:$0xff] %vm277_vm3, %v3306_v27 }
 0x214   : > { %3090 = vmatprep.subr.bf16.mxu0 %v3514_v3  ;;  %3138 = vmatprep.subr.bf16.mxu1 %v3514_v3  ;;  %289 = vst.msk [vmem:[%s3770_s8 + $0x58] sm:$0xff] %vm277_vm3, %v3306_v27  ;;  %290 = vst.msk [vmem:[%s3770_s8 + $0x60] sm:$0xff] %vm277_vm3, %v3306_v27 }
 0x215   : > { %3012 = vmatprep.mubr.bf16.mxu0 %v3229_v31  ;;  %3060 = vmatprep.mubr.bf16.mxu1 %v3231_v32  ;;  %291 = vst.msk [vmem:[%s3770_s8 + $0x68] sm:$0xff] %vm277_vm3, %v3306_v27  ;;  %292 = vst.msk [vmem:[%s3770_s8 + $0x70] sm:$0xff] %vm277_vm3, %v3306_v27 }
 0x216   : > { %293 = vst.msk [vmem:[%s3770_s8 + $0x78] sm:$0xff] %vm277_vm3, %v3306_v27  ;;  %294 = vst.msk [vmem:[%s3770_s8 + $0x80] sm:$0xff] %vm277_vm3, %v3306_v27 }
 0x217   : > { %3091 = vmatpush3.bf16.msra.mxu0 %v3514_v3  ;;  %3139 = vmatpush3.bf16.msra.mxu1 %v3514_v3  ;;  %v3265_v3 = vld [vmem:[%s4819_s5 + $0x140] sm:$0xff]   ;;  %295 = vst.msk [vmem:[%s3770_s8 + $0x88] sm:$0xff] %vm277_vm3, %v3306_v27  ;;  %296 = vst.msk [vmem:[%s3770_s8 + $0x90] sm:$0xff] %vm277_vm3, %v3306_v27 }
 0x218   : > { %3092 = vmatprep.subr.bf16.mxu0 %v3530_v20  ;;  %3140 = vmatprep.subr.bf16.mxu1 %v3530_v20  ;;  %297 = vst.msk [vmem:[%s3770_s8 + $0x98] sm:$0xff] %vm277_vm3, %v3306_v27  ;;  %298 = vst.msk [vmem:[%s3770_s8 + $0xa0] sm:$0xff] %vm277_vm3, %v3306_v27 }
 0x219   : > { %299 = vst.msk [vmem:[%s3770_s8 + $0xa8] sm:$0xff] %vm277_vm3, %v3306_v27  ;;  %300 = vst.msk [vmem:[%s3770_s8 + $0xb0] sm:$0xff] %vm277_vm3, %v3306_v27 }
 0x21a   : > { %3013 = vmatmul.mubr.bf16.gmra.mrb[20].mxu0 %v3230_v33  ;;  %3061 = vmatmul.mubr.bf16.gmra.mrb[28].mxu1 %v3232_v34  ;;  %301 = vst.msk [vmem:[%s3770_s8 + $0xb8] sm:$0xff] %vm277_vm3, %v3306_v27  ;;  %302 = vst.msk [vmem:[%s3770_s8 + $0xc0] sm:$0xff] %vm277_vm3, %v3306_v27 }
 0x21b   : > { %3093 = vmatpush3.bf16.msra.mxu0 %v3530_v20  ;;  %3141 = vmatpush3.bf16.msra.mxu1 %v3530_v20  ;;  %303 = vst.msk [vmem:[%s3770_s8 + $0xc8] sm:$0xff] %vm277_vm3, %v3306_v27  ;;  %304 = vst.msk [vmem:[%s3770_s8 + $0xd0] sm:$0xff] %vm277_vm3, %v3306_v27 }
 0x21c   : > { %3094 = vmatprep.subr.bf16.mxu0 %v3526_v19  ;;  %3142 = vmatprep.subr.bf16.mxu1 %v3526_v19  ;;  %305 = vst.msk [vmem:[%s3770_s8 + $0xd8] sm:$0xff] %vm277_vm3, %v3306_v27  ;;  %306 = vst.msk [vmem:[%s3770_s8 + $0xe0] sm:$0xff] %vm277_vm3, %v3306_v27 }
 0x21d   : > { %3016 = vmatprep.mubr.bf16.mxu0 %v3233_v35  ;;  %3064 = vmatprep.mubr.bf16.mxu1 %v3235_v36  ;;  %307 = vst.msk [vmem:[%s3770_s8 + $0xe8] sm:$0xff] %vm277_vm3, %v3306_v27  ;;  %308 = vst.msk [vmem:[%s3770_s8 + $0xf0] sm:$0xff] %vm277_vm3, %v3306_v27 }
 0x21e   : > { %309 = vst.msk [vmem:[%s3770_s8 + $0xf8] sm:$0xff] %vm277_vm3, %v3306_v27  ;;  %310 = vst.msk [vmem:[%s3770_s8 + $0x100] sm:$0xff] %vm277_vm3, %v3306_v27 }
 0x21f   : > { %3095 = vmatpush3.bf16.msra.mxu0 %v3526_v19  ;;  %3143 = vmatpush3.bf16.msra.mxu1 %v3526_v19  ;;  %311 = vst.msk [vmem:[%s3770_s8 + $0x108] sm:$0xff] %vm277_vm3, %v3306_v27  ;;  %313 = vst.msk [vmem:[%s3770_s8 + $0x118] sm:$0xff] %vm277_vm3, %v3306_v27 }
 0x220   : > { %314 = vst.msk [vmem:[%s3770_s8 + $0x120] sm:$0xff] %vm277_vm3, %v3306_v27  ;;  %315 = vst.msk [vmem:[%s3770_s8 + $0x128] sm:$0xff] %vm277_vm3, %v3306_v27 }
 0x221   : > { %316 = vst.msk [vmem:[%s3770_s8 + $0x130] sm:$0xff] %vm277_vm3, %v3306_v27  ;;  %317 = vst.msk [vmem:[%s3770_s8 + $0x138] sm:$0xff] %vm277_vm3, %v3306_v27 }
 0x222   : > { %3017 = vmatmul.mubr.bf16.gmra.mrb[24].mxu0 %v3234_v37  ;;  %3065 = vmatmul.mubr.bf16.gmra.mrb[32].mxu1 %v3236_v38  ;;  %318 = vst.msk [vmem:[%s3770_s8 + $0x140] sm:$0xff] %vm277_vm3, %v3306_v27  ;;  %319 = vst.msk [vmem:[%s3770_s8 + $0x148] sm:$0xff] %vm277_vm3, %v3306_v27 }
 0x223   : > { %3020 = vmatprep.mubr.bf16.mxu0 %v3237_v39  ;;  %3068 = vmatprep.mubr.bf16.mxu1 %v3239_v40  ;;  %320 = vst.msk [vmem:[%s3770_s8 + $0x150] sm:$0xff] %vm277_vm3, %v3306_v27  ;;  %321 = vst.msk [vmem:[%s3770_s8 + $0x158] sm:$0xff] %vm277_vm3, %v3306_v27 }
 0x224   : > { %322 = vst.msk [vmem:[%s3770_s8 + $0x160] sm:$0xff] %vm277_vm3, %v3306_v27  ;;  %323 = vst.msk [vmem:[%s3770_s8 + $0x168] sm:$0xff] %vm277_vm3, %v3306_v27 }
 0x225   : > { %324 = vst.msk [vmem:[%s3770_s8 + $0x170] sm:$0xff] %vm277_vm3, %v3306_v27  ;;  %325 = vst.msk [vmem:[%s3770_s8 + $0x178] sm:$0xff] %vm277_vm3, %v3306_v27 }
 0x226   : > { %326 = vst.msk [vmem:[%s3770_s8 + $0x180] sm:$0xff] %vm277_vm3, %v3306_v27  ;;  %327 = vst.msk [vmem:[%s3770_s8 + $0x188] sm:$0xff] %vm277_vm3, %v3306_v27 }
 0x227   : > { %328 = vst.msk [vmem:[%s3770_s8 + $0x190] sm:$0xff] %vm277_vm3, %v3306_v27  ;;  %329 = vst.msk [vmem:[%s3770_s8 + $0x198] sm:$0xff] %vm277_vm3, %v3306_v27 }
 0x228   : > { %330 = vst.msk [vmem:[%s3770_s8 + $0x1a0] sm:$0xff] %vm277_vm3, %v3306_v27  ;;  %331 = vst.msk [vmem:[%s3770_s8 + $0x1a8] sm:$0xff] %vm277_vm3, %v3306_v27 }
 0x229   : > { %332 = vst.msk [vmem:[%s3770_s8 + $0x1b0] sm:$0xff] %vm277_vm3, %v3306_v27  ;;  %333 = vst.msk [vmem:[%s3770_s8 + $0x1b8] sm:$0xff] %vm277_vm3, %v3306_v27 }
 0x22a   : > { %3021 = vmatmul.mubr.bf16.gmra.mrb[28].mxu0 %v3238_v41  ;;  %3069 = vmatmul.mubr.bf16.gmra.mrb[36].mxu1 %v3240_v42  ;;  %334 = vst.msk [vmem:[%s3770_s8 + $0x1c0] sm:$0xff] %vm277_vm3, %v3306_v27  ;;  %335 = vst.msk [vmem:[%s3770_s8 + $0x1c8] sm:$0xff] %vm277_vm3, %v3306_v27 }
 0x22b   : > { %3024 = vmatprep.mubr.bf16.mxu0 %v3241_v43  ;;  %3072 = vmatprep.mubr.bf16.mxu1 %v3243_v44  ;;  %336 = vst.msk [vmem:[%s3770_s8 + $0x1d0] sm:$0xff] %vm277_vm3, %v3306_v27  ;;  %337 = vst.msk [vmem:[%s3770_s8 + $0x1d8] sm:$0xff] %vm277_vm3, %v3306_v27 }
 0x22c   : > { %338 = vst.msk [vmem:[%s3770_s8 + $0x1e0] sm:$0xff] %vm277_vm3, %v3306_v27  ;;  %339 = vst.msk [vmem:[%s3770_s8 + $0x1e8] sm:$0xff] %vm277_vm3, %v3306_v27 }
 0x22d   : > { %340 = vst.msk [vmem:[%s3770_s8 + $0x1f0] sm:$0xff] %vm277_vm3, %v3306_v27  ;;  %341 = vst.msk [vmem:[%s3770_s8 + $0x1f8] sm:$0xff] %vm277_vm3, %v3306_v27 }
 0x22e   : > { %342 = vst.msk [vmem:[%s3770_s8 + $0x200] sm:$0xff] %vm277_vm3, %v3306_v27  ;;  %343 = vst.msk [vmem:[%s3770_s8 + $0x208] sm:$0xff] %vm277_vm3, %v3306_v27 }
 0x22f   : > { %344 = vst.msk [vmem:[%s3770_s8 + $0x210] sm:$0xff] %vm277_vm3, %v3306_v27  ;;  %345 = vst.msk [vmem:[%s3770_s8 + $0x218] sm:$0xff] %vm277_vm3, %v3306_v27 }
 0x230   : > { %346 = vst.msk [vmem:[%s3770_s8 + $0x220] sm:$0xff] %vm277_vm3, %v3306_v27  ;;  %347 = vst.msk [vmem:[%s3770_s8 + $0x228] sm:$0xff] %vm277_vm3, %v3306_v27 }
 0x231   : > { %348 = vst.msk [vmem:[%s3770_s8 + $0x230] sm:$0xff] %vm277_vm3, %v3306_v27  ;;  %349 = vst.msk [vmem:[%s3770_s8 + $0x238] sm:$0xff] %vm277_vm3, %v3306_v27 }
 0x232   : > { %3025 = vmatmul.mubr.bf16.gmra.mrb[32].mxu0 %v3242_v45  ;;  %3073 = vmatmul.mubr.bf16.gmra.mrb[40].mxu1 %v3244_v46  ;;  %350 = vst.msk [vmem:[%s3770_s8 + $0x240] sm:$0xff] %vm277_vm3, %v3306_v27  ;;  %351 = vst.msk [vmem:[%s3770_s8 + $0x248] sm:$0xff] %vm277_vm3, %v3306_v27 }
 0x233   : > { %3028 = vmatprep.mubr.bf16.mxu0 %v3245_v47  ;;  %3076 = vmatprep.mubr.bf16.mxu1 %v3247_v48  ;;  %352 = vst.msk [vmem:[%s3770_s8 + $0x250] sm:$0xff] %vm277_vm3, %v3306_v27  ;;  %353 = vst.msk [vmem:[%s3770_s8 + $0x258] sm:$0xff] %vm277_vm3, %v3306_v27 }
 0x234   : > { %354 = vst.msk [vmem:[%s3770_s8 + $0x260] sm:$0xff] %vm277_vm3, %v3306_v27  ;;  %355 = vst.msk [vmem:[%s3770_s8 + $0x268] sm:$0xff] %vm277_vm3, %v3306_v27 }
 0x235   : > { %356 = vst.msk [vmem:[%s3770_s8 + $0x270] sm:$0xff] %vm277_vm3, %v3306_v27  ;;  %357 = vst.msk [vmem:[%s3770_s8 + $0x278] sm:$0xff] %vm277_vm3, %v3306_v27 }
 0x236   : > { %358 = vst.msk [vmem:[%s3770_s8 + $0x280] sm:$0xff] %vm277_vm3, %v3306_v27  ;;  %359 = vst.msk [vmem:[%s3770_s8 + $0x288] sm:$0xff] %vm277_vm3, %v3306_v27 }
 0x237   : > { %360 = vst.msk [vmem:[%s3770_s8 + $0x290] sm:$0xff] %vm277_vm3, %v3306_v27  ;;  %361 = vst.msk [vmem:[%s3770_s8 + $0x298] sm:$0xff] %vm277_vm3, %v3306_v27 }
 0x238   : > { %362 = vst.msk [vmem:[%s3770_s8 + $0x2a0] sm:$0xff] %vm277_vm3, %v3306_v27  ;;  %363 = vst.msk [vmem:[%s3770_s8 + $0x2a8] sm:$0xff] %vm277_vm3, %v3306_v27 }
 0x239   : > { %364 = vst.msk [vmem:[%s3770_s8 + $0x2b0] sm:$0xff] %vm277_vm3, %v3306_v27  ;;  %365 = vst.msk [vmem:[%s3770_s8 + $0x2b8] sm:$0xff] %vm277_vm3, %v3306_v27 }
 0x23a   : > { %3029 = vmatmul.mubr.bf16.gmra.mrb[36].mxu0 %v3246_v49  ;;  %3077 = vmatmul.mubr.bf16.gmra.mrb[44].mxu1 %v3248_v50  ;;  %366 = vst.msk [vmem:[%s3770_s8 + $0x2c0] sm:$0xff] %vm277_vm3, %v3306_v27  ;;  %367 = vst.msk [vmem:[%s3770_s8 + $0x2c8] sm:$0xff] %vm277_vm3, %v3306_v27 }
 0x23b   : > { %3096 = vmatprep.mubr.bf16.mxu0 %v3249_v51  ;;  %3144 = vmatprep.mubr.bf16.mxu1 %v3251_v52  ;;  %368 = vst.msk [vmem:[%s3770_s8 + $0x2d0] sm:$0xff] %vm277_vm3, %v3306_v27  ;;  %369 = vst.msk [vmem:[%s3770_s8 + $0x2d8] sm:$0xff] %vm277_vm3, %v3306_v27 }
 0x23c   : > { %370 = vst.msk [vmem:[%s3770_s8 + $0x2e0] sm:$0xff] %vm277_vm3, %v3306_v27  ;;  %371 = vst.msk [vmem:[%s3770_s8 + $0x2e8] sm:$0xff] %vm277_vm3, %v3306_v27 }
 0x23d   : > { %372 = vst.msk [vmem:[%s3770_s8 + $0x2f0] sm:$0xff] %vm277_vm3, %v3306_v27  ;;  %373 = vst.msk [vmem:[%s3770_s8 + $0x2f8] sm:$0xff] %vm277_vm3, %v3306_v27 }
 0x23e   : > { %374 = vst.msk [vmem:[%s3770_s8 + $0x300] sm:$0xff] %vm277_vm3, %v3306_v27  ;;  %375 = vst.msk [vmem:[%s3770_s8 + $0x308] sm:$0xff] %vm277_vm3, %v3306_v27 }
 0x23f   : > { %376 = vst.msk [vmem:[%s3770_s8 + $0x310] sm:$0xff] %vm277_vm3, %v3306_v27  ;;  %377 = vst.msk [vmem:[%s3770_s8 + $0x318] sm:$0xff] %vm277_vm3, %v3306_v27 }
 0x240   : > { %378 = vst.msk [vmem:[%s3770_s8 + $0x320] sm:$0xff] %vm277_vm3, %v3306_v27  ;;  %379 = vst.msk [vmem:[%s3770_s8 + $0x328] sm:$0xff] %vm277_vm3, %v3306_v27 }
 0x241   : > { %380 = vst.msk [vmem:[%s3770_s8 + $0x330] sm:$0xff] %vm277_vm3, %v3306_v27  ;;  %381 = vst.msk [vmem:[%s3770_s8 + $0x338] sm:$0xff] %vm277_vm3, %v3306_v27 }
 0x242   : > { %3097 = vmatmul.mubr.bf16.vlgmr.msra.gmra.mrb[40].mxu0 %v3250_v53  ;;  %3145 = vmatmul.mubr.bf16.vlgmr.msra.gmra.mrb[48].mxu1 %v3252_v54  ;;  %382 = vst.msk [vmem:[%s3770_s8 + $0x340] sm:$0xff] %vm277_vm3, %v3306_v27  ;;  %383 = vst.msk [vmem:[%s3770_s8 + $0x348] sm:$0xff] %vm277_vm3, %v3306_v27 }
 0x243   : > { %3100 = vmatprep.mubr.bf16.mxu0 %v3253_v55  ;;  %3148 = vmatprep.mubr.bf16.mxu1 %v3255_v56  ;;  %384 = vst.msk [vmem:[%s3770_s8 + $0x350] sm:$0xff] %vm277_vm3, %v3306_v27  ;;  %385 = vst.msk [vmem:[%s3770_s8 + $0x358] sm:$0xff] %vm277_vm3, %v3306_v27 }
 0x244   : > { %386 = vst.msk [vmem:[%s3770_s8 + $0x360] sm:$0xff] %vm277_vm3, %v3306_v27  ;;  %387 = vst.msk [vmem:[%s3770_s8 + $0x368] sm:$0xff] %vm277_vm3, %v3306_v27 }
 0x245   : > { %388 = vst.msk [vmem:[%s3770_s8 + $0x370] sm:$0xff] %vm277_vm3, %v3306_v27  ;;  %389 = vst.msk [vmem:[%s3770_s8 + $0x378] sm:$0xff] %vm277_vm3, %v3306_v27 }
 0x246   : > { %390 = vst.msk [vmem:[%s3770_s8 + $0x380] sm:$0xff] %vm277_vm3, %v3306_v27  ;;  %391 = vst.msk [vmem:[%s3770_s8 + $0x388] sm:$0xff] %vm277_vm3, %v3306_v27 }
 0x247   : > { %392 = vst.msk [vmem:[%s3770_s8 + $0x390] sm:$0xff] %vm277_vm3, %v3306_v27  ;;  %393 = vst.msk [vmem:[%s3770_s8 + $0x398] sm:$0xff] %vm277_vm3, %v3306_v27 }
 0x248   : > { %394 = vst.msk [vmem:[%s3770_s8 + $0x3a0] sm:$0xff] %vm277_vm3, %v3306_v27  ;;  %395 = vst.msk [vmem:[%s3770_s8 + $0x3a8] sm:$0xff] %vm277_vm3, %v3306_v27 }
 0x249   : > { %396 = vst.msk [vmem:[%s3770_s8 + $0x3b0] sm:$0xff] %vm277_vm3, %v3306_v27  ;;  %397 = vst.msk [vmem:[%s3770_s8 + $0x3b8] sm:$0xff] %vm277_vm3, %v3306_v27 }
 0x24a   : > { %3101 = vmatmul.mubr.bf16.gmra.mrb[44].mxu0 %v3254_v57  ;;  %3149 = vmatmul.mubr.bf16.gmra.mrb[52].mxu1 %v3256_v58  ;;  %398 = vst.msk [vmem:[%s3770_s8 + $0x3c0] sm:$0xff] %vm277_vm3, %v3306_v27  ;;  %399 = vst.msk [vmem:[%s3770_s8 + $0x3c8] sm:$0xff] %vm277_vm3, %v3306_v27 }
 0x24b   : > { %3104 = vmatprep.mubr.bf16.mxu0 %v3257_v59  ;;  %3152 = vmatprep.mubr.bf16.mxu1 %v3259_v60  ;;  %400 = vst.msk [vmem:[%s3770_s8 + $0x3d0] sm:$0xff] %vm277_vm3, %v3306_v27  ;;  %401 = vst.msk [vmem:[%s3770_s8 + $0x3d8] sm:$0xff] %vm277_vm3, %v3306_v27 }
 0x24c   : > { %402 = vst.msk [vmem:[%s3770_s8 + $0x3e0] sm:$0xff] %vm277_vm3, %v3306_v27  ;;  %403 = vst.msk [vmem:[%s3770_s8 + $0x3e8] sm:$0xff] %vm277_vm3, %v3306_v27 }
 0x24d   : > { %404 = vst.msk [vmem:[%s3770_s8 + $0x3f0] sm:$0xff] %vm277_vm3, %v3306_v27  ;;  %405 = vst.msk [vmem:[%s3770_s8 + $0x3f8] sm:$0xff] %vm277_vm3, %v3306_v27 }
 0x252   : > { %3105 = vmatmul.mubr.bf16.gmra.mrb[48].mxu0 %v3258_v61  ;;  %3153 = vmatmul.mubr.bf16.gmra.mrb[56].mxu1 %v3260_v62 }
 0x253   : > { %3108 = vmatprep.mubr.bf16.mxu0 %v3261_v63  ;;  %3156 = vmatprep.mubr.bf16.mxu1 %v3263_v0 }
 0x25a   : > { %3109 = vmatmul.mubr.bf16.gmra.mrb[52].mxu0 %v3262_v1  ;;  %3157 = vmatmul.mubr.bf16.gmra.mrb[60].mxu1 %v3264_v2 }
 0x25b   : > { %3112 = vmatprep.mubr.bf16.mxu0 %v3265_v3  ;;  %3160 = vmatprep.mubr.bf16.mxu1 %v3267_v4 }
 0x262   : > { %3113 = vmatmul.mubr.bf16.gmra.mrb[56].mxu0 %v3266_v5  ;;  %3161 = vmatmul.mubr.bf16.gmra.mrb[64].mxu1 %v3268_v6 }
 0x263   : > { %3116 = vmatprep.mubr.bf16.mxu0 %v3269_v7  ;;  %3164 = vmatprep.mubr.bf16.mxu1 %v3271_v8 }
 0x26a   : > { %3117 = vmatmul.mubr.bf16.gmra.mrb[60].mxu0 %v3270_v9  ;;  %3165 = vmatmul.mubr.bf16.gmra.mrb[68].mxu1 %v3272_v10 }
 0x26b   : > { %3120 = vmatprep.mubr.bf16.mxu0 %v3273_v11  ;;  %3168 = vmatprep.mubr.bf16.mxu1 %v3275_v12 }
 0x272   : > { %3121 = vmatmul.mubr.bf16.gmra.mrb[64].mxu0 %v3274_v13  ;;  %3169 = vmatmul.mubr.bf16.gmra.mrb[72].mxu1 %v3276_v14 }
 0x273   : > { %3124 = vmatprep.mubr.bf16.mxu0 %v3277_v15  ;;  %3172 = vmatprep.mubr.bf16.mxu1 %v3279_v16 }
 0x27a   : > { %3125 = vmatmul.mubr.bf16.gmra.mrb[68].mxu0 %v3278_v17  ;;  %3173 = vmatmul.mubr.bf16.gmra.mrb[76].mxu1 %v3280_v18 }
 0x2d5   : > { %v3002_v19 = vpop.f32.mrb[8].mxu0  ;;  %v3050_v20 = vpop.f32.mrb[16].mxu1 }
 0x2d6   : > { %1618 = vmax.xlane.f32.xlu1 %v3050_v20  ;;  %1168 = vmax.xlane.f32.xlu0 %v3002_v19  ;;  %v1037_v21 = vpop.f32.mrb[9].mxu0  ;;  %v1487_v22 = vpop.f32.mrb[17].mxu1 }
 0x2d7   : > { %v3759_v23 = vpop.f32.mrb[10].mxu0  ;;  %v3761_v24 = vpop.f32.mrb[18].mxu1 }
 0x2d8   : > { %v3763_v25 = vpop.f32.mrb[11].mxu0  ;;  %v3765_v26 = vpop.f32.mrb[19].mxu1 }
 0x2da   : > { %1614 = vmax.xlane.f32.xlu1 %v1487_v22  ;;  %1164 = vmax.xlane.f32.xlu0 %v1037_v21 }
 0x2dd   : > { %v3006_v28 = vpop.f32.mrb[12].mxu0  ;;  %v3054_v29 = vpop.f32.mrb[20].mxu1 }
 0x2de   : > { %1170 = vmax.xlane.f32.xlu0 %v3759_v23  ;;  %1166 = vmax.xlane.f32.xlu1 %v3763_v25  ;;  %v1053_v30 = vpop.f32.mrb[13].mxu0  ;;  %v1503_v31 = vpop.f32.mrb[21].mxu1 }
 0x2df   : > { %v3007_v32 = vpop.f32.mrb[14].mxu0  ;;  %v3055_v33 = vpop.f32.mrb[22].mxu1 }
 0x2e0   : > { %v1056_v34 = vpop.f32.mrb[15].mxu0  ;;  %v1506_v35 = vpop.f32.mrb[23].mxu1 }
 0x2e2   : > { %1620 = vmax.xlane.f32.xlu0 %v3761_v24  ;;  %1176 = vmax.xlane.f32.xlu1 %v3006_v28 }
 0x2e5   : > { %v3010_v36 = vpop.f32.mrb[16].mxu0  ;;  %v3058_v37 = vpop.f32.mrb[24].mxu1 }
 0x2e6   : > { %1616 = vmax.xlane.f32.xlu0 %v3765_v26  ;;  %1626 = vmax.xlane.f32.xlu1 %v3054_v29  ;;  %v1069_v38 = vpop.f32.mrb[17].mxu0  ;;  %v1519_v39 = vpop.f32.mrb[25].mxu1 }
 0x2e7   : > { %v3011_v40 = vpop.f32.mrb[18].mxu0  ;;  %v3059_v41 = vpop.f32.mrb[26].mxu1 }
 0x2e8   : > { %v1072_v42 = vpop.f32.mrb[19].mxu0  ;;  %v1522_v43 = vpop.f32.mrb[27].mxu1 }
 0x2ea   : > { %1172 = vmax.xlane.f32.xlu1 %v1053_v30  ;;  %1178 = vmax.xlane.f32.xlu0 %v3007_v32 }
 0x2ed   : > { %v3014_v44 = vpop.f32.mrb[20].mxu0  ;;  %v3062_v45 = vpop.f32.mrb[28].mxu1 }
 0x2ee   : > { %1622 = vmax.xlane.f32.xlu1 %v1503_v31  ;;  %1628 = vmax.xlane.f32.xlu0 %v3055_v33  ;;  %v1085_v46 = vpop.f32.mrb[21].mxu0  ;;  %v1535_v47 = vpop.f32.mrb[29].mxu1 }
 0x2ef   : > { %v3015_v48 = vpop.f32.mrb[22].mxu0  ;;  %v3063_v49 = vpop.f32.mrb[30].mxu1 }
 0x2f0   : > { %v1088_v50 = vpop.f32.mrb[23].mxu0  ;;  %v1538_v51 = vpop.f32.mrb[31].mxu1 }
 0x2f2   : > { %1174 = vmax.xlane.f32.xlu0 %v1056_v34  ;;  %1184 = vmax.xlane.f32.xlu1 %v3010_v36 }
 0x2f5   : > { %v3018_v52 = vpop.f32.mrb[24].mxu0  ;;  %v3066_v53 = vpop.f32.mrb[32].mxu1 }
 0x2f6   : > { %1624 = vmax.xlane.f32.xlu0 %v1506_v35  ;;  %1634 = vmax.xlane.f32.xlu1 %v3058_v37  ;;  %v1101_v54 = vpop.f32.mrb[25].mxu0  ;;  %v1551_v55 = vpop.f32.mrb[33].mxu1 }
 0x2f7   : > { %v3019_v56 = vpop.f32.mrb[26].mxu0  ;;  %v3067_v57 = vpop.f32.mrb[34].mxu1 }
 0x2f8   : > { %v1104_v58 = vpop.f32.mrb[27].mxu0  ;;  %v4160_v59 = vpop.f32.mrb[35].mxu1 }
 0x2fa   : > { %1180 = vmax.xlane.f32.xlu1 %v1069_v38  ;;  %1186 = vmax.xlane.f32.xlu0 %v3011_v40 }
 0x2fd   : > { %v3022_v60 = vpop.f32.mrb[28].mxu0  ;;  %v3070_v61 = vpop.f32.mrb[36].mxu1 }
 0x2fe   : > { %1630 = vmax.xlane.f32.xlu1 %v1519_v39  ;;  %1636 = vmax.xlane.f32.xlu0 %v3059_v41  ;;  %v4162_v62 = vpop.f32.mrb[29].mxu0  ;;  %v4164_v63 = vpop.f32.mrb[37].mxu1 }
 0x2ff   : > { %v4166_v0 = vpop.f32.mrb[30].mxu0  ;;  %v4168_v1 = vpop.f32.mrb[38].mxu1 }
 0x300   : > { %v4170_v2 = vpop.f32.mrb[31].mxu0  ;;  %v4172_v3 = vpop.f32.mrb[39].mxu1 }
 0x302   : > { %1182 = vmax.xlane.f32.xlu0 %v1072_v42  ;;  %1192 = vmax.xlane.f32.xlu1 %v3014_v44 }
 0x305   : > { %v4174_v4 = vpop.f32.mrb[32].mxu0  ;;  %v4176_v5 = vpop.f32.mrb[40].mxu1 }
 0x306   : > { %1632 = vmax.xlane.f32.xlu0 %v1522_v43  ;;  %1642 = vmax.xlane.f32.xlu1 %v3062_v45  ;;  %v4178_v6 = vpop.f32.mrb[33].mxu0  ;;  %v4180_v7 = vpop.f32.mrb[41].mxu1 }
 0x307   : > { %v4182_v8 = vpop.f32.mrb[34].mxu0  ;;  %v4184_v9 = vpop.f32.mrb[42].mxu1 }
 0x308   : > { %v4186_v10 = vpop.f32.mrb[35].mxu0  ;;  %v4188_v11 = vpop.f32.mrb[43].mxu1 }
 0x30a   : > { %1188 = vmax.xlane.f32.xlu1 %v1085_v46  ;;  %1194 = vmax.xlane.f32.xlu0 %v3015_v48 }
 0x30d   : > { %v4190_v12 = vpop.f32.mrb[36].mxu0  ;;  %v4192_v13 = vpop.f32.mrb[44].mxu1 }
 0x30e   : > { %1638 = vmax.xlane.f32.xlu1 %v1535_v47  ;;  %1644 = vmax.xlane.f32.xlu0 %v3063_v49  ;;  %v4194_v14 = vpop.f32.mrb[37].mxu0  ;;  %v4196_v15 = vpop.f32.mrb[45].mxu1 }
 0x30f   : > { %v4198_v16 = vpop.f32.mrb[38].mxu0  ;;  %v4200_v17 = vpop.f32.mrb[46].mxu1 }
 0x310   : > { %v4202_v18 = vpop.f32.mrb[39].mxu0  ;;  %v4204_v19 = vpop.f32.mrb[47].mxu1 }
 0x312   : > { %1190 = vmax.xlane.f32.xlu0 %v1088_v50  ;;  %1200 = vmax.xlane.f32.xlu1 %v3018_v52 }
 0x315   : > { %v4206_v20 = vpop.f32.mrb[40].mxu0  ;;  %v4208_v21 = vpop.f32.mrb[48].mxu1 }
 0x316   : > { %1640 = vmax.xlane.f32.xlu0 %v1538_v51  ;;  %1650 = vmax.xlane.f32.xlu1 %v3066_v53  ;;  %v4210_v22 = vpop.f32.mrb[41].mxu0  ;;  %v4212_v23 = vpop.f32.mrb[49].mxu1 }
 0x317   : > { %v4214_v24 = vpop.f32.mrb[42].mxu0  ;;  %v4216_v25 = vpop.f32.mrb[50].mxu1 }
 0x318   : > { %v4218_v26 = vpop.f32.mrb[43].mxu0  ;;  %v4220_v27 = vpop.f32.mrb[51].mxu1 }
 0x31a   : > { %1196 = vmax.xlane.f32.xlu1 %v1101_v54  ;;  %1202 = vmax.xlane.f32.xlu0 %v3019_v56 }
 0x31d   : > { %v4222_v28 = vpop.f32.mrb[44].mxu0  ;;  %v4224_v29 = vpop.f32.mrb[52].mxu1 }
 0x31e   : > { %1646 = vmax.xlane.f32.xlu1 %v1551_v55  ;;  %1652 = vmax.xlane.f32.xlu0 %v3067_v57  ;;  %v4226_v30 = vpop.f32.mrb[45].mxu0  ;;  %v4228_v31 = vpop.f32.mrb[53].mxu1 }
 0x31f   : > { %v4230_v32 = vpop.f32.mrb[46].mxu0  ;;  %v4232_v33 = vpop.f32.mrb[54].mxu1 }
 0x320   : > { %v4234_v34 = vpop.f32.mrb[47].mxu0  ;;  %v4236_v35 = vpop.f32.mrb[55].mxu1 }
 0x322   : > { %1198 = vmax.xlane.f32.xlu0 %v1104_v58  ;;  %1208 = vmax.xlane.f32.xlu1 %v3022_v60 }
 0x325   : > { %v4238_v36 = vpop.f32.mrb[48].mxu0  ;;  %v4240_v37 = vpop.f32.mrb[56].mxu1 }
 0x326   : > { %1648 = vmax.xlane.f32.xlu0 %v4160_v59  ;;  %1658 = vmax.xlane.f32.xlu1 %v3070_v61  ;;  %v4243_v38 = vpop.f32.mrb[49].mxu0  ;;  %v4245_v39 = vpop.f32.mrb[57].mxu1 }
 0x327   : > { %v4247_v40 = vpop.f32.mrb[50].mxu0  ;;  %v4249_v41 = vpop.f32.mrb[58].mxu1 }
 0x328   : > { %v4251_v42 = vpop.f32.mrb[51].mxu0  ;;  %v4253_v43 = vpop.f32.mrb[59].mxu1 }
 0x32a   : > { %1204 = vmax.xlane.f32.xlu1 %v4162_v62  ;;  %1210 = vmax.xlane.f32.xlu0 %v4166_v0 }
 0x32d   : > { %v4257_v44 = vpop.f32.mrb[52].mxu0  ;;  %v4259_v45 = vpop.f32.mrb[60].mxu1 }
 0x32e   : > { %1654 = vmax.xlane.f32.xlu1 %v4164_v63  ;;  %1660 = vmax.xlane.f32.xlu0 %v4168_v1  ;;  %v4263_v46 = vpop.f32.mrb[53].mxu0  ;;  %v4265_v47 = vpop.f32.mrb[61].mxu1 }
 0x32f   : > { %v4267_v48 = vpop.f32.mrb[54].mxu0  ;;  %v4269_v49 = vpop.f32.mrb[62].mxu1 }
 0x330   : > { %v4271_v50 = vpop.f32.mrb[55].mxu0  ;;  %v4273_v51 = vpop.f32.mrb[63].mxu1 }
 0x332   : > { %1206 = vmax.xlane.f32.xlu0 %v4170_v2  ;;  %1216 = vmax.xlane.f32.xlu1 %v4174_v4 }
 0x335   : > { %v4277_v52 = vpop.f32.mrb[56].mxu0  ;;  %v4279_v53 = vpop.f32.mrb[64].mxu1 }
 0x336   : > { %1656 = vmax.xlane.f32.xlu0 %v4172_v3  ;;  %1666 = vmax.xlane.f32.xlu1 %v4176_v5  ;;  %v4283_v54 = vpop.f32.mrb[57].mxu0  ;;  %v4285_v55 = vpop.f32.mrb[65].mxu1 }
 0x337   : > { %v4287_v56 = vpop.f32.mrb[58].mxu0  ;;  %v4289_v57 = vpop.f32.mrb[66].mxu1 }
 0x338   : > { %v4291_v58 = vpop.f32.mrb[59].mxu0  ;;  %v4293_v59 = vpop.f32.mrb[67].mxu1 }
 0x33a   : > { %1212 = vmax.xlane.f32.xlu1 %v4178_v6  ;;  %1218 = vmax.xlane.f32.xlu0 %v4182_v8 }
 0x33d   : > { %v4297_v60 = vpop.f32.mrb[60].mxu0  ;;  %v4299_v61 = vpop.f32.mrb[68].mxu1 }
 0x33e   : > { %1662 = vmax.xlane.f32.xlu1 %v4180_v7  ;;  %1668 = vmax.xlane.f32.xlu0 %v4184_v9  ;;  %v4303_v62 = vpop.f32.mrb[61].mxu0  ;;  %v4305_v63 = vpop.f32.mrb[69].mxu1 }
 0x33f   : > { %v4307_v0 = vpop.f32.mrb[62].mxu0  ;;  %v4309_v1 = vpop.f32.mrb[70].mxu1 }
 0x340   : > { %v4311_v2 = vpop.f32.mrb[63].mxu0  ;;  %v4313_v3 = vpop.f32.mrb[71].mxu1 }
 0x341   : > { %4821 = vst [vmem:[#allocation2_spill] sm:$0xff] %v4313_v3 }
 0x342   : > { %1214 = vmax.xlane.f32.xlu0 %v4186_v10  ;;  %1224 = vmax.xlane.f32.xlu1 %v4190_v12 }
 0x345   : > { %v4317_v4 = vpop.f32.mrb[64].mxu0  ;;  %v4319_v5 = vpop.f32.mrb[72].mxu1 }
 0x346   : > { %1664 = vmax.xlane.f32.xlu0 %v4188_v11  ;;  %1674 = vmax.xlane.f32.xlu1 %v4192_v13  ;;  %v4323_v6 = vpop.f32.mrb[65].mxu0  ;;  %v4325_v7 = vpop.f32.mrb[73].mxu1 }
 0x347   : > { %v4327_v8 = vpop.f32.mrb[66].mxu0  ;;  %v4329_v9 = vpop.f32.mrb[74].mxu1 }
 0x348   : > { %4822 = vst [vmem:[#allocation3_spill] sm:$0xff] %v4329_v9  ;;  %v4331_v3 = vpop.f32.mrb[67].mxu0  ;;  %v4333_v10 = vpop.f32.mrb[75].mxu1 }
 0x349   : > { %4823 = vst [vmem:[#allocation4_spill] sm:$0xff] %v4331_v3  ;;  %4824 = vst [vmem:[#allocation5_spill] sm:$0xff] %v4333_v10 }
 0x34a   : > { %1220 = vmax.xlane.f32.xlu1 %v4194_v14  ;;  %1226 = vmax.xlane.f32.xlu0 %v4198_v16 }
 0x34d   : > { %v4337_v12 = vpop.f32.mrb[68].mxu0  ;;  %v4339_v11 = vpop.f32.mrb[76].mxu1 }
 0x34e   : > { %1670 = vmax.xlane.f32.xlu1 %v4196_v15  ;;  %1676 = vmax.xlane.f32.xlu0 %v4200_v17  ;;  %v4343_v13 = vpop.f32.mrb[69].mxu0  ;;  %v4345_v9 = vpop.f32.mrb[77].mxu1  ;;  %v1680_v15 = vld [vmem:[%s3770_s8 + $0x110] sm:$0xff] }
 0x34f   : > { %v4347_v3 = vpop.f32.mrb[70].mxu0  ;;  %v4349_v10 = vpop.f32.mrb[78].mxu1  ;;  %v1230_v17 = vld [vmem:[%s3770_s8 + $0x10] sm:$0xff] }
 0x350   : > { %v4351_v14 = vpop.f32.mrb[71].mxu0  ;;  %v4353_v16 = vpop.f32.mrb[79].mxu1 }
 0x352   : > { %1222 = vmax.xlane.f32.xlu0 %v4202_v18  ;;  %2067 = vmax.xlane.f32.xlu1 %v4206_v20 }
 0x356   : > { %1672 = vmax.xlane.f32.xlu0 %v4204_v19  ;;  %2516 = vmax.xlane.f32.xlu1 %v4208_v21 }
 0x35a   : > { %2063 = vmax.xlane.f32.xlu1 %v4210_v22  ;;  %2069 = vmax.xlane.f32.xlu0 %v4214_v24  ;;  %v1678_v22 = vld [vmem:[%s3770_s8 + $0x100] sm:$0xff] }
 0x35b   : > { %v1228_v24 = vld [vmem:[%s3770_s8] sm:$0xff] }
 0x35e   : > { %2512 = vmax.xlane.f32.xlu1 %v4212_v23  ;;  %2518 = vmax.xlane.f32.xlu0 %v4216_v25 }
 0x362   : > { %2065 = vmax.xlane.f32.xlu0 %v4218_v26  ;;  %2075 = vmax.xlane.f32.xlu1 %v4222_v28 }
 0x363   : > { %v1619_v18 = vpop.xlane.xlu1 %1618  ;;  %v1169_v19 = vpop.xlane.xlu0 %1168 }
 0x364   : > { %v1712_v20 = vmax.f32 %v1680_v15, %v1619_v18  ;;  %v1262_v21 = vmax.f32 %v1230_v17, %v1169_v19  ;;  %v1231_v15 = vld [vmem:[%s3770_s8 + $0x18] sm:$0xff]  ;;  %v1229_v17 = vld [vmem:[%s3770_s8 + $0x8] sm:$0xff] }
 0x366   : > { %1744 = vst.msk [vmem:[%s3770_s8 + $0x110] sm:$0xff] %vm277_vm3, %v1712_v20  ;;  %1295 = vst.msk [vmem:[%s3770_s8 + $0x10] sm:$0xff] %vm277_vm3, %v1262_v21  ;;  %2514 = vmax.xlane.f32.xlu0 %v4220_v27  ;;  %2524 = vmax.xlane.f32.xlu1 %v4224_v29  ;;  %v1681_v20 = vld [vmem:[%s3770_s8 + $0x118] sm:$0xff]  ;;  %v1234_v21 = vld [vmem:[%s3770_s8 + $0x30] sm:$0xff] }
 0x367   : > { %v1615_v23 = vpop.xlane.xlu1 %1614  ;;  %v1165_v25 = vpop.xlane.xlu0 %1164 }
 0x368   : > { %v1710_v26 = vmax.f32 %v1678_v22, %v1615_v23  ;;  %v1260_v28 = vmax.f32 %v1228_v24, %v1165_v25  ;;  %v1679_v23 = vld [vmem:[%s3770_s8 + $0x108] sm:$0xff]  ;;  %v1684_v25 = vld [vmem:[%s3770_s8 + $0x130] sm:$0xff] }
 0x36a   : > { %1742 = vst.msk [vmem:[%s3770_s8 + $0x100] sm:$0xff] %vm277_vm3, %v1710_v26  ;;  %1293 = vst.msk [vmem:[%s3770_s8] sm:$0xff] %vm277_vm3, %v1260_v28  ;;  %2071 = vmax.xlane.f32.xlu1 %v4226_v30  ;;  %2077 = vmax.xlane.f32.xlu0 %v4230_v32 }
 0x36b   : > { %v1171_v27 = vpop.xlane.xlu0 %1170  ;;  %v1167_v29 = vpop.xlane.xlu1 %1166 }
 0x36c   : > { %v1263_v18 = vmax.f32 %v1231_v15, %v1171_v27  ;;  %v1261_v19 = vmax.f32 %v1229_v17, %v1167_v29  ;;  %v1232_v15 = vld [vmem:[%s3770_s8 + $0x20] sm:$0xff]  ;;  %v1235_v17 = vld [vmem:[%s3770_s8 + $0x38] sm:$0xff] }
 0x36e   : > { %1296 = vst.msk [vmem:[%s3770_s8 + $0x18] sm:$0xff] %vm277_vm3, %v1263_v18  ;;  %1294 = vst.msk [vmem:[%s3770_s8 + $0x8] sm:$0xff] %vm277_vm3, %v1261_v19  ;;  %2520 = vmax.xlane.f32.xlu1 %v4228_v31  ;;  %2526 = vmax.xlane.f32.xlu0 %v4232_v33  ;;  %v1682_v18 = vld [vmem:[%s3770_s8 + $0x120] sm:$0xff]  ;;  %v1685_v19 = vld [vmem:[%s3770_s8 + $0x138] sm:$0xff] }
 0x36f   : > { %v1621_v30 = vpop.xlane.xlu0 %1620  ;;  %v1177_v32 = vpop.xlane.xlu1 %1176 }
 0x370   : > { %v1713_v22 = vmax.f32 %v1681_v20, %v1621_v30  ;;  %v1266_v24 = vmax.f32 %v1234_v21, %v1177_v32  ;;  %v1233_v30 = vld [vmem:[%s3770_s8 + $0x28] sm:$0xff]  ;;  %v1238_v32 = vld [vmem:[%s3770_s8 + $0x50] sm:$0xff] }
 0x372   : > { %1745 = vst.msk [vmem:[%s3770_s8 + $0x118] sm:$0xff] %vm277_vm3, %v1713_v22  ;;  %1299 = vst.msk [vmem:[%s3770_s8 + $0x30] sm:$0xff] %vm277_vm3, %v1266_v24  ;;  %2073 = vmax.xlane.f32.xlu0 %v4234_v34  ;;  %2083 = vmax.xlane.f32.xlu1 %v4238_v36 }
 0x373   : > { %v1617_v31 = vpop.xlane.xlu0 %1616  ;;  %v1627_v33 = vpop.xlane.xlu1 %1626 }
 0x374   : > { %v1711_v26 = vmax.f32 %v1679_v23, %v1617_v31  ;;  %v1716_v28 = vmax.f32 %v1684_v25, %v1627_v33  ;;  %v1683_v23 = vld [vmem:[%s3770_s8 + $0x128] sm:$0xff]  ;;  %v1688_v25 = vld [vmem:[%s3770_s8 + $0x150] sm:$0xff] }
 0x376   : > { %1743 = vst.msk [vmem:[%s3770_s8 + $0x108] sm:$0xff] %vm277_vm3, %v1711_v26  ;;  %1748 = vst.msk [vmem:[%s3770_s8 + $0x130] sm:$0xff] %vm277_vm3, %v1716_v28  ;;  %2522 = vmax.xlane.f32.xlu0 %v4236_v35  ;;  %2532 = vmax.xlane.f32.xlu1 %v4240_v37  ;;  %v1236_v26 = vld [vmem:[%s3770_s8 + $0x40] sm:$0xff]  ;;  %v1239_v28 = vld [vmem:[%s3770_s8 + $0x58] sm:$0xff] }
 0x377   : > { %v1173_v34 = vpop.xlane.xlu1 %1172  ;;  %v1179_v36 = vpop.xlane.xlu0 %1178 }
 0x378   : > { %v1264_v27 = vmax.f32 %v1232_v15, %v1173_v34  ;;  %v1267_v29 = vmax.f32 %v1235_v17, %v1179_v36  ;;  %v1686_v34 = vld [vmem:[%s3770_s8 + $0x140] sm:$0xff]  ;;  %v1689_v36 = vld [vmem:[%s3770_s8 + $0x158] sm:$0xff] }
 0x37a   : > { %1297 = vst.msk [vmem:[%s3770_s8 + $0x20] sm:$0xff] %vm277_vm3, %v1264_v27  ;;  %1300 = vst.msk [vmem:[%s3770_s8 + $0x38] sm:$0xff] %vm277_vm3, %v1267_v29  ;;  %2079 = vmax.xlane.f32.xlu1 %v4243_v38  ;;  %2085 = vmax.xlane.f32.xlu0 %v4247_v40 }
 0x37b   : > { %v1623_v35 = vpop.xlane.xlu1 %1622  ;;  %v1629_v37 = vpop.xlane.xlu0 %1628 }
 0x37c   : > { %v1714_v20 = vmax.f32 %v1682_v18, %v1623_v35  ;;  %v1717_v21 = vmax.f32 %v1685_v19, %v1629_v37  ;;  %v1237_v18 = vld [vmem:[%s3770_s8 + $0x48] sm:$0xff]  ;;  %v1242_v19 = vld [vmem:[%s3770_s8 + $0x70] sm:$0xff] }
 0x37e   : > { %1746 = vst.msk [vmem:[%s3770_s8 + $0x120] sm:$0xff] %vm277_vm3, %v1714_v20  ;;  %1749 = vst.msk [vmem:[%s3770_s8 + $0x138] sm:$0xff] %vm277_vm3, %v1717_v21  ;;  %2528 = vmax.xlane.f32.xlu1 %v4245_v39  ;;  %2534 = vmax.xlane.f32.xlu0 %v4249_v41  ;;  %v1687_v20 = vld [vmem:[%s3770_s8 + $0x148] sm:$0xff]  ;;  %v1692_v21 = vld [vmem:[%s3770_s8 + $0x170] sm:$0xff] }
 0x37f   : > { %v1175_v38 = vpop.xlane.xlu0 %1174  ;;  %v1185_v40 = vpop.xlane.xlu1 %1184 }
 0x380   : > { %v1265_v22 = vmax.f32 %v1233_v30, %v1175_v38  ;;  %v1270_v24 = vmax.f32 %v1238_v32, %v1185_v40  ;;  %v1240_v38 = vld [vmem:[%s3770_s8 + $0x60] sm:$0xff]  ;;  %v1243_v40 = vld [vmem:[%s3770_s8 + $0x78] sm:$0xff] }
 0x382   : > { %1298 = vst.msk [vmem:[%s3770_s8 + $0x28] sm:$0xff] %vm277_vm3, %v1265_v22  ;;  %1303 = vst.msk [vmem:[%s3770_s8 + $0x50] sm:$0xff] %vm277_vm3, %v1270_v24  ;;  %2081 = vmax.xlane.f32.xlu0 %v4251_v42  ;;  %2091 = vmax.xlane.f32.xlu1 %v4257_v44 }
 0x383   : > { %v1625_v39 = vpop.xlane.xlu0 %1624  ;;  %v1635_v41 = vpop.xlane.xlu1 %1634 }
 0x384   : > { %v1715_v31 = vmax.f32 %v1683_v23, %v1625_v39  ;;  %v1720_v33 = vmax.f32 %v1688_v25, %v1635_v41  ;;  %v1690_v23 = vld [vmem:[%s3770_s8 + $0x160] sm:$0xff]  ;;  %v1693_v25 = vld [vmem:[%s3770_s8 + $0x178] sm:$0xff] }
 0x386   : > { %1747 = vst.msk [vmem:[%s3770_s8 + $0x128] sm:$0xff] %vm277_vm3, %v1715_v31  ;;  %1752 = vst.msk [vmem:[%s3770_s8 + $0x150] sm:$0xff] %vm277_vm3, %v1720_v33  ;;  %2530 = vmax.xlane.f32.xlu0 %v4253_v43  ;;  %2540 = vmax.xlane.f32.xlu1 %v4259_v45  ;;  %v1241_v31 = vld [vmem:[%s3770_s8 + $0x68] sm:$0xff]  ;;  %v1246_v33 = vld [vmem:[%s3770_s8 + $0x90] sm:$0xff] }
 0x387   : > { %v1181_v42 = vpop.xlane.xlu1 %1180  ;;  %v1187_v44 = vpop.xlane.xlu0 %1186 }
 0x388   : > { %v1268_v15 = vmax.f32 %v1236_v26, %v1181_v42  ;;  %v1271_v17 = vmax.f32 %v1239_v28, %v1187_v44  ;;  %v1691_v42 = vld [vmem:[%s3770_s8 + $0x168] sm:$0xff]  ;;  %v1696_v44 = vld [vmem:[%s3770_s8 + $0x190] sm:$0xff] }
 0x38a   : > { %1301 = vst.msk [vmem:[%s3770_s8 + $0x40] sm:$0xff] %vm277_vm3, %v1268_v15  ;;  %1304 = vst.msk [vmem:[%s3770_s8 + $0x58] sm:$0xff] %vm277_vm3, %v1271_v17  ;;  %2087 = vmax.xlane.f32.xlu1 %v4263_v46  ;;  %2093 = vmax.xlane.f32.xlu0 %v4267_v48 }
 0x38b   : > { %v1631_v43 = vpop.xlane.xlu1 %1630  ;;  %v1637_v45 = vpop.xlane.xlu0 %1636 }
 0x38c   : > { %v1718_v27 = vmax.f32 %v1686_v34, %v1631_v43  ;;  %v1721_v29 = vmax.f32 %v1689_v36, %v1637_v45  ;;  %v1244_v34 = vld [vmem:[%s3770_s8 + $0x80] sm:$0xff]  ;;  %v1247_v36 = vld [vmem:[%s3770_s8 + $0x98] sm:$0xff] }
 0x38e   : > { %1750 = vst.msk [vmem:[%s3770_s8 + $0x140] sm:$0xff] %vm277_vm3, %v1718_v27  ;;  %1753 = vst.msk [vmem:[%s3770_s8 + $0x158] sm:$0xff] %vm277_vm3, %v1721_v29  ;;  %2536 = vmax.xlane.f32.xlu1 %v4265_v47  ;;  %2542 = vmax.xlane.f32.xlu0 %v4269_v49  ;;  %v1694_v27 = vld [vmem:[%s3770_s8 + $0x180] sm:$0xff]  ;;  %v1697_v29 = vld [vmem:[%s3770_s8 + $0x198] sm:$0xff] }
 0x38f   : > { %v1183_v46 = vpop.xlane.xlu0 %1182  ;;  %v1193_v48 = vpop.xlane.xlu1 %1192 }
 0x390   : > { %v1269_v35 = vmax.f32 %v1237_v18, %v1183_v46  ;;  %v1274_v37 = vmax.f32 %v1242_v19, %v1193_v48  ;;  %v1245_v46 = vld [vmem:[%s3770_s8 + $0x88] sm:$0xff]  ;;  %v1250_v48 = vld [vmem:[%s3770_s8 + $0xb0] sm:$0xff] }
 0x392   : > { %1302 = vst.msk [vmem:[%s3770_s8 + $0x48] sm:$0xff] %vm277_vm3, %v1269_v35  ;;  %1307 = vst.msk [vmem:[%s3770_s8 + $0x70] sm:$0xff] %vm277_vm3, %v1274_v37  ;;  %2089 = vmax.xlane.f32.xlu0 %v4271_v50  ;;  %2099 = vmax.xlane.f32.xlu1 %v4277_v52 }
 0x393   : > { %v1633_v47 = vpop.xlane.xlu0 %1632  ;;  %v1643_v49 = vpop.xlane.xlu1 %1642 }
 0x394   : > { %v1719_v30 = vmax.f32 %v1687_v20, %v1633_v47  ;;  %v1724_v32 = vmax.f32 %v1692_v21, %v1643_v49  ;;  %v1695_v20 = vld [vmem:[%s3770_s8 + $0x188] sm:$0xff]  ;;  %v1700_v21 = vld [vmem:[%s3770_s8 + $0x1b0] sm:$0xff] }
 0x396   : > { %1751 = vst.msk [vmem:[%s3770_s8 + $0x148] sm:$0xff] %vm277_vm3, %v1719_v30  ;;  %1756 = vst.msk [vmem:[%s3770_s8 + $0x170] sm:$0xff] %vm277_vm3, %v1724_v32  ;;  %2538 = vmax.xlane.f32.xlu0 %v4273_v51  ;;  %2548 = vmax.xlane.f32.xlu1 %v4279_v53  ;;  %v1248_v30 = vld [vmem:[%s3770_s8 + $0xa0] sm:$0xff]  ;;  %v1251_v32 = vld [vmem:[%s3770_s8 + $0xb8] sm:$0xff] }
 0x397   : > { %v1189_v50 = vpop.xlane.xlu1 %1188  ;;  %v1195_v52 = vpop.xlane.xlu0 %1194 }
 0x398   : > { %v1272_v22 = vmax.f32 %v1240_v38, %v1189_v50  ;;  %v1275_v24 = vmax.f32 %v1243_v40, %v1195_v52  ;;  %v4825_v38 = vld [vmem:[#allocation2_spill] sm:$0xff] }
 0x399   : > { %v1698_v52 = vld [vmem:[%s3770_s8 + $0x1a0] sm:$0xff] }
 0x39a   : > { %1305 = vst.msk [vmem:[%s3770_s8 + $0x60] sm:$0xff] %vm277_vm3, %v1272_v22  ;;  %1308 = vst.msk [vmem:[%s3770_s8 + $0x78] sm:$0xff] %vm277_vm3, %v1275_v24  ;;  %2095 = vmax.xlane.f32.xlu1 %v4283_v54  ;;  %2101 = vmax.xlane.f32.xlu0 %v4287_v56  ;;  %v1701_v22 = vld [vmem:[%s3770_s8 + $0x1b8] sm:$0xff] }
 0x39b   : > { %v1639_v51 = vpop.xlane.xlu1 %1638  ;;  %v1645_v53 = vpop.xlane.xlu0 %1644 }
 0x39c   : > { %v1722_v39 = vmax.f32 %v1690_v23, %v1639_v51  ;;  %v1725_v41 = vmax.f32 %v1693_v25, %v1645_v53  ;;  %v1249_v51 = vld [vmem:[%s3770_s8 + $0xa8] sm:$0xff]  ;;  %v1254_v53 = vld [vmem:[%s3770_s8 + $0xd0] sm:$0xff] }
 0x39e   : > { %1754 = vst.msk [vmem:[%s3770_s8 + $0x160] sm:$0xff] %vm277_vm3, %v1722_v39  ;;  %1757 = vst.msk [vmem:[%s3770_s8 + $0x178] sm:$0xff] %vm277_vm3, %v1725_v41  ;;  %2544 = vmax.xlane.f32.xlu1 %v4285_v55  ;;  %2550 = vmax.xlane.f32.xlu0 %v4289_v57  ;;  %v4826_v39 = vld [vmem:[#allocation3_spill] sm:$0xff] }
 0x39f   : > { %v1191_v54 = vpop.xlane.xlu0 %1190  ;;  %v1201_v56 = vpop.xlane.xlu1 %1200 }
 0x3a0   : > { %v1273_v26 = vmax.f32 %v1241_v31, %v1191_v54  ;;  %v1278_v28 = vmax.f32 %v1246_v33, %v1201_v56  ;;  %v1699_v33 = vld [vmem:[%s3770_s8 + $0x1a8] sm:$0xff]  ;;  %v1704_v54 = vld [vmem:[%s3770_s8 + $0x1d0] sm:$0xff] }
 0x3a1   : > { %v4827_v56 = vld [vmem:[#allocation4_spill] sm:$0xff] }
 0x3a2   : > { %1306 = vst.msk [vmem:[%s3770_s8 + $0x68] sm:$0xff] %vm277_vm3, %v1273_v26  ;;  %1311 = vst.msk [vmem:[%s3770_s8 + $0x90] sm:$0xff] %vm277_vm3, %v1278_v28  ;;  %2097 = vmax.xlane.f32.xlu0 %v4291_v58  ;;  %2107 = vmax.xlane.f32.xlu1 %v4297_v60 }
 0x3a3   : > { %v1641_v55 = vpop.xlane.xlu0 %1640  ;;  %v1651_v57 = vpop.xlane.xlu1 %1650 }
 0x3a4   : > { %v1723_v15 = vmax.f32 %v1691_v42, %v1641_v55  ;;  %v1728_v17 = vmax.f32 %v1696_v44, %v1651_v57  ;;  %v1252_v44 = vld [vmem:[%s3770_s8 + $0xc0] sm:$0xff]  ;;  %v1255_v55 = vld [vmem:[%s3770_s8 + $0xd8] sm:$0xff] }
 0x3a5   : > { %v4828_v57 = vld [vmem:[#allocation5_spill] sm:$0xff] }
 0x3a6   : > { %1755 = vst.msk [vmem:[%s3770_s8 + $0x168] sm:$0xff] %vm277_vm3, %v1723_v15  ;;  %1760 = vst.msk [vmem:[%s3770_s8 + $0x190] sm:$0xff] %vm277_vm3, %v1728_v17  ;;  %2546 = vmax.xlane.f32.xlu0 %v4293_v59  ;;  %2556 = vmax.xlane.f32.xlu1 %v4299_v61 }
 0x3a7   : > { %v1197_v58 = vpop.xlane.xlu1 %1196  ;;  %v1203_v60 = vpop.xlane.xlu0 %1202 }
 0x3a8   : > { %v1276_v43 = vmax.f32 %v1244_v34, %v1197_v58  ;;  %v1279_v45 = vmax.f32 %v1247_v36, %v1203_v60  ;;  %v1702_v36 = vld [vmem:[%s3770_s8 + $0x1c0] sm:$0xff]  ;;  %v1705_v58 = vld [vmem:[%s3770_s8 + $0x1d8] sm:$0xff] }
 0x3aa   : > { %1309 = vst.msk [vmem:[%s3770_s8 + $0x80] sm:$0xff] %vm277_vm3, %v1276_v43  ;;  %1312 = vst.msk [vmem:[%s3770_s8 + $0x98] sm:$0xff] %vm277_vm3, %v1279_v45  ;;  %2103 = vmax.xlane.f32.xlu1 %v4303_v62  ;;  %2109 = vmax.xlane.f32.xlu0 %v4307_v0 }
 0x3ab   : > { %v1647_v59 = vpop.xlane.xlu1 %1646  ;;  %v1653_v61 = vpop.xlane.xlu0 %1652 }
 0x3ac   : > { %v1726_v18 = vmax.f32 %v1694_v27, %v1647_v59  ;;  %v1729_v19 = vmax.f32 %v1697_v29, %v1653_v61  ;;  %v1253_v27 = vld [vmem:[%s3770_s8 + $0xc8] sm:$0xff]  ;;  %v1258_v29 = vld [vmem:[%s3770_s8 + $0xf0] sm:$0xff] }
 0x3ae   : > { %1758 = vst.msk [vmem:[%s3770_s8 + $0x180] sm:$0xff] %vm277_vm3, %v1726_v18  ;;  %1761 = vst.msk [vmem:[%s3770_s8 + $0x198] sm:$0xff] %vm277_vm3, %v1729_v19  ;;  %2552 = vmax.xlane.f32.xlu1 %v4305_v63  ;;  %2558 = vmax.xlane.f32.xlu0 %v4309_v1  ;;  %v1703_v18 = vld [vmem:[%s3770_s8 + $0x1c8] sm:$0xff]  ;;  %v1708_v19 = vld [vmem:[%s3770_s8 + $0x1f0] sm:$0xff] }
 0x3af   : > { %v1199_v62 = vpop.xlane.xlu0 %1198  ;;  %v1209_v0 = vpop.xlane.xlu1 %1208 }
 0x3b0   : > { %v1277_v35 = vmax.f32 %v1245_v46, %v1199_v62  ;;  %v1282_v37 = vmax.f32 %v1250_v48, %v1209_v0  ;;  %v1256_v62 = vld [vmem:[%s3770_s8 + $0xe0] sm:$0xff]  ;;  %v1259_v0 = vld [vmem:[%s3770_s8 + $0xf8] sm:$0xff] }
 0x3b2   : > { %1310 = vst.msk [vmem:[%s3770_s8 + $0x88] sm:$0xff] %vm277_vm3, %v1277_v35  ;;  %1315 = vst.msk [vmem:[%s3770_s8 + $0xb0] sm:$0xff] %vm277_vm3, %v1282_v37  ;;  %2105 = vmax.xlane.f32.xlu0 %v4311_v2  ;;  %2115 = vmax.xlane.f32.xlu1 %v4317_v4 }
 0x3b3   : > { %v1649_v63 = vpop.xlane.xlu0 %1648  ;;  %v1659_v1 = vpop.xlane.xlu1 %1658 }
 0x3b4   : > { %v1727_v47 = vmax.f32 %v1695_v20, %v1649_v63  ;;  %v1732_v49 = vmax.f32 %v1700_v21, %v1659_v1  ;;  %v1706_v21 = vld [vmem:[%s3770_s8 + $0x1e0] sm:$0xff]  ;;  %v1709_v63 = vld [vmem:[%s3770_s8 + $0x1f8] sm:$0xff] }
 0x3b6   : > { %1759 = vst.msk [vmem:[%s3770_s8 + $0x188] sm:$0xff] %vm277_vm3, %v1727_v47  ;;  %1764 = vst.msk [vmem:[%s3770_s8 + $0x1b0] sm:$0xff] %vm277_vm3, %v1732_v49  ;;  %2554 = vmax.xlane.f32.xlu0 %v4825_v38  ;;  %2564 = vmax.xlane.f32.xlu1 %v4319_v5 }
 0x3b7   : > { %v1205_v2 = vpop.xlane.xlu1 %1204  ;;  %v1211_v4 = vpop.xlane.xlu0 %1210 }
 0x3b8   : > { %v1280_v40 = vmax.f32 %v1248_v30, %v1205_v2  ;;  %v1283_v50 = vmax.f32 %v1251_v32, %v1211_v4  ;;  %v2129_v32 = vld [vmem:[%s3770_s8 + $0x210] sm:$0xff] }
 0x3ba   : > { %1313 = vst.msk [vmem:[%s3770_s8 + $0xa0] sm:$0xff] %vm277_vm3, %v1280_v40  ;;  %1316 = vst.msk [vmem:[%s3770_s8 + $0xb8] sm:$0xff] %vm277_vm3, %v1283_v50  ;;  %2111 = vmax.xlane.f32.xlu1 %v4323_v6  ;;  %2117 = vmax.xlane.f32.xlu0 %v4327_v8  ;;  %v1707_v50 = vld [vmem:[%s3770_s8 + $0x1e8] sm:$0xff] }
 0x3bb   : > { %v1655_v5 = vpop.xlane.xlu1 %1654  ;;  %v1661_v24 = vpop.xlane.xlu0 %1660 }
 0x3bc   : > { %v1730_v23 = vmax.f32 %v1698_v52, %v1655_v5  ;;  %v1733_v25 = vmax.f32 %v1701_v22, %v1661_v24  ;;  %v2578_v52 = vld [vmem:[%s3770_s8 + $0x310] sm:$0xff] }
 0x3be   : > { %1762 = vst.msk [vmem:[%s3770_s8 + $0x1a0] sm:$0xff] %vm277_vm3, %v1730_v23  ;;  %1765 = vst.msk [vmem:[%s3770_s8 + $0x1b8] sm:$0xff] %vm277_vm3, %v1733_v25  ;;  %2560 = vmax.xlane.f32.xlu1 %v4325_v7  ;;  %2566 = vmax.xlane.f32.xlu0 %v4826_v39  ;;  %v2127_v25 = vld [vmem:[%s3770_s8 + $0x200] sm:$0xff] }
 0x3bf   : > { %v1207_v6 = vpop.xlane.xlu0 %1206  ;;  %v1217_v8 = vpop.xlane.xlu1 %1216 }
 0x3c0   : > { %v1281_v41 = vmax.f32 %v1249_v51, %v1207_v6  ;;  %v1286_v31 = vmax.f32 %v1254_v53, %v1217_v8  ;;  %v2130_v51 = vld [vmem:[%s3770_s8 + $0x218] sm:$0xff] }
 0x3c2   : > { %1314 = vst.msk [vmem:[%s3770_s8 + $0xa8] sm:$0xff] %vm277_vm3, %v1281_v41  ;;  %1319 = vst.msk [vmem:[%s3770_s8 + $0xd0] sm:$0xff] %vm277_vm3, %v1286_v31  ;;  %2113 = vmax.xlane.f32.xlu0 %v4827_v56  ;;  %2123 = vmax.xlane.f32.xlu1 %v4337_v12  ;;  %v2576_v41 = vld [vmem:[%s3770_s8 + $0x300] sm:$0xff]  ;;  %v2579_v31 = vld [vmem:[%s3770_s8 + $0x318] sm:$0xff] }
 0x3c3   : > { %v1657_v7 = vpop.xlane.xlu0 %1656  ;;  %v1667_v26 = vpop.xlane.xlu1 %1666 }
 0x3c4   : > { %v1731_v28 = vmax.f32 %v1699_v33, %v1657_v7  ;;  %v1736_v42 = vmax.f32 %v1704_v54, %v1667_v26  ;;  %v2128_v26 = vld [vmem:[%s3770_s8 + $0x208] sm:$0xff] }
 0x3c6   : > { %1763 = vst.msk [vmem:[%s3770_s8 + $0x1a8] sm:$0xff] %vm277_vm3, %v1731_v28  ;;  %1768 = vst.msk [vmem:[%s3770_s8 + $0x1d0] sm:$0xff] %vm277_vm3, %v1736_v42  ;;  %2562 = vmax.xlane.f32.xlu0 %v4828_v57  ;;  %2119 = vmax.xlane.f32.xlu1 %v4343_v13  ;;  %v2133_v28 = vld [vmem:[%s3770_s8 + $0x230] sm:$0xff] }
 0x3c7   : > { %v1213_v12 = vpop.xlane.xlu1 %1212  ;;  %v1219_v15 = vpop.xlane.xlu0 %1218 }
 0x3c8   : > { %v1284_v17 = vmax.f32 %v1252_v44, %v1213_v12  ;;  %v1287_v34 = vmax.f32 %v1255_v55, %v1219_v15  ;;  %v2577_v12 = vld [vmem:[%s3770_s8 + $0x308] sm:$0xff]  ;;  %v2582_v15 = vld [vmem:[%s3770_s8 + $0x330] sm:$0xff] }
 0x3ca   : > { %1317 = vst.msk [vmem:[%s3770_s8 + $0xc0] sm:$0xff] %vm277_vm3, %v1284_v17  ;;  %1320 = vst.msk [vmem:[%s3770_s8 + $0xd8] sm:$0xff] %vm277_vm3, %v1287_v34  ;;  %2125 = vmax.xlane.f32.xlu0 %v4347_v3  ;;  %2568 = vmax.xlane.f32.xlu1 %v4345_v9 }
 0x3cb   : > { %v1663_v13 = vpop.xlane.xlu1 %1662  ;;  %v1669_v60 = vpop.xlane.xlu0 %1668 }
 0x3cc   : > { %v1734_v43 = vmax.f32 %v1702_v36, %v1663_v13  ;;  %v1737_v45 = vmax.f32 %v1705_v58, %v1669_v60  ;;  %v2131_v13 = vld [vmem:[%s3770_s8 + $0x220] sm:$0xff]  ;;  %v2134_v60 = vld [vmem:[%s3770_s8 + $0x238] sm:$0xff] }
 0x3ce   : > { %1766 = vst.msk [vmem:[%s3770_s8 + $0x1c0] sm:$0xff] %vm277_vm3, %v1734_v43  ;;  %1769 = vst.msk [vmem:[%s3770_s8 + $0x1d8] sm:$0xff] %vm277_vm3, %v1737_v45  ;;  %2121 = vmax.xlane.f32.xlu0 %v4351_v14  ;;  %2572 = vmax.xlane.f32.xlu1 %v4339_v11 }
 0x3cf   : > { %v1215_v3 = vpop.xlane.xlu0 %1214  ;;  %v1225_v9 = vpop.xlane.xlu1 %1224 }
 0x3d0   : > { %v1285_v59 = vmax.f32 %v1253_v27, %v1215_v3  ;;  %v1290_v61 = vmax.f32 %v1258_v29, %v1225_v9  ;;  %v2580_v3 = vld [vmem:[%s3770_s8 + $0x320] sm:$0xff]  ;;  %v2583_v9 = vld [vmem:[%s3770_s8 + $0x338] sm:$0xff] }
 0x3d2   : > { %1318 = vst.msk [vmem:[%s3770_s8 + $0xc8] sm:$0xff] %vm277_vm3, %v1285_v59  ;;  %1323 = vst.msk [vmem:[%s3770_s8 + $0xf0] sm:$0xff] %vm277_vm3, %v1290_v61  ;;  %2570 = vmax.xlane.f32.xlu0 %v4353_v16 }
 0x3d3   : > { %v1665_v14 = vpop.xlane.xlu0 %1664  ;;  %v1675_v11 = vpop.xlane.xlu1 %1674 }
 0x3d4   : > { %v1735_v46 = vmax.f32 %v1703_v18, %v1665_v14  ;;  %v1740_v48 = vmax.f32 %v1708_v19, %v1675_v11  ;;  %v2132_v14 = vld [vmem:[%s3770_s8 + $0x228] sm:$0xff]  ;;  %v2137_v11 = vld [vmem:[%s3770_s8 + $0x250] sm:$0xff] }
 0x3d6   : > { %1767 = vst.msk [vmem:[%s3770_s8 + $0x1c8] sm:$0xff] %vm277_vm3, %v1735_v46  ;;  %1772 = vst.msk [vmem:[%s3770_s8 + $0x1f0] sm:$0xff] %vm277_vm3, %v1740_v48  ;;  %2574 = vmax.xlane.f32.xlu0 %v4349_v10  ;;  %v1257_v10 = vld [vmem:[%s3770_s8 + $0xe8] sm:$0xff] }
 0x3d7   : > { %v1221_v35 = vpop.xlane.xlu1 %1220  ;;  %v1227_v16 = vpop.xlane.xlu0 %1226 }
 0x3d8   : > { %v1288_v37 = vmax.f32 %v1256_v62, %v1221_v35  ;;  %v1291_v20 = vmax.f32 %v1259_v0, %v1227_v16  ;;  %v2581_v35 = vld [vmem:[%s3770_s8 + $0x328] sm:$0xff]  ;;  %v2586_v16 = vld [vmem:[%s3770_s8 + $0x350] sm:$0xff] }
 0x3da   : > { %1321 = vst.msk [vmem:[%s3770_s8 + $0xe0] sm:$0xff] %vm277_vm3, %v1288_v37  ;;  %1324 = vst.msk [vmem:[%s3770_s8 + $0xf8] sm:$0xff] %vm277_vm3, %v1291_v20 }
 0x3db   : > { %v1671_v1 = vpop.xlane.xlu1 %1670  ;;  %v1677_v47 = vpop.xlane.xlu0 %1676 }
 0x3dc   : > { %v1738_v49 = vmax.f32 %v1706_v21, %v1671_v1  ;;  %v1741_v30 = vmax.f32 %v1709_v63, %v1677_v47  ;;  %v2135_v1 = vld [vmem:[%s3770_s8 + $0x240] sm:$0xff]  ;;  %v2138_v47 = vld [vmem:[%s3770_s8 + $0x258] sm:$0xff] }
 0x3de   : > { %1770 = vst.msk [vmem:[%s3770_s8 + $0x1e0] sm:$0xff] %vm277_vm3, %v1738_v49  ;;  %1773 = vst.msk [vmem:[%s3770_s8 + $0x1f8] sm:$0xff] %vm277_vm3, %v1741_v30 }
 0x3df   : > { %v1223_v38 = vpop.xlane.xlu0 %1222  ;;  %v2068_v2 = vpop.xlane.xlu1 %2067 }
 0x3e0   : > { %v1289_v4 = vmax.f32 %v1257_v10, %v1223_v38  ;;  %v2161_v40 = vmax.f32 %v2129_v32, %v2068_v2  ;;  %v2584_v38 = vld [vmem:[%s3770_s8 + $0x340] sm:$0xff]  ;;  %v2587_v2 = vld [vmem:[%s3770_s8 + $0x358] sm:$0xff] }
 0x3e2   : > { %1322 = vst.msk [vmem:[%s3770_s8 + $0xe8] sm:$0xff] %vm277_vm3, %v1289_v4  ;;  %2193 = vst.msk [vmem:[%s3770_s8 + $0x210] sm:$0xff] %vm277_vm3, %v2161_v40 }
 0x3e3   : > { %v1673_v22 = vpop.xlane.xlu0 %1672  ;;  %v2517_v5 = vpop.xlane.xlu1 %2516 }
 0x3e4   : > { %v1739_v24 = vmax.f32 %v1707_v50, %v1673_v22  ;;  %v2610_v23 = vmax.f32 %v2578_v52, %v2517_v5  ;;  %v2136_v22 = vld [vmem:[%s3770_s8 + $0x248] sm:$0xff]  ;;  %v2141_v5 = vld [vmem:[%s3770_s8 + $0x270] sm:$0xff] }
 0x3e6   : > { %1771 = vst.msk [vmem:[%s3770_s8 + $0x1e8] sm:$0xff] %vm277_vm3, %v1739_v24  ;;  %2642 = vst.msk [vmem:[%s3770_s8 + $0x310] sm:$0xff] %vm277_vm3, %v2610_v23 }
 0x3e7   : > { %v2064_v53 = vpop.xlane.xlu1 %2063  ;;  %v2070_v39 = vpop.xlane.xlu0 %2069 }
 0x3e8   : > { %v2159_v6 = vmax.f32 %v2127_v25, %v2064_v53  ;;  %v2162_v8 = vmax.f32 %v2130_v51, %v2070_v39  ;;  %v2585_v53 = vld [vmem:[%s3770_s8 + $0x348] sm:$0xff]  ;;  %v2590_v39 = vld [vmem:[%s3770_s8 + $0x370] sm:$0xff] }
 0x3ea   : > { %2191 = vst.msk [vmem:[%s3770_s8 + $0x200] sm:$0xff] %vm277_vm3, %v2159_v6  ;;  %2194 = vst.msk [vmem:[%s3770_s8 + $0x218] sm:$0xff] %vm277_vm3, %v2162_v8 }
 0x3eb   : > { %v2513_v33 = vpop.xlane.xlu1 %2512  ;;  %v2519_v54 = vpop.xlane.xlu0 %2518 }
 0x3ec   : > { %v2608_v56 = vmax.f32 %v2576_v41, %v2513_v33  ;;  %v2611_v7 = vmax.f32 %v2579_v31, %v2519_v54  ;;  %v2139_v33 = vld [vmem:[%s3770_s8 + $0x260] sm:$0xff]  ;;  %v2142_v54 = vld [vmem:[%s3770_s8 + $0x278] sm:$0xff] }
 0x3ee   : > { %2640 = vst.msk [vmem:[%s3770_s8 + $0x300] sm:$0xff] %vm277_vm3, %v2608_v56  ;;  %2643 = vst.msk [vmem:[%s3770_s8 + $0x318] sm:$0xff] %vm277_vm3, %v2611_v7 }
 0x3ef   : > { %v2066_v42 = vpop.xlane.xlu0 %2065  ;;  %v2076_v44 = vpop.xlane.xlu1 %2075 }
 0x3f0   : > { %v2160_v55 = vmax.f32 %v2128_v26, %v2066_v42  ;;  %v2165_v57 = vmax.f32 %v2133_v28, %v2076_v44  ;;  %v2588_v42 = vld [vmem:[%s3770_s8 + $0x360] sm:$0xff]  ;;  %v2591_v44 = vld [vmem:[%s3770_s8 + $0x378] sm:$0xff] }
 0x3f2   : > { %2192 = vst.msk [vmem:[%s3770_s8 + $0x208] sm:$0xff] %vm277_vm3, %v2160_v55  ;;  %2197 = vst.msk [vmem:[%s3770_s8 + $0x230] sm:$0xff] %vm277_vm3, %v2165_v57 }
 0x3f3   : > { %v2515_v17 = vpop.xlane.xlu0 %2514  ;;  %v2525_v34 = vpop.xlane.xlu1 %2524 }
 0x3f4   : > { %v2609_v36 = vmax.f32 %v2577_v12, %v2515_v17  ;;  %v2614_v58 = vmax.f32 %v2582_v15, %v2525_v34  ;;  %v2140_v17 = vld [vmem:[%s3770_s8 + $0x268] sm:$0xff]  ;;  %v2145_v34 = vld [vmem:[%s3770_s8 + $0x290] sm:$0xff] }
 0x3f6   : > { %2641 = vst.msk [vmem:[%s3770_s8 + $0x308] sm:$0xff] %vm277_vm3, %v2609_v36  ;;  %2646 = vst.msk [vmem:[%s3770_s8 + $0x330] sm:$0xff] %vm277_vm3, %v2614_v58 }
 0x3f7   : > { %v2072_v43 = vpop.xlane.xlu1 %2071  ;;  %v2078_v45 = vpop.xlane.xlu0 %2077 }
 0x3f8   : > { %v2163_v27 = vmax.f32 %v2131_v13, %v2072_v43  ;;  %v2166_v29 = vmax.f32 %v2134_v60, %v2078_v45  ;;  %v2589_v43 = vld [vmem:[%s3770_s8 + $0x368] sm:$0xff]  ;;  %v2594_v45 = vld [vmem:[%s3770_s8 + $0x390] sm:$0xff] }
 0x3fa   : > { %2195 = vst.msk [vmem:[%s3770_s8 + $0x220] sm:$0xff] %vm277_vm3, %v2163_v27  ;;  %2198 = vst.msk [vmem:[%s3770_s8 + $0x238] sm:$0xff] %vm277_vm3, %v2166_v29 }
 0x3fb   : > { %v2521_v59 = vpop.xlane.xlu1 %2520  ;;  %v2527_v61 = vpop.xlane.xlu0 %2526 }
 0x3fc   : > { %v2612_v18 = vmax.f32 %v2580_v3, %v2521_v59  ;;  %v2615_v19 = vmax.f32 %v2583_v9, %v2527_v61  ;;  %v2143_v59 = vld [vmem:[%s3770_s8 + $0x280] sm:$0xff]  ;;  %v2146_v61 = vld [vmem:[%s3770_s8 + $0x298] sm:$0xff] }
 0x3fe   : > { %2644 = vst.msk [vmem:[%s3770_s8 + $0x320] sm:$0xff] %vm277_vm3, %v2612_v18  ;;  %2647 = vst.msk [vmem:[%s3770_s8 + $0x338] sm:$0xff] %vm277_vm3, %v2615_v19 }
 0x3ff   : > { %v2074_v46 = vpop.xlane.xlu0 %2073  ;;  %v2084_v48 = vpop.xlane.xlu1 %2083 }
 0x400   : > { %v2164_v62 = vmax.f32 %v2132_v14, %v2074_v46  ;;  %v2169_v0 = vmax.f32 %v2137_v11, %v2084_v48  ;;  %v2592_v46 = vld [vmem:[%s3770_s8 + $0x380] sm:$0xff]  ;;  %v2595_v48 = vld [vmem:[%s3770_s8 + $0x398] sm:$0xff] }
 0x402   : > { %2196 = vst.msk [vmem:[%s3770_s8 + $0x228] sm:$0xff] %vm277_vm3, %v2164_v62  ;;  %2201 = vst.msk [vmem:[%s3770_s8 + $0x250] sm:$0xff] %vm277_vm3, %v2169_v0 }
 0x403   : > { %v2523_v37 = vpop.xlane.xlu0 %2522  ;;  %v2533_v20 = vpop.xlane.xlu1 %2532 }
 0x404   : > { %v2613_v21 = vmax.f32 %v2581_v35, %v2523_v37  ;;  %v2618_v63 = vmax.f32 %v2586_v16, %v2533_v20  ;;  %v2144_v37 = vld [vmem:[%s3770_s8 + $0x288] sm:$0xff]  ;;  %v2149_v20 = vld [vmem:[%s3770_s8 + $0x2b0] sm:$0xff] }
 0x406   : > { %2645 = vst.msk [vmem:[%s3770_s8 + $0x328] sm:$0xff] %vm277_vm3, %v2613_v21  ;;  %2650 = vst.msk [vmem:[%s3770_s8 + $0x350] sm:$0xff] %vm277_vm3, %v2618_v63 }
 0x407   : > { %v2080_v49 = vpop.xlane.xlu1 %2079  ;;  %v2086_v30 = vpop.xlane.xlu0 %2085 }
 0x408   : > { %v2167_v10 = vmax.f32 %v2135_v1, %v2080_v49  ;;  %v2170_v32 = vmax.f32 %v2138_v47, %v2086_v30  ;;  %v2593_v49 = vld [vmem:[%s3770_s8 + $0x388] sm:$0xff]  ;;  %v2598_v30 = vld [vmem:[%s3770_s8 + $0x3b0] sm:$0xff] }
 0x40a   : > { %2199 = vst.msk [vmem:[%s3770_s8 + $0x240] sm:$0xff] %vm277_vm3, %v2167_v10  ;;  %2202 = vst.msk [vmem:[%s3770_s8 + $0x258] sm:$0xff] %vm277_vm3, %v2170_v32 }
 0x40b   : > { %v2529_v4 = vpop.xlane.xlu1 %2528  ;;  %v2535_v40 = vpop.xlane.xlu0 %2534 }
 0x40c   : > { %v2616_v50 = vmax.f32 %v2584_v38, %v2529_v4  ;;  %v2619_v52 = vmax.f32 %v2587_v2, %v2535_v40  ;;  %v2147_v4 = vld [vmem:[%s3770_s8 + $0x2a0] sm:$0xff]  ;;  %v2150_v40 = vld [vmem:[%s3770_s8 + $0x2b8] sm:$0xff] }
 0x40e   : > { %2648 = vst.msk [vmem:[%s3770_s8 + $0x340] sm:$0xff] %vm277_vm3, %v2616_v50  ;;  %2651 = vst.msk [vmem:[%s3770_s8 + $0x358] sm:$0xff] %vm277_vm3, %v2619_v52 }
 0x40f   : > { %v2082_v24 = vpop.xlane.xlu0 %2081  ;;  %v2092_v23 = vpop.xlane.xlu1 %2091 }
 0x410   : > { %v2168_v25 = vmax.f32 %v2136_v22, %v2082_v24  ;;  %v2173_v51 = vmax.f32 %v2141_v5, %v2092_v23  ;;  %v2596_v24 = vld [vmem:[%s3770_s8 + $0x3a0] sm:$0xff]  ;;  %v2599_v23 = vld [vmem:[%s3770_s8 + $0x3b8] sm:$0xff] }
 0x412   : > { %2200 = vst.msk [vmem:[%s3770_s8 + $0x248] sm:$0xff] %vm277_vm3, %v2168_v25  ;;  %2205 = vst.msk [vmem:[%s3770_s8 + $0x270] sm:$0xff] %vm277_vm3, %v2173_v51 }
 0x413   : > { %v2531_v6 = vpop.xlane.xlu0 %2530  ;;  %v2541_v8 = vpop.xlane.xlu1 %2540 }
 0x414   : > { %v2617_v41 = vmax.f32 %v2585_v53, %v2531_v6  ;;  %v2622_v31 = vmax.f32 %v2590_v39, %v2541_v8  ;;  %v2148_v6 = vld [vmem:[%s3770_s8 + $0x2a8] sm:$0xff]  ;;  %v2153_v8 = vld [vmem:[%s3770_s8 + $0x2d0] sm:$0xff] }
 0x416   : > { %2649 = vst.msk [vmem:[%s3770_s8 + $0x348] sm:$0xff] %vm277_vm3, %v2617_v41  ;;  %2654 = vst.msk [vmem:[%s3770_s8 + $0x370] sm:$0xff] %vm277_vm3, %v2622_v31 }
 0x417   : > { %v2088_v56 = vpop.xlane.xlu1 %2087  ;;  %v2094_v7 = vpop.xlane.xlu0 %2093 }
 0x418   : > { %v2171_v26 = vmax.f32 %v2139_v33, %v2088_v56  ;;  %v2174_v28 = vmax.f32 %v2142_v54, %v2094_v7  ;;  %v2597_v56 = vld [vmem:[%s3770_s8 + $0x3a8] sm:$0xff]  ;;  %v2602_v7 = vld [vmem:[%s3770_s8 + $0x3d0] sm:$0xff] }
 0x41a   : > { %2203 = vst.msk [vmem:[%s3770_s8 + $0x260] sm:$0xff] %vm277_vm3, %v2171_v26  ;;  %2206 = vst.msk [vmem:[%s3770_s8 + $0x278] sm:$0xff] %vm277_vm3, %v2174_v28 }
 0x41b   : > { %v2537_v55 = vpop.xlane.xlu1 %2536  ;;  %v2543_v57 = vpop.xlane.xlu0 %2542 }
 0x41c   : > { %v2620_v12 = vmax.f32 %v2588_v42, %v2537_v55  ;;  %v2623_v15 = vmax.f32 %v2591_v44, %v2543_v57  ;;  %v2151_v55 = vld [vmem:[%s3770_s8 + $0x2c0] sm:$0xff]  ;;  %v2154_v57 = vld [vmem:[%s3770_s8 + $0x2d8] sm:$0xff] }
 0x41e   : > { %2652 = vst.msk [vmem:[%s3770_s8 + $0x360] sm:$0xff] %vm277_vm3, %v2620_v12  ;;  %2655 = vst.msk [vmem:[%s3770_s8 + $0x378] sm:$0xff] %vm277_vm3, %v2623_v15 }
 0x41f   : > { %v2090_v36 = vpop.xlane.xlu0 %2089  ;;  %v2100_v58 = vpop.xlane.xlu1 %2099 }
 0x420   : > { %v2172_v13 = vmax.f32 %v2140_v17, %v2090_v36  ;;  %v2177_v60 = vmax.f32 %v2145_v34, %v2100_v58  ;;  %v2600_v36 = vld [vmem:[%s3770_s8 + $0x3c0] sm:$0xff]  ;;  %v2603_v58 = vld [vmem:[%s3770_s8 + $0x3d8] sm:$0xff] }
 0x422   : > { %2204 = vst.msk [vmem:[%s3770_s8 + $0x268] sm:$0xff] %vm277_vm3, %v2172_v13  ;;  %2209 = vst.msk [vmem:[%s3770_s8 + $0x290] sm:$0xff] %vm277_vm3, %v2177_v60 }
 0x423   : > { %v2539_v27 = vpop.xlane.xlu0 %2538  ;;  %v2549_v29 = vpop.xlane.xlu1 %2548 }
 0x424   : > { %v2621_v3 = vmax.f32 %v2589_v43, %v2539_v27  ;;  %v2626_v9 = vmax.f32 %v2594_v45, %v2549_v29  ;;  %v2152_v27 = vld [vmem:[%s3770_s8 + $0x2c8] sm:$0xff]  ;;  %v2157_v29 = vld [vmem:[%s3770_s8 + $0x2f0] sm:$0xff] }
 0x426   : > { %2653 = vst.msk [vmem:[%s3770_s8 + $0x368] sm:$0xff] %vm277_vm3, %v2621_v3  ;;  %2658 = vst.msk [vmem:[%s3770_s8 + $0x390] sm:$0xff] %vm277_vm3, %v2626_v9 }
 0x427   : > { %v2096_v18 = vpop.xlane.xlu1 %2095  ;;  %v2102_v19 = vpop.xlane.xlu0 %2101 }
 0x428   : > { %v2175_v14 = vmax.f32 %v2143_v59, %v2096_v18  ;;  %v2178_v11 = vmax.f32 %v2146_v61, %v2102_v19  ;;  %v2601_v18 = vld [vmem:[%s3770_s8 + $0x3c8] sm:$0xff]  ;;  %v2155_v19 = vld [vmem:[%s3770_s8 + $0x2e0] sm:$0xff] }
 0x42a   : > { %2207 = vst.msk [vmem:[%s3770_s8 + $0x280] sm:$0xff] %vm277_vm3, %v2175_v14  ;;  %2210 = vst.msk [vmem:[%s3770_s8 + $0x298] sm:$0xff] %vm277_vm3, %v2178_v11 }
 0x42b   : > { %v2545_v62 = vpop.xlane.xlu1 %2544  ;;  %v2551_v0 = vpop.xlane.xlu0 %2550 }
 0x42c   : > { %v2624_v35 = vmax.f32 %v2592_v46, %v2545_v62  ;;  %v2627_v16 = vmax.f32 %v2595_v48, %v2551_v0  ;;  %v2158_v62 = vld [vmem:[%s3770_s8 + $0x2f8] sm:$0xff]  ;;  %v2604_v0 = vld [vmem:[%s3770_s8 + $0x3e0] sm:$0xff] }
 0x42e   : > { %2656 = vst.msk [vmem:[%s3770_s8 + $0x380] sm:$0xff] %vm277_vm3, %v2624_v35  ;;  %2659 = vst.msk [vmem:[%s3770_s8 + $0x398] sm:$0xff] %vm277_vm3, %v2627_v16 }
 0x42f   : > { %v2098_v21 = vpop.xlane.xlu0 %2097  ;;  %v2108_v63 = vpop.xlane.xlu1 %2107 }
 0x430   : > { %v2176_v1 = vmax.f32 %v2144_v37, %v2098_v21  ;;  %v2181_v47 = vmax.f32 %v2149_v20, %v2108_v63  ;;  %v2156_v21 = vld [vmem:[%s3770_s8 + $0x2e8] sm:$0xff]  ;;  %v2606_v63 = vld [vmem:[%s3770_s8 + $0x3f0] sm:$0xff] }
 0x432   : > { %2208 = vst.msk [vmem:[%s3770_s8 + $0x288] sm:$0xff] %vm277_vm3, %v2176_v1  ;;  %2213 = vst.msk [vmem:[%s3770_s8 + $0x2b0] sm:$0xff] %vm277_vm3, %v2181_v47 }
 0x433   : > { %v2547_v10 = vpop.xlane.xlu0 %2546  ;;  %v2557_v32 = vpop.xlane.xlu1 %2556 }
 0x434   : > { %v2625_v38 = vmax.f32 %v2593_v49, %v2547_v10  ;;  %v2630_v2 = vmax.f32 %v2598_v30, %v2557_v32  ;;  %v2605_v10 = vld [vmem:[%s3770_s8 + $0x3e8] sm:$0xff] }
 0x436   : > { %2657 = vst.msk [vmem:[%s3770_s8 + $0x388] sm:$0xff] %vm277_vm3, %v2625_v38  ;;  %2662 = vst.msk [vmem:[%s3770_s8 + $0x3b0] sm:$0xff] %vm277_vm3, %v2630_v2  ;;  %v2607_v2 = vld [vmem:[%s3770_s8 + $0x3f8] sm:$0xff] }
 0x437   : > { %v2104_v50 = vpop.xlane.xlu1 %2103  ;;  %v2110_v52 = vpop.xlane.xlu0 %2109 }
 0x438   : > { %v2179_v22 = vmax.f32 %v2147_v4, %v2104_v50  ;;  %v2182_v5 = vmax.f32 %v2150_v40, %v2110_v52 }
 0x43a   : > { %2211 = vst.msk [vmem:[%s3770_s8 + $0x2a0] sm:$0xff] %vm277_vm3, %v2179_v22  ;;  %2214 = vst.msk [vmem:[%s3770_s8 + $0x2b8] sm:$0xff] %vm277_vm3, %v2182_v5 }
 0x43b   : > { %v2553_v25 = vpop.xlane.xlu1 %2552  ;;  %v2559_v51 = vpop.xlane.xlu0 %2558 }
 0x43c   : > { %v2628_v53 = vmax.f32 %v2596_v24, %v2553_v25  ;;  %v2631_v39 = vmax.f32 %v2599_v23, %v2559_v51 }
 0x43e   : > { %2660 = vst.msk [vmem:[%s3770_s8 + $0x3a0] sm:$0xff] %vm277_vm3, %v2628_v53  ;;  %2663 = vst.msk [vmem:[%s3770_s8 + $0x3b8] sm:$0xff] %vm277_vm3, %v2631_v39 }
 0x43f   : > { %v2106_v41 = vpop.xlane.xlu0 %2105  ;;  %v2116_v31 = vpop.xlane.xlu1 %2115 }
 0x440   : > { %v2180_v33 = vmax.f32 %v2148_v6, %v2106_v41  ;;  %v2185_v54 = vmax.f32 %v2153_v8, %v2116_v31 }
 0x442   : > { %2212 = vst.msk [vmem:[%s3770_s8 + $0x2a8] sm:$0xff] %vm277_vm3, %v2180_v33  ;;  %2217 = vst.msk [vmem:[%s3770_s8 + $0x2d0] sm:$0xff] %vm277_vm3, %v2185_v54 }
 0x443   : > { %v2555_v26 = vpop.xlane.xlu0 %2554  ;;  %v2565_v28 = vpop.xlane.xlu1 %2564 }
 0x444   : > { %v2629_v42 = vmax.f32 %v2597_v56, %v2555_v26  ;;  %v2634_v44 = vmax.f32 %v2602_v7, %v2565_v28 }
 0x446   : > { %2661 = vst.msk [vmem:[%s3770_s8 + $0x3a8] sm:$0xff] %vm277_vm3, %v2629_v42  ;;  %2666 = vst.msk [vmem:[%s3770_s8 + $0x3d0] sm:$0xff] %vm277_vm3, %v2634_v44 }
 0x447   : > { %v2112_v12 = vpop.xlane.xlu1 %2111  ;;  %v2118_v15 = vpop.xlane.xlu0 %2117 }
 0x448   : > { %v2183_v17 = vmax.f32 %v2151_v55, %v2112_v12  ;;  %v2186_v34 = vmax.f32 %v2154_v57, %v2118_v15 }
 0x44a   : > { %2215 = vst.msk [vmem:[%s3770_s8 + $0x2c0] sm:$0xff] %vm277_vm3, %v2183_v17  ;;  %2218 = vst.msk [vmem:[%s3770_s8 + $0x2d8] sm:$0xff] %vm277_vm3, %v2186_v34 }
 0x44b   : > { %v2561_v13 = vpop.xlane.xlu1 %2560  ;;  %v2567_v60 = vpop.xlane.xlu0 %2566 }
 0x44c   : > { %v2632_v43 = vmax.f32 %v2600_v36, %v2561_v13  ;;  %v2635_v45 = vmax.f32 %v2603_v58, %v2567_v60 }
 0x44e   : > { %2664 = vst.msk [vmem:[%s3770_s8 + $0x3c0] sm:$0xff] %vm277_vm3, %v2632_v43  ;;  %2667 = vst.msk [vmem:[%s3770_s8 + $0x3d8] sm:$0xff] %vm277_vm3, %v2635_v45 }
 0x44f   : > { %v2114_v3 = vpop.xlane.xlu0 %2113  ;;  %v2124_v9 = vpop.xlane.xlu1 %2123 }
 0x450   : > { %v2184_v59 = vmax.f32 %v2152_v27, %v2114_v3  ;;  %v2189_v61 = vmax.f32 %v2157_v29, %v2124_v9 }
 0x452   : > { %2216 = vst.msk [vmem:[%s3770_s8 + $0x2c8] sm:$0xff] %vm277_vm3, %v2184_v59  ;;  %2221 = vst.msk [vmem:[%s3770_s8 + $0x2f0] sm:$0xff] %vm277_vm3, %v2189_v61 }
 0x453   : > { %v2563_v14 = vpop.xlane.xlu0 %2562  ;;  %v2120_v11 = vpop.xlane.xlu1 %2119 }
 0x454   : > { %v2633_v46 = vmax.f32 %v2601_v18, %v2563_v14  ;;  %v2187_v48 = vmax.f32 %v2155_v19, %v2120_v11 }
 0x456   : > { %2665 = vst.msk [vmem:[%s3770_s8 + $0x3c8] sm:$0xff] %vm277_vm3, %v2633_v46  ;;  %2219 = vst.msk [vmem:[%s3770_s8 + $0x2e0] sm:$0xff] %vm277_vm3, %v2187_v48 }
 0x457   : > { %v2126_v35 = vpop.xlane.xlu0 %2125  ;;  %v2569_v16 = vpop.xlane.xlu1 %2568 }
 0x458   : > { %v2190_v37 = vmax.f32 %v2158_v62, %v2126_v35  ;;  %v2636_v20 = vmax.f32 %v2604_v0, %v2569_v16 }
 0x45a   : > { %2222 = vst.msk [vmem:[%s3770_s8 + $0x2f8] sm:$0xff] %vm277_vm3, %v2190_v37  ;;  %2668 = vst.msk [vmem:[%s3770_s8 + $0x3e0] sm:$0xff] %vm277_vm3, %v2636_v20 }
 0x45b   : > { %v2122_v1 = vpop.xlane.xlu0 %2121  ;;  %v2573_v47 = vpop.xlane.xlu1 %2572 }
 0x45c   : > { %v2188_v49 = vmax.f32 %v2156_v21, %v2122_v1  ;;  %v2638_v30 = vmax.f32 %v2606_v63, %v2573_v47 }
 0x45e   : > { %2220 = vst.msk [vmem:[%s3770_s8 + $0x2e8] sm:$0xff] %vm277_vm3, %v2188_v49  ;;  %2670 = vst.msk [vmem:[%s3770_s8 + $0x3f0] sm:$0xff] %vm277_vm3, %v2638_v30 }
 0x45f   : > { %v2571_v32 = vpop.xlane.xlu0 %2570 }
 0x460   : > { %v2637_v38 = vmax.f32 %v2605_v10, %v2571_v32 }
 0x462   : > { %2669 = vst.msk [vmem:[%s3770_s8 + $0x3e8] sm:$0xff] %vm277_vm3, %v2637_v38 }
 0x463   : > { %v2575_v4 = vpop.xlane.xlu0 %2574 }
 0x464   : > { %v2639_v40 = vmax.f32 %v2607_v2, %v2575_v4 }
 0x466   : > { %2671 = vst.msk [vmem:[%s3770_s8 + $0x3f8] sm:$0xff] %vm277_vm3, %v2639_v40 }
 0x467 PF: > { %s16_s23 = sadd.s32 1, %s3303_s23   ;;  %s4829_s21 = smov %s3299_s22 }
 0x468   : > { %p13_p5 = scmp.ge.s32.totalorder %s16_s23, 4   ;;  %s4830_s22 = smov %s4832_s24 }
 0x46a   :  { %15 = sbr.rel (!%p13_p5) target bundleno = 2 (0x2), region = 78 }

// kernel: pointnet_plus_conv_forward.3
= control target key start
LH: loop header
LB: loop body
LE: loop exit
PB: predicated region body
PF: predicated region fallthrough
CT: control target
= control target key end

     0   :  { %s9320_s0 = inlined_call_operand.vmem [shape: f32[2,1024], index: 0, kind: input, shape index: {}]   ;;  %s9321_s1 = inlined_call_operand.vmem [shape: bf16[2,256], index: 1, kind: input, shape index: {}]   ;;  %s9322_s2 = inlined_call_operand.vmem [shape: f32[1,1024], index: 2, kind: input, shape index: {}]   ;;  %s9323_s3 = inlined_call_operand.vmem [shape: bf16[1024,512], index: 3, kind: input, shape index: {}]   ;;  %s9324_s4 = inlined_call_operand.vmem [shape: f32[1,512], index: 4, kind: input, shape index: {}]   ;;  %s9325_s5 = inlined_call_operand.vmem [shape: bf16[256,512], index: 5, kind: input, shape index: {}]   ;;  %s9326_s6 = inlined_call_operand.vmem [shape: f32[1,512], index: 6, kind: input, shape index: {}]   ;;  %s9327_s7 = inlined_call_operand.vmem [shape: bf16[512,512], index: 7, kind: input, shape index: {}]   ;;  %s9328_s8 = inlined_call_operand.vmem [shape: bf16[512,512], index: 8, kind: input, shape index: {}]   ;;  %s9329_s9 = inlined_call_operand.vmem [shape: f32[1,512], index: 9, kind: input, shape index: {}]   ;;  %s9330_s10 = inlined_call_operand.vmem [shape: bf16[512,256], index: 10, kind: input, shape index: {}]   ;;  %s9331_s11 = inlined_call_operand.vmem [shape: f32[1,256], index: 11, kind: input, shape index: {}]   ;;  %s9332_s12 = inlined_call_operand.vmem [shape: bf16[256,128], index: 12, kind: input, shape index: {}]   ;;  %s9333_s13 = inlined_call_operand.vmem [shape: f32[1,128], index: 13, kind: input, shape index: {}]   ;;  %s9334_s14 = inlined_call_operand.vmem [shape: bf16[128,128], index: 14, kind: input, shape index: {}]   ;;  %s9335_s15 = inlined_call_operand.vmem [shape: f32[1,128], index: 15, kind: input, shape index: {}]   ;;  %s9336_s16 = inlined_call_operand.hbm [shape: f32[2,128], index: 16, kind: output, shape index: {}]  }
   0x1   :  { %9338 = sst [smem:[#allocation5_spill]] %s9320_s0 }
   0x2   :  { %v6038_v0 = vld [vmem:[%s9323_s3 + $0x4] ss:$16 sps:$4 sm:$0xff]   ;;  %v6040_v1 = vld [vmem:[%s9323_s3 + $0xc] ss:$16 sps:$4 sm:$0xff]   ;;  %v6042_v2 = vld [vmem:[%s9323_s3] ss:$16 sps:$4 sm:$0xff]   ;;  %v59_v36 = vlaneseq }
   0x3   :  { %1739 = vmatprep.subr.bf16.mxu0 %v6038_v0  ;;  %v6043_v3 = vld [vmem:[%s9323_s3 + $0x8] ss:$16 sps:$4 sm:$0xff]   ;;  %1903 = vmatprep.subr.bf16.mxu1 %v6040_v1  ;;  %v6044_v4 = vld [vmem:[%s9323_s3 + $0x24] ss:$16 sps:$4 sm:$0xff]   ;;  %v6046_v5 = vld [vmem:[%s9323_s3 + $0x2c] ss:$16 sps:$4 sm:$0xff]  }
   0x4   :  { %1740 = vmatpush1.bf16.msra.mxu0 %v6042_v2  ;;  %1904 = vmatpush1.bf16.msra.mxu1 %v6043_v3  ;;  %v6048_v6 = vld [vmem:[%s9323_s3 + $0x20] ss:$16 sps:$4 sm:$0xff]   ;;  %v6049_v7 = vld [vmem:[%s9323_s3 + $0x28] ss:$16 sps:$4 sm:$0xff]   ;;  %v6050_v8 = vld [vmem:[%s9323_s3 + $0x44] ss:$16 sps:$4 sm:$0xff]  }
   0x5   :  { %1741 = vmatprep.subr.bf16.mxu0 %v6044_v4  ;;  %1905 = vmatprep.subr.bf16.mxu1 %v6046_v5  ;;  %v6052_v9 = vld [vmem:[%s9323_s3 + $0x4c] ss:$16 sps:$4 sm:$0xff]   ;;  %v6054_v10 = vld [vmem:[%s9323_s3 + $0x40] ss:$16 sps:$4 sm:$0xff]   ;;  %v6055_v11 = vld [vmem:[%s9323_s3 + $0x48] ss:$16 sps:$4 sm:$0xff]  }
   0x6   :  { %v6056_v12 = vld [vmem:[%s9323_s3 + $0x64] ss:$16 sps:$4 sm:$0xff]   ;;  %v6058_v13 = vld [vmem:[%s9323_s3 + $0x6c] ss:$16 sps:$4 sm:$0xff]   ;;  %v6060_v14 = vld [vmem:[%s9323_s3 + $0x60] ss:$16 sps:$4 sm:$0xff]  }
   0x7   :  { %v6061_v15 = vld [vmem:[%s9323_s3 + $0x68] ss:$16 sps:$4 sm:$0xff]   ;;  %v6062_v16 = vld [vmem:[%s9323_s3 + $0x84] ss:$16 sps:$4 sm:$0xff]   ;;  %v6064_v17 = vld [vmem:[%s9323_s3 + $0x8c] ss:$16 sps:$4 sm:$0xff]  }
   0x8   :  { %1742 = vmatpush1.bf16.msra.mxu0 %v6048_v6  ;;  %1906 = vmatpush1.bf16.msra.mxu1 %v6049_v7  ;;  %v6066_v18 = vld [vmem:[%s9323_s3 + $0x80] ss:$16 sps:$4 sm:$0xff]   ;;  %v6067_v19 = vld [vmem:[%s9323_s3 + $0x88] ss:$16 sps:$4 sm:$0xff]   ;;  %v6068_v20 = vld [vmem:[%s9323_s3 + $0xa4] ss:$16 sps:$4 sm:$0xff]  }
   0x9   :  { %1743 = vmatprep.subr.bf16.mxu0 %v6050_v8  ;;  %1907 = vmatprep.subr.bf16.mxu1 %v6052_v9  ;;  %v6070_v21 = vld [vmem:[%s9323_s3 + $0xac] ss:$16 sps:$4 sm:$0xff]   ;;  %v6072_v22 = vld [vmem:[%s9323_s3 + $0xa0] ss:$16 sps:$4 sm:$0xff]   ;;  %v6073_v23 = vld [vmem:[%s9323_s3 + $0xa8] ss:$16 sps:$4 sm:$0xff]  }
   0xa   :  { %v6074_v24 = vld [vmem:[%s9323_s3 + $0xc4] ss:$16 sps:$4 sm:$0xff]   ;;  %v6076_v25 = vld [vmem:[%s9323_s3 + $0xcc] ss:$16 sps:$4 sm:$0xff]   ;;  %v6078_v26 = vld [vmem:[%s9323_s3 + $0xc0] ss:$16 sps:$4 sm:$0xff]  }
   0xb   :  { %v6079_v27 = vld [vmem:[%s9323_s3 + $0xc8] ss:$16 sps:$4 sm:$0xff]   ;;  %v6080_v28 = vld [vmem:[%s9323_s3 + $0xe4] ss:$16 sps:$4 sm:$0xff]   ;;  %v6082_v29 = vld [vmem:[%s9323_s3 + $0xec] ss:$16 sps:$4 sm:$0xff]  }
   0xc   :  { %1744 = vmatpush1.bf16.msra.mxu0 %v6054_v10  ;;  %1908 = vmatpush1.bf16.msra.mxu1 %v6055_v11  ;;  %v6084_v30 = vld [vmem:[%s9323_s3 + $0xe0] ss:$16 sps:$4 sm:$0xff]   ;;  %v6085_v31 = vld [vmem:[%s9323_s3 + $0xe8] ss:$16 sps:$4 sm:$0xff]   ;;  %v6086_v32 = vld [vmem:[%s9323_s3 + $0x104] ss:$16 sps:$4 sm:$0xff]  }
   0xd   :  { %1745 = vmatprep.subr.bf16.mxu0 %v6056_v12  ;;  %1909 = vmatprep.subr.bf16.mxu1 %v6058_v13  ;;  %v6088_v33 = vld [vmem:[%s9323_s3 + $0x10c] ss:$16 sps:$4 sm:$0xff]   ;;  %v6090_v34 = vld [vmem:[%s9323_s3 + $0x100] ss:$16 sps:$4 sm:$0xff]   ;;  %v6091_v35 = vld [vmem:[%s9323_s3 + $0x108] ss:$16 sps:$4 sm:$0xff]  }
   0xe   :  { %v6092_v37 = vld [vmem:[%s9323_s3 + $0x124] ss:$16 sps:$4 sm:$0xff]   ;;  %v6094_v38 = vld [vmem:[%s9323_s3 + $0x12c] ss:$16 sps:$4 sm:$0xff]   ;;  %v6096_v39 = vld [vmem:[%s9323_s3 + $0x120] ss:$16 sps:$4 sm:$0xff]  }
   0xf   :  { %v7253_v40 = vshrl.u32 %v59_v36, 7  ;;  %v7046_v41 = vmov 1983009808   ;;  %v6097_v43 = vld [vmem:[%s9323_s3 + $0x128] ss:$16 sps:$4 sm:$0xff]   ;;  %v7291_v55 = vld [vmem:[%s9322_s2] sm:$0xff] }
  0x10   :  { %1746 = vmatpush1.bf16.msra.mxu0 %v6060_v14  ;;  %1910 = vmatpush1.bf16.msra.mxu1 %v6061_v15  ;;  %v94_v42 = vunpack.c.l.s4 %v7046_v41  ;;  %v6098_v44 = vld [vmem:[%s9323_s3 + $0x144] ss:$16 sps:$4 sm:$0xff]   ;;  %v6100_v45 = vld [vmem:[%s9323_s3 + $0x14c] ss:$16 sps:$4 sm:$0xff]   ;;  %v6102_v46 = vld [vmem:[%s9323_s3 + $0x140] ss:$16 sps:$4 sm:$0xff]  }
  0x11   :  { %1747 = vmatprep.subr.bf16.mxu0 %v6062_v16  ;;  %1911 = vmatprep.subr.bf16.mxu1 %v6064_v17  ;;  %v6103_v47 = vld [vmem:[%s9323_s3 + $0x148] ss:$16 sps:$4 sm:$0xff]   ;;  %v7271_v48 = vsub.s32 0, %v7253_v40  ;;  %v6104_v50 = vld [vmem:[%s9323_s3 + $0x164] ss:$16 sps:$4 sm:$0xff]   ;;  %v7277_v51 = vsub.s32 1, %v7253_v40 }
  0x12   :  { %v95_v49 = vunpack.c.0.s8 %v94_v42  ;;  %v7280_v52 = vsub.s32 2, %v7253_v40  ;;  %v6106_v53 = vld [vmem:[%s9323_s3 + $0x16c] ss:$16 sps:$4 sm:$0xff]   ;;  %v7286_v54 = vsub.s32 3, %v7253_v40  ;;  %v6108_v57 = vld [vmem:[%s9323_s3 + $0x160] ss:$16 sps:$4 sm:$0xff]  }
  0x13   :  { %v6109_v58 = vld [vmem:[%s9323_s3 + $0x168] ss:$16 sps:$4 sm:$0xff]   ;;  %v62_v59 = vrot.slane %v7291_v55, %v7271_v48  ;;  %v66_v60 = vrot.slane %v7291_v55, %v7277_v51  ;;  %v6110_v62 = vld [vmem:[%s9323_s3 + $0x184] ss:$16 sps:$4 sm:$0xff]   ;;  %v6112_v63 = vld [vmem:[%s9323_s3 + $0x18c] ss:$16 sps:$4 sm:$0xff]  }
  0x14   :  { %1748 = vmatpush1.bf16.msra.mxu0 %v6066_v18  ;;  %1912 = vmatpush1.bf16.msra.mxu1 %v6067_v19  ;;  %v7294_v56 = vsub.s32 %v95_v49, %v7253_v40  ;;  %v70_v61 = vrot.slane %v7291_v55, %v7280_v52  ;;  %v74_v0 = vrot.slane %v7291_v55, %v7286_v54  ;;  %v6114_v3 = vld [vmem:[%s9323_s3 + $0x180] ss:$16 sps:$4 sm:$0xff]   ;;  %v6115_v4 = vld [vmem:[%s9323_s3 + $0x188] ss:$16 sps:$4 sm:$0xff]   ;;  %v6116_v6 = vld [vmem:[%s9323_s3 + $0x1a4] ss:$16 sps:$4 sm:$0xff]  }
  0x15   :  { %1749 = vmatprep.subr.bf16.mxu0 %v6068_v20  ;;  %1913 = vmatprep.subr.bf16.mxu1 %v6070_v21  ;;  %v91_v1 = vcombine.low %v62_v59, %v66_v60  ;;  %v6118_v7 = vld [vmem:[%s9323_s3 + $0x1ac] ss:$16 sps:$4 sm:$0xff]   ;;  %s9339_s27 = sld [smem:[#allocation5_spill]]  ;;  %v6120_v11 = vld [vmem:[%s9323_s3 + $0x1a0] ss:$16 sps:$4 sm:$0xff]  }
  0x16   :  { %v92_v2 = vcombine.low %v70_v61, %v74_v0  ;;  %v6121_v12 = vld [vmem:[%s9323_s3 + $0x1a8] ss:$16 sps:$4 sm:$0xff]   ;;  %v6122_v13 = vld [vmem:[%s9323_s3 + $0x1c4] ss:$16 sps:$4 sm:$0xff]   ;;  %v6124_v14 = vld [vmem:[%s9323_s3 + $0x1cc] ss:$16 sps:$4 sm:$0xff]  }
  0x17   :  { %v99_v5 = vrot.slane %v91_v1, %v7294_v56  ;;  %v6126_v18 = vld [vmem:[%s9323_s3 + $0x1c0] ss:$16 sps:$4 sm:$0xff]   ;;  %v6127_v19 = vld [vmem:[%s9323_s3 + $0x1c8] ss:$16 sps:$4 sm:$0xff]   ;;  %v6128_v20 = vld [vmem:[%s9323_s3 + $0x1e4] ss:$16 sps:$4 sm:$0xff]  }
  0x18   :  { %1750 = vmatpush1.bf16.msra.mxu0 %v6072_v22  ;;  %1914 = vmatpush1.bf16.msra.mxu1 %v6073_v23  ;;  %v106_v8 = vrot.slane %v92_v2, %v7294_v56  ;;  %v6130_v21 = vld [vmem:[%s9323_s3 + $0x1ec] ss:$16 sps:$4 sm:$0xff]   ;;  %v6140_v36 = vld [vmem:[%s9323_s3 + $0x220] ss:$16 sps:$4 sm:$0xff]   ;;  %v6149_v42 = vld [vmem:[%s9323_s3 + $0x248] ss:$16 sps:$4 sm:$0xff]  }
  0x19   :  { %1751 = vmatprep.subr.bf16.mxu0 %v6074_v24  ;;  %1915 = vmatprep.subr.bf16.mxu1 %v6076_v25  ;;  %v6132_v25 = vld [vmem:[%s9323_s3 + $0x1e0] ss:$16 sps:$4 sm:$0xff]   ;;  %v6163_v49 = vld [vmem:[%s9323_s3 + $0x28c] ss:$16 sps:$4 sm:$0xff]   ;;  %v6167_v60 = vld [vmem:[%s9323_s3 + $0x2a8] ss:$16 sps:$4 sm:$0xff]  }
  0x1a   :  { %v107_v10 = vcombine.low %v99_v5, %v106_v8  ;;  %v6146_v41 = vld [vmem:[%s9323_s3 + $0x240] ss:$16 sps:$4 sm:$0xff]   ;;  %v6172_v61 = vld [vmem:[%s9323_s3 + $0x2c4] ss:$16 sps:$4 sm:$0xff]   ;;  %v6173_v0 = vld [vmem:[%s9323_s3 + $0x2c8] ss:$16 sps:$4 sm:$0xff]  }
  0x1b   :  { %v55_v9 = vld [vmem:[%s9339_s27] sm:$0xff]  ;;  %v6181_v2 = vld [vmem:[%s9323_s3 + $0x2ec] ss:$16 sps:$4 sm:$0xff]   ;;  %v6185_v8 = vld [vmem:[%s9323_s3 + $0x308] ss:$16 sps:$4 sm:$0xff]  }
  0x1c   :  { %1752 = vmatpush1.bf16.msra.mxu0 %v6078_v26  ;;  %1916 = vmatpush1.bf16.msra.mxu1 %v6079_v27  ;;  %v127_v15 = vadd.f32 %v107_v10, %v55_v9  ;;  %v6133_v26 = vld [vmem:[%s9323_s3 + $0x1e8] ss:$16 sps:$4 sm:$0xff]   ;;  %v6136_v27 = vld [vmem:[%s9323_s3 + $0x204] ss:$16 sps:$4 sm:$0xff]   ;;  %v6164_v59 = vld [vmem:[%s9323_s3 + $0x2a0] ss:$16 sps:$4 sm:$0xff]  }
  0x1d   :  { %1753 = vmatprep.subr.bf16.mxu0 %v6080_v28  ;;  %1917 = vmatprep.subr.bf16.mxu1 %v6082_v29  ;;  %v6139_v28 = vld [vmem:[%s9323_s3 + $0x20c] ss:$16 sps:$4 sm:$0xff]   ;;  %v6178_v1 = vld [vmem:[%s9323_s3 + $0x2e4] ss:$16 sps:$4 sm:$0xff]  }
  0x1e   :  { %v131_v16 = vcombine.high %v127_v15, %v127_v15  ;;  %v138_v17 = vrot.slane %v127_v15, %v7294_v56  ;;  %v6184_v5 = vld [vmem:[%s9323_s3 + $0x304] ss:$16 sps:$4 sm:$0xff]   ;;  %v6193_v10 = vld [vmem:[%s9323_s3 + $0x32c] ss:$16 sps:$4 sm:$0xff]   ;;  %v6194_v15 = vld [vmem:[%s9323_s3 + $0x340] ss:$16 sps:$4 sm:$0xff]  }
  0x1f   :  { %v6190_v9 = vld [vmem:[%s9323_s3 + $0x324] ss:$16 sps:$4 sm:$0xff]  }
  0x20   :  { %1754 = vmatpush1.bf16.msra.mxu0 %v6084_v30  ;;  %1918 = vmatpush1.bf16.msra.mxu1 %v6085_v31  ;;  %v146_v22 = vcombine.high %v138_v17, %v138_v17  ;;  %v7359_v23 = vrot.slane %v131_v16, %v7294_v56  ;;  %v173_v30 = vpack.c.bf16 %v138_v17, %v138_v17  ;;  %v6134_v31 = vld [vmem:[%s9323_s3 + $0x200] ss:$16 sps:$4 sm:$0xff]   ;;  %v6197_v16 = vld [vmem:[%s9323_s3 + $0x348] ss:$16 sps:$4 sm:$0xff]   ;;  %v6202_v17 = vld [vmem:[%s9323_s3 + $0x364] ss:$16 sps:$4 sm:$0xff]  }
  0x21   :  { %1755 = vmatprep.subr.bf16.mxu0 %v6086_v32  ;;  %1919 = vmatprep.subr.bf16.mxu1 %v6088_v33  ;;  %v6137_v32 = vld [vmem:[%s9323_s3 + $0x208] ss:$16 sps:$4 sm:$0xff]   ;;  %v6142_v33 = vld [vmem:[%s9323_s3 + $0x224] ss:$16 sps:$4 sm:$0xff]  }
  0x22   :  { %v174_v24 = vpack.c.bf16 %v146_v22, %v146_v22  ;;  %v147_v29 = vcombine.high %v7359_v23, %v7359_v23  ;;  %v6203_v22 = vld [vmem:[%s9323_s3 + $0x368] ss:$16 sps:$4 sm:$0xff]  }
  0x24   :  { %1756 = vmatpush1.bf16.msra.mxu0 %v6090_v34  ;;  %1920 = vmatpush1.bf16.msra.mxu1 %v6091_v35  ;;  %v6145_v34 = vld [vmem:[%s9323_s3 + $0x22c] ss:$16 sps:$4 sm:$0xff]   ;;  %v176_v35 = vpack.c.bf16 %v147_v29, %v147_v29  ;;  %v6209_v29 = vld [vmem:[%s9323_s3 + $0x388] ss:$16 sps:$4 sm:$0xff]  }
  0x25   :  { %1757 = vmatprep.subr.bf16.mxu0 %v6092_v37  ;;  %1921 = vmatprep.subr.bf16.mxu1 %v6094_v38  ;;  %v6143_v37 = vld [vmem:[%s9323_s3 + $0x228] ss:$16 sps:$4 sm:$0xff]   ;;  %v6148_v38 = vld [vmem:[%s9323_s3 + $0x244] ss:$16 sps:$4 sm:$0xff]  }
  0x26   :  { %1771 = vmatprep.mubr.bf16.mxu0 %v174_v24  ;;  %1935 = vmatprep.mubr.bf16.mxu1 %v174_v24  ;;  %v85_v24 = vsub.s32 6, %v7253_v40 }
  0x28   :  { %1758 = vmatpush1.bf16.msra.mxu0 %v6096_v39  ;;  %1922 = vmatpush1.bf16.msra.mxu1 %v6097_v43  ;;  %v6151_v39 = vld [vmem:[%s9323_s3 + $0x24c] ss:$16 sps:$4 sm:$0xff]   ;;  %v6154_v43 = vld [vmem:[%s9323_s3 + $0x264] ss:$16 sps:$4 sm:$0xff]  }
  0x29   :  { %1759 = vmatprep.subr.bf16.mxu0 %v6098_v44  ;;  %1923 = vmatprep.subr.bf16.mxu1 %v6100_v45  ;;  %v6157_v44 = vld [vmem:[%s9323_s3 + $0x26c] ss:$16 sps:$4 sm:$0xff]   ;;  %v6152_v45 = vld [vmem:[%s9323_s3 + $0x260] ss:$16 sps:$4 sm:$0xff]  }
  0x2c   :  { %1760 = vmatpush1.bf16.msra.mxu0 %v6102_v46  ;;  %1924 = vmatpush1.bf16.msra.mxu1 %v6103_v47  ;;  %v6155_v46 = vld [vmem:[%s9323_s3 + $0x268] ss:$16 sps:$4 sm:$0xff]   ;;  %v6160_v47 = vld [vmem:[%s9323_s3 + $0x284] ss:$16 sps:$4 sm:$0xff]  }
  0x2d   :  { %1761 = vmatprep.subr.bf16.mxu0 %v6104_v50  ;;  %1925 = vmatprep.subr.bf16.mxu1 %v6106_v53  ;;  %v6158_v50 = vld [vmem:[%s9323_s3 + $0x280] ss:$16 sps:$4 sm:$0xff]   ;;  %v6161_v53 = vld [vmem:[%s9323_s3 + $0x288] ss:$16 sps:$4 sm:$0xff]  }
  0x30   :  { %1762 = vmatpush1.bf16.msra.mxu0 %v6108_v57  ;;  %1926 = vmatpush1.bf16.msra.mxu1 %v6109_v58  ;;  %v6166_v57 = vld [vmem:[%s9323_s3 + $0x2a4] ss:$16 sps:$4 sm:$0xff]   ;;  %v6169_v58 = vld [vmem:[%s9323_s3 + $0x2ac] ss:$16 sps:$4 sm:$0xff]  }
  0x31   :  { %1763 = vmatprep.subr.bf16.mxu0 %v6110_v62  ;;  %1927 = vmatprep.subr.bf16.mxu1 %v6112_v63  ;;  %v6175_v62 = vld [vmem:[%s9323_s3 + $0x2cc] ss:$16 sps:$4 sm:$0xff]   ;;  %v6170_v63 = vld [vmem:[%s9323_s3 + $0x2c0] ss:$16 sps:$4 sm:$0xff]  }
  0x34   :  { %1764 = vmatpush1.bf16.msra.mxu0 %v6114_v3  ;;  %1928 = vmatpush1.bf16.msra.mxu1 %v6115_v4  ;;  %v6176_v3 = vld [vmem:[%s9323_s3 + $0x2e0] ss:$16 sps:$4 sm:$0xff]   ;;  %v6179_v4 = vld [vmem:[%s9323_s3 + $0x2e8] ss:$16 sps:$4 sm:$0xff]  }
  0x35   :  { %1765 = vmatprep.subr.bf16.mxu0 %v6116_v6  ;;  %1929 = vmatprep.subr.bf16.mxu1 %v6118_v7  ;;  %v6187_v6 = vld [vmem:[%s9323_s3 + $0x30c] ss:$16 sps:$4 sm:$0xff]   ;;  %v6182_v7 = vld [vmem:[%s9323_s3 + $0x300] ss:$16 sps:$4 sm:$0xff]  }
  0x38   :  { %1766 = vmatpush1.bf16.msra.mxu0 %v6120_v11  ;;  %1930 = vmatpush1.bf16.msra.mxu1 %v6121_v12  ;;  %v6188_v11 = vld [vmem:[%s9323_s3 + $0x320] ss:$16 sps:$4 sm:$0xff]   ;;  %v6191_v12 = vld [vmem:[%s9323_s3 + $0x328] ss:$16 sps:$4 sm:$0xff]  }
  0x39   :  { %1767 = vmatprep.subr.bf16.mxu0 %v6122_v13  ;;  %1931 = vmatprep.subr.bf16.mxu1 %v6124_v14  ;;  %v6196_v13 = vld [vmem:[%s9323_s3 + $0x344] ss:$16 sps:$4 sm:$0xff]   ;;  %v6199_v14 = vld [vmem:[%s9323_s3 + $0x34c] ss:$16 sps:$4 sm:$0xff]  }
  0x3c   :  { %1768 = vmatpush1.bf16.msra.mxu0 %v6126_v18  ;;  %1932 = vmatpush1.bf16.msra.mxu1 %v6127_v19  ;;  %v6205_v18 = vld [vmem:[%s9323_s3 + $0x36c] ss:$16 sps:$4 sm:$0xff]   ;;  %v77_v19 = vsub.s32 4, %v7253_v40 }
  0x3d   :  { %1769 = vmatprep.subr.bf16.mxu0 %v6128_v20  ;;  %1933 = vmatprep.subr.bf16.mxu1 %v6130_v21  ;;  %v81_v20 = vsub.s32 5, %v7253_v40  ;;  %v6200_v21 = vld [vmem:[%s9323_s3 + $0x360] ss:$16 sps:$4 sm:$0xff]  }
  0x40   :  { %1770 = vmatpush1.bf16.msra.mxu0 %v6132_v25  ;;  %1934 = vmatpush1.bf16.msra.mxu1 %v6133_v26  ;;  %v6208_v25 = vld [vmem:[%s9323_s3 + $0x384] ss:$16 sps:$4 sm:$0xff]   ;;  %v6211_v26 = vld [vmem:[%s9323_s3 + $0x38c] ss:$16 sps:$4 sm:$0xff]  }
  0x41   :  { %1780 = vmatprep.subr.bf16.mxu0 %v6136_v27  ;;  %1944 = vmatprep.subr.bf16.mxu1 %v6139_v28  ;;  %v89_v27 = vsub.s32 7, %v7253_v40  ;;  %v6206_v28 = vld [vmem:[%s9323_s3 + $0x380] ss:$16 sps:$4 sm:$0xff]  }
  0x43   :  { %1772 = vmatmul.mubr.bf16.vlgmr.msra.gmra.mrb[0].mxu0 %v173_v30  ;;  %1936 = vmatmul.mubr.bf16.vlgmr.msra.gmra.mrb[0].mxu1 %v173_v30  ;;  %v78_v30 = vrot.slane %v7291_v55, %v77_v19  ;;  %v6265_v19 = vld [vmem:[%s9323_s3 + $0x4ac] ss:$16 sps:$4 sm:$0xff]  }
  0x44   :  { %1781 = vmatpush1.bf16.msra.mxu0 %v6134_v31  ;;  %1945 = vmatpush1.bf16.msra.mxu1 %v6137_v32  ;;  %v6214_v31 = vld [vmem:[%s9323_s3 + $0x3a4] ss:$16 sps:$4 sm:$0xff]   ;;  %v6217_v32 = vld [vmem:[%s9323_s3 + $0x3ac] ss:$16 sps:$4 sm:$0xff]  }
  0x45   :  { %1782 = vmatprep.subr.bf16.mxu0 %v6142_v33  ;;  %1946 = vmatprep.subr.bf16.mxu1 %v6145_v34  ;;  %v82_v33 = vrot.slane %v7291_v55, %v81_v20  ;;  %v86_v34 = vrot.slane %v7291_v55, %v85_v24  ;;  %v6260_v20 = vld [vmem:[%s9323_s3 + $0x4a0] ss:$16 sps:$4 sm:$0xff]   ;;  %v6271_v24 = vld [vmem:[%s9323_s3 + $0x4cc] ss:$16 sps:$4 sm:$0xff]  }
  0x46   :  { %1812 = vmatprep.mubr.bf16.mxu0 %v176_v35  ;;  %1976 = vmatprep.mubr.bf16.mxu1 %v176_v35  ;;  %v90_v35 = vrot.slane %v7291_v55, %v89_v27  ;;  %v6223_v55 = vld [vmem:[%s9323_s3 + $0x3cc] ss:$16 sps:$4 sm:$0xff]   ;;  %v6274_v27 = vld [vmem:[%s9323_s3 + $0x4e4] ss:$16 sps:$4 sm:$0xff]  }
  0x48   :  { %1783 = vmatpush1.bf16.msra.mxu0 %v6140_v36  ;;  %1947 = vmatpush1.bf16.msra.mxu1 %v6143_v37  ;;  %v6212_v36 = vld [vmem:[%s9323_s3 + $0x3a0] ss:$16 sps:$4 sm:$0xff]   ;;  %v6215_v37 = vld [vmem:[%s9323_s3 + $0x3a8] ss:$16 sps:$4 sm:$0xff]  }
  0x49   :  { %1784 = vmatprep.subr.bf16.mxu0 %v6148_v38  ;;  %1948 = vmatprep.subr.bf16.mxu1 %v6151_v39  ;;  %v6220_v38 = vld [vmem:[%s9323_s3 + $0x3c4] ss:$16 sps:$4 sm:$0xff]   ;;  %v108_v39 = vcombine.low %v78_v30, %v82_v33  ;;  %v6275_v30 = vld [vmem:[%s9323_s3 + $0x4e8] ss:$16 sps:$4 sm:$0xff]   ;;  %v6278_v33 = vld [vmem:[%s9323_s3 + $0x500] ss:$16 sps:$4 sm:$0xff]  }
  0x4c   :  { %1785 = vmatpush1.bf16.msra.mxu0 %v6146_v41  ;;  %1949 = vmatpush1.bf16.msra.mxu1 %v6149_v42  ;;  %v109_v41 = vcombine.low %v86_v34, %v90_v35  ;;  %v6218_v42 = vld [vmem:[%s9323_s3 + $0x3c0] ss:$16 sps:$4 sm:$0xff]   ;;  %v6281_v34 = vld [vmem:[%s9323_s3 + $0x508] ss:$16 sps:$4 sm:$0xff]   ;;  %v6286_v35 = vld [vmem:[%s9323_s3 + $0x524] ss:$16 sps:$4 sm:$0xff]  }
  0x4d   :  { %1786 = vmatprep.subr.bf16.mxu0 %v6154_v43  ;;  %1950 = vmatprep.subr.bf16.mxu1 %v6157_v44  ;;  %v6221_v43 = vld [vmem:[%s9323_s3 + $0x3c8] ss:$16 sps:$4 sm:$0xff]   ;;  %v6226_v44 = vld [vmem:[%s9323_s3 + $0x3e4] ss:$16 sps:$4 sm:$0xff]  }
  0x50   :  { %1787 = vmatpush1.bf16.msra.mxu0 %v6152_v45  ;;  %1951 = vmatpush1.bf16.msra.mxu1 %v6155_v46  ;;  %v6229_v45 = vld [vmem:[%s9323_s3 + $0x3ec] ss:$16 sps:$4 sm:$0xff]   ;;  %v116_v46 = vrot.slane %v108_v39, %v7294_v56 }
  0x51   :  { %1788 = vmatprep.subr.bf16.mxu0 %v6160_v47  ;;  %1952 = vmatprep.subr.bf16.mxu1 %v6163_v49  ;;  %v123_v47 = vrot.slane %v109_v41, %v7294_v56  ;;  %v6224_v49 = vld [vmem:[%s9323_s3 + $0x3e0] ss:$16 sps:$4 sm:$0xff]   ;;  %v6295_v39 = vld [vmem:[%s9323_s3 + $0x54c] ss:$16 sps:$4 sm:$0xff]  }
  0x52   :  { %v6290_v41 = vld [vmem:[%s9323_s3 + $0x540] ss:$16 sps:$4 sm:$0xff]  }
  0x54   :  { %1789 = vmatpush1.bf16.msra.mxu0 %v6158_v50  ;;  %1953 = vmatpush1.bf16.msra.mxu1 %v6161_v53  ;;  %v6227_v50 = vld [vmem:[%s9323_s3 + $0x3e8] ss:$16 sps:$4 sm:$0xff]   ;;  %v6232_v53 = vld [vmem:[%s9323_s3 + $0x404] ss:$16 sps:$4 sm:$0xff]  }
  0x55   :  { %1790 = vmatprep.subr.bf16.mxu0 %v6166_v57  ;;  %1954 = vmatprep.subr.bf16.mxu1 %v6169_v58  ;;  %v6235_v57 = vld [vmem:[%s9323_s3 + $0x40c] ss:$16 sps:$4 sm:$0xff]   ;;  %v124_v58 = vcombine.low %v116_v46, %v123_v47  ;;  %v6299_v46 = vld [vmem:[%s9323_s3 + $0x568] ss:$16 sps:$4 sm:$0xff]   ;;  %v6304_v47 = vld [vmem:[%s9323_s3 + $0x584] ss:$16 sps:$4 sm:$0xff]  }
  0x58   :  { %1791 = vmatpush1.bf16.msra.mxu0 %v6164_v59  ;;  %1955 = vmatpush1.bf16.msra.mxu1 %v6167_v60  ;;  %v6230_v59 = vld [vmem:[%s9323_s3 + $0x400] ss:$16 sps:$4 sm:$0xff]   ;;  %v175_v60 = vpack.c.bf16 %v7359_v23, %v7359_v23  ;;  %v6241_v23 = vld [vmem:[%s9323_s3 + $0x42c] ss:$16 sps:$4 sm:$0xff]  }
  0x59   :  { %1792 = vmatprep.subr.bf16.mxu0 %v6172_v61  ;;  %1956 = vmatprep.subr.bf16.mxu1 %v6175_v62  ;;  %v6233_v61 = vld [vmem:[%s9323_s3 + $0x408] ss:$16 sps:$4 sm:$0xff]   ;;  %v6238_v62 = vld [vmem:[%s9323_s3 + $0x424] ss:$16 sps:$4 sm:$0xff]  }
  0x5c   :  { %1793 = vmatpush1.bf16.msra.mxu0 %v6170_v63  ;;  %1957 = vmatpush1.bf16.msra.mxu1 %v6173_v0  ;;  %v56_v63 = vld [vmem:[%s9339_s27 + $0x8] sm:$0xff] }
  0x5d   :  { %1794 = vmatprep.subr.bf16.mxu0 %v6178_v1  ;;  %1958 = vmatprep.subr.bf16.mxu1 %v6181_v2  ;;  %v7594_v0 = vadd.f32 %v124_v58, %v56_v63  ;;  %v6236_v1 = vld [vmem:[%s9323_s3 + $0x420] ss:$16 sps:$4 sm:$0xff]   ;;  %v6313_v58 = vld [vmem:[%s9323_s3 + $0x5ac] ss:$16 sps:$4 sm:$0xff]  }
  0x5f   :  { %v7601_v2 = vrot.slane %v7594_v0, %v7294_v56  ;;  %v148_v63 = vcombine.high %v7594_v0, %v7594_v0  ;;  %v6325_v0 = vld [vmem:[%s9323_s3 + $0x5ec] ss:$16 sps:$4 sm:$0xff]  }
  0x60   :  { %1795 = vmatpush1.bf16.msra.mxu0 %v6176_v3  ;;  %1959 = vmatpush1.bf16.msra.mxu1 %v6179_v4  ;;  %v6239_v3 = vld [vmem:[%s9323_s3 + $0x428] ss:$16 sps:$4 sm:$0xff]   ;;  %v6244_v4 = vld [vmem:[%s9323_s3 + $0x444] ss:$16 sps:$4 sm:$0xff]  }
  0x61   :  { %1796 = vmatprep.subr.bf16.mxu0 %v6184_v5  ;;  %1960 = vmatprep.subr.bf16.mxu1 %v6187_v6  ;;  %v6247_v5 = vld [vmem:[%s9323_s3 + $0x44c] ss:$16 sps:$4 sm:$0xff]   ;;  %v163_v6 = vcombine.high %v7601_v2, %v7601_v2 }
  0x64   :  { %1797 = vmatpush1.bf16.msra.mxu0 %v6182_v7  ;;  %1961 = vmatpush1.bf16.msra.mxu1 %v6185_v8  ;;  %v6242_v7 = vld [vmem:[%s9323_s3 + $0x440] ss:$16 sps:$4 sm:$0xff]   ;;  %v178_v8 = vpack.c.bf16 %v163_v6, %v163_v6  ;;  %v6323_v6 = vld [vmem:[%s9323_s3 + $0x5e8] ss:$16 sps:$4 sm:$0xff]  }
  0x65   :  { %1798 = vmatprep.subr.bf16.mxu0 %v6190_v9  ;;  %1962 = vmatprep.subr.bf16.mxu1 %v6193_v10  ;;  %v6245_v9 = vld [vmem:[%s9323_s3 + $0x448] ss:$16 sps:$4 sm:$0xff]   ;;  %v6250_v10 = vld [vmem:[%s9323_s3 + $0x464] ss:$16 sps:$4 sm:$0xff]  }
  0x68   :  { %1799 = vmatpush1.bf16.msra.mxu0 %v6188_v11  ;;  %1963 = vmatpush1.bf16.msra.mxu1 %v6191_v12  ;;  %v6253_v11 = vld [vmem:[%s9323_s3 + $0x46c] ss:$16 sps:$4 sm:$0xff]   ;;  %v6248_v12 = vld [vmem:[%s9323_s3 + $0x460] ss:$16 sps:$4 sm:$0xff]  }
  0x69   :  { %1800 = vmatprep.subr.bf16.mxu0 %v6196_v13  ;;  %1964 = vmatprep.subr.bf16.mxu1 %v6199_v14  ;;  %v6251_v13 = vld [vmem:[%s9323_s3 + $0x468] ss:$16 sps:$4 sm:$0xff]   ;;  %v6256_v14 = vld [vmem:[%s9323_s3 + $0x484] ss:$16 sps:$4 sm:$0xff]  }
  0x6c   :  { %1801 = vmatpush1.bf16.msra.mxu0 %v6194_v15  ;;  %1965 = vmatpush1.bf16.msra.mxu1 %v6197_v16  ;;  %v6259_v15 = vld [vmem:[%s9323_s3 + $0x48c] ss:$16 sps:$4 sm:$0xff]   ;;  %v6254_v16 = vld [vmem:[%s9323_s3 + $0x480] ss:$16 sps:$4 sm:$0xff]  }
  0x6d   :  { %1802 = vmatprep.subr.bf16.mxu0 %v6202_v17  ;;  %1966 = vmatprep.subr.bf16.mxu1 %v6205_v18  ;;  %v6257_v17 = vld [vmem:[%s9323_s3 + $0x488] ss:$16 sps:$4 sm:$0xff]   ;;  %v6262_v18 = vld [vmem:[%s9323_s3 + $0x4a4] ss:$16 sps:$4 sm:$0xff]  }
  0x70   :  { %1803 = vmatpush1.bf16.msra.mxu0 %v6200_v21  ;;  %1967 = vmatpush1.bf16.msra.mxu1 %v6203_v22  ;;  %v6263_v21 = vld [vmem:[%s9323_s3 + $0x4a8] ss:$16 sps:$4 sm:$0xff]   ;;  %v6268_v22 = vld [vmem:[%s9323_s3 + $0x4c4] ss:$16 sps:$4 sm:$0xff]  }
  0x71   :  { %1804 = vmatprep.subr.bf16.mxu0 %v6208_v25  ;;  %1968 = vmatprep.subr.bf16.mxu1 %v6211_v26  ;;  %v6266_v25 = vld [vmem:[%s9323_s3 + $0x4c0] ss:$16 sps:$4 sm:$0xff]   ;;  %v6269_v26 = vld [vmem:[%s9323_s3 + $0x4c8] ss:$16 sps:$4 sm:$0xff]  }
  0x74   :  { %1805 = vmatpush1.bf16.msra.mxu0 %v6206_v28  ;;  %1969 = vmatpush1.bf16.msra.mxu1 %v6209_v29  ;;  %v6277_v28 = vld [vmem:[%s9323_s3 + $0x4ec] ss:$16 sps:$4 sm:$0xff]   ;;  %v6272_v29 = vld [vmem:[%s9323_s3 + $0x4e0] ss:$16 sps:$4 sm:$0xff]  }
  0x75   :  { %1806 = vmatprep.subr.bf16.mxu0 %v6214_v31  ;;  %1970 = vmatprep.subr.bf16.mxu1 %v6217_v32  ;;  %v6280_v31 = vld [vmem:[%s9323_s3 + $0x504] ss:$16 sps:$4 sm:$0xff]   ;;  %v6283_v32 = vld [vmem:[%s9323_s3 + $0x50c] ss:$16 sps:$4 sm:$0xff]  }
  0x78   :  { %1807 = vmatpush1.bf16.msra.mxu0 %v6212_v36  ;;  %1971 = vmatpush1.bf16.msra.mxu1 %v6215_v37  ;;  %v6289_v36 = vld [vmem:[%s9323_s3 + $0x52c] ss:$16 sps:$4 sm:$0xff]   ;;  %v6284_v37 = vld [vmem:[%s9323_s3 + $0x520] ss:$16 sps:$4 sm:$0xff]  }
  0x79   :  { %1808 = vmatprep.subr.bf16.mxu0 %v6220_v38  ;;  %1972 = vmatprep.subr.bf16.mxu1 %v6223_v55  ;;  %v6287_v38 = vld [vmem:[%s9323_s3 + $0x528] ss:$16 sps:$4 sm:$0xff]   ;;  %v6292_v55 = vld [vmem:[%s9323_s3 + $0x544] ss:$16 sps:$4 sm:$0xff]  }
  0x7c   :  { %1809 = vmatpush1.bf16.msra.mxu0 %v6218_v42  ;;  %1973 = vmatpush1.bf16.msra.mxu1 %v6221_v43  ;;  %v6293_v42 = vld [vmem:[%s9323_s3 + $0x548] ss:$16 sps:$4 sm:$0xff]   ;;  %v6298_v43 = vld [vmem:[%s9323_s3 + $0x564] ss:$16 sps:$4 sm:$0xff]  }
  0x7d   :  { %1810 = vmatprep.subr.bf16.mxu0 %v6226_v44  ;;  %1974 = vmatprep.subr.bf16.mxu1 %v6229_v45  ;;  %v6301_v44 = vld [vmem:[%s9323_s3 + $0x56c] ss:$16 sps:$4 sm:$0xff]   ;;  %v6296_v45 = vld [vmem:[%s9323_s3 + $0x560] ss:$16 sps:$4 sm:$0xff]  }
  0x80   :  { %1811 = vmatpush1.bf16.msra.mxu0 %v6224_v49  ;;  %1975 = vmatpush1.bf16.msra.mxu1 %v6227_v50  ;;  %v6307_v49 = vld [vmem:[%s9323_s3 + $0x58c] ss:$16 sps:$4 sm:$0xff]   ;;  %v6302_v50 = vld [vmem:[%s9323_s3 + $0x580] ss:$16 sps:$4 sm:$0xff]  }
  0x81   :  { %1821 = vmatprep.subr.bf16.mxu0 %v6232_v53  ;;  %1985 = vmatprep.subr.bf16.mxu1 %v6235_v57  ;;  %v6305_v53 = vld [vmem:[%s9323_s3 + $0x588] ss:$16 sps:$4 sm:$0xff]   ;;  %v6310_v57 = vld [vmem:[%s9323_s3 + $0x5a4] ss:$16 sps:$4 sm:$0xff]  }
  0x83   :  { %1813 = vmatmul.mubr.bf16.vlgmr.msra.gmra.mrb[0].mxu0 %v175_v60  ;;  %1977 = vmatmul.mubr.bf16.vlgmr.msra.gmra.mrb[0].mxu1 %v175_v60  ;;  %v6311_v60 = vld [vmem:[%s9323_s3 + $0x5a8] ss:$16 sps:$4 sm:$0xff]  }
  0x84   :  { %1822 = vmatpush1.bf16.msra.mxu0 %v6230_v59  ;;  %1986 = vmatpush1.bf16.msra.mxu1 %v6233_v61  ;;  %v6308_v59 = vld [vmem:[%s9323_s3 + $0x5a0] ss:$16 sps:$4 sm:$0xff]   ;;  %v6316_v61 = vld [vmem:[%s9323_s3 + $0x5c4] ss:$16 sps:$4 sm:$0xff]  }
  0x85   :  { %1823 = vmatprep.subr.bf16.mxu0 %v6238_v62  ;;  %1987 = vmatprep.subr.bf16.mxu1 %v6241_v23  ;;  %v6319_v62 = vld [vmem:[%s9323_s3 + $0x5cc] ss:$16 sps:$4 sm:$0xff]   ;;  %v6314_v23 = vld [vmem:[%s9323_s3 + $0x5c0] ss:$16 sps:$4 sm:$0xff]  }
  0x86   :  { %1853 = vmatprep.mubr.bf16.mxu0 %v178_v8  ;;  %2017 = vmatprep.mubr.bf16.mxu1 %v178_v8 }
  0x88   :  { %1824 = vmatpush1.bf16.msra.mxu0 %v6236_v1  ;;  %1988 = vmatpush1.bf16.msra.mxu1 %v6239_v3  ;;  %v6317_v1 = vld [vmem:[%s9323_s3 + $0x5c8] ss:$16 sps:$4 sm:$0xff]   ;;  %v6322_v3 = vld [vmem:[%s9323_s3 + $0x5e4] ss:$16 sps:$4 sm:$0xff]  }
  0x89   :  { %1825 = vmatprep.subr.bf16.mxu0 %v6244_v4  ;;  %1989 = vmatprep.subr.bf16.mxu1 %v6247_v5  ;;  %v7773_v4 = vrot.slane %v148_v63, %v7294_v56  ;;  %v6320_v5 = vld [vmem:[%s9323_s3 + $0x5e0] ss:$16 sps:$4 sm:$0xff]   ;;  %v6331_v56 = vld [vmem:[%s9323_s3 + $0x60c] ss:$16 sps:$4 sm:$0xff]   ;;  %v6400_v63 = vld [vmem:[%s9323_s3 + $0x784] ss:$16 sps:$4 sm:$0xff]  }
  0x8b   :  { %v164_v8 = vcombine.high %v7773_v4, %v7773_v4 }
  0x8c   :  { %1826 = vmatpush1.bf16.msra.mxu0 %v6242_v7  ;;  %1990 = vmatpush1.bf16.msra.mxu1 %v6245_v9  ;;  %v6328_v7 = vld [vmem:[%s9323_s3 + $0x604] ss:$16 sps:$4 sm:$0xff]   ;;  %v6326_v9 = vld [vmem:[%s9323_s3 + $0x600] ss:$16 sps:$4 sm:$0xff]  }
  0x8d   :  { %1827 = vmatprep.subr.bf16.mxu0 %v6250_v10  ;;  %1991 = vmatprep.subr.bf16.mxu1 %v6253_v11  ;;  %v177_v10 = vpack.c.bf16 %v7601_v2, %v7601_v2  ;;  %v6329_v11 = vld [vmem:[%s9323_s3 + $0x608] ss:$16 sps:$4 sm:$0xff]   ;;  %v6332_v2 = vld [vmem:[%s9323_s3 + $0x620] ss:$16 sps:$4 sm:$0xff]  }
  0x90   :  { %1828 = vmatpush1.bf16.msra.mxu0 %v6248_v12  ;;  %1992 = vmatpush1.bf16.msra.mxu1 %v6251_v13  ;;  %v6334_v12 = vld [vmem:[%s9323_s3 + $0x624] ss:$16 sps:$4 sm:$0xff]   ;;  %v6337_v13 = vld [vmem:[%s9323_s3 + $0x62c] ss:$16 sps:$4 sm:$0xff]  }
  0x91   :  { %1829 = vmatprep.subr.bf16.mxu0 %v6256_v14  ;;  %1993 = vmatprep.subr.bf16.mxu1 %v6259_v15  ;;  %v180_v14 = vpack.c.bf16 %v164_v8, %v164_v8  ;;  %v6335_v15 = vld [vmem:[%s9323_s3 + $0x628] ss:$16 sps:$4 sm:$0xff]   ;;  %v6415_v8 = vld [vmem:[%s9323_s3 + $0x7cc] ss:$16 sps:$4 sm:$0xff]  }
  0x94   :  { %1830 = vmatpush1.bf16.msra.mxu0 %v6254_v16  ;;  %1994 = vmatpush1.bf16.msra.mxu1 %v6257_v17  ;;  %v6340_v16 = vld [vmem:[%s9323_s3 + $0x644] ss:$16 sps:$4 sm:$0xff]   ;;  %v6343_v17 = vld [vmem:[%s9323_s3 + $0x64c] ss:$16 sps:$4 sm:$0xff]  }
  0x95   :  { %1831 = vmatprep.subr.bf16.mxu0 %v6262_v18  ;;  %1995 = vmatprep.subr.bf16.mxu1 %v6265_v19  ;;  %v6338_v18 = vld [vmem:[%s9323_s3 + $0x640] ss:$16 sps:$4 sm:$0xff]   ;;  %v6341_v19 = vld [vmem:[%s9323_s3 + $0x648] ss:$16 sps:$4 sm:$0xff]  }
  0x98   :  { %1832 = vmatpush1.bf16.msra.mxu0 %v6260_v20  ;;  %1996 = vmatpush1.bf16.msra.mxu1 %v6263_v21  ;;  %v6346_v20 = vld [vmem:[%s9323_s3 + $0x664] ss:$16 sps:$4 sm:$0xff]   ;;  %v6349_v21 = vld [vmem:[%s9323_s3 + $0x66c] ss:$16 sps:$4 sm:$0xff]  }
  0x99   :  { %1833 = vmatprep.subr.bf16.mxu0 %v6268_v22  ;;  %1997 = vmatprep.subr.bf16.mxu1 %v6271_v24  ;;  %v6344_v22 = vld [vmem:[%s9323_s3 + $0x660] ss:$16 sps:$4 sm:$0xff]   ;;  %v6347_v24 = vld [vmem:[%s9323_s3 + $0x668] ss:$16 sps:$4 sm:$0xff]  }
  0x9c   :  { %1834 = vmatpush1.bf16.msra.mxu0 %v6266_v25  ;;  %1998 = vmatpush1.bf16.msra.mxu1 %v6269_v26  ;;  %v6352_v25 = vld [vmem:[%s9323_s3 + $0x684] ss:$16 sps:$4 sm:$0xff]   ;;  %v6355_v26 = vld [vmem:[%s9323_s3 + $0x68c] ss:$16 sps:$4 sm:$0xff]  }
  0x9d   :  { %1835 = vmatprep.subr.bf16.mxu0 %v6274_v27  ;;  %1999 = vmatprep.subr.bf16.mxu1 %v6277_v28  ;;  %v6350_v27 = vld [vmem:[%s9323_s3 + $0x680] ss:$16 sps:$4 sm:$0xff]   ;;  %v6353_v28 = vld [vmem:[%s9323_s3 + $0x688] ss:$16 sps:$4 sm:$0xff]  }
  0xa0   :  { %1836 = vmatpush1.bf16.msra.mxu0 %v6272_v29  ;;  %2000 = vmatpush1.bf16.msra.mxu1 %v6275_v30  ;;  %v6358_v29 = vld [vmem:[%s9323_s3 + $0x6a4] ss:$16 sps:$4 sm:$0xff]   ;;  %v6361_v30 = vld [vmem:[%s9323_s3 + $0x6ac] ss:$16 sps:$4 sm:$0xff]  }
  0xa1   :  { %1837 = vmatprep.subr.bf16.mxu0 %v6280_v31  ;;  %2001 = vmatprep.subr.bf16.mxu1 %v6283_v32  ;;  %v6356_v31 = vld [vmem:[%s9323_s3 + $0x6a0] ss:$16 sps:$4 sm:$0xff]   ;;  %v6359_v32 = vld [vmem:[%s9323_s3 + $0x6a8] ss:$16 sps:$4 sm:$0xff]  }
  0xa4   :  { %1838 = vmatpush1.bf16.msra.mxu0 %v6278_v33  ;;  %2002 = vmatpush1.bf16.msra.mxu1 %v6281_v34  ;;  %v6364_v33 = vld [vmem:[%s9323_s3 + $0x6c4] ss:$16 sps:$4 sm:$0xff]   ;;  %v6367_v34 = vld [vmem:[%s9323_s3 + $0x6cc] ss:$16 sps:$4 sm:$0xff]  }
  0xa5   :  { %1839 = vmatprep.subr.bf16.mxu0 %v6286_v35  ;;  %2003 = vmatprep.subr.bf16.mxu1 %v6289_v36  ;;  %v6362_v35 = vld [vmem:[%s9323_s3 + $0x6c0] ss:$16 sps:$4 sm:$0xff]   ;;  %v6365_v36 = vld [vmem:[%s9323_s3 + $0x6c8] ss:$16 sps:$4 sm:$0xff]  }
  0xa8   :  { %1840 = vmatpush1.bf16.msra.mxu0 %v6284_v37  ;;  %2004 = vmatpush1.bf16.msra.mxu1 %v6287_v38  ;;  %v6370_v37 = vld [vmem:[%s9323_s3 + $0x6e4] ss:$16 sps:$4 sm:$0xff]   ;;  %v6373_v38 = vld [vmem:[%s9323_s3 + $0x6ec] ss:$16 sps:$4 sm:$0xff]  }
  0xa9   :  { %1841 = vmatprep.subr.bf16.mxu0 %v6292_v55  ;;  %2005 = vmatprep.subr.bf16.mxu1 %v6295_v39  ;;  %v6368_v55 = vld [vmem:[%s9323_s3 + $0x6e0] ss:$16 sps:$4 sm:$0xff]   ;;  %v6371_v39 = vld [vmem:[%s9323_s3 + $0x6e8] ss:$16 sps:$4 sm:$0xff]  }
  0xac   :  { %1842 = vmatpush1.bf16.msra.mxu0 %v6290_v41  ;;  %2006 = vmatpush1.bf16.msra.mxu1 %v6293_v42  ;;  %v6376_v41 = vld [vmem:[%s9323_s3 + $0x704] ss:$16 sps:$4 sm:$0xff]   ;;  %v6379_v42 = vld [vmem:[%s9323_s3 + $0x70c] ss:$16 sps:$4 sm:$0xff]  }
  0xad   :  { %1843 = vmatprep.subr.bf16.mxu0 %v6298_v43  ;;  %2007 = vmatprep.subr.bf16.mxu1 %v6301_v44  ;;  %v6374_v43 = vld [vmem:[%s9323_s3 + $0x700] ss:$16 sps:$4 sm:$0xff]   ;;  %v6377_v44 = vld [vmem:[%s9323_s3 + $0x708] ss:$16 sps:$4 sm:$0xff]  }
  0xb0   :  { %1844 = vmatpush1.bf16.msra.mxu0 %v6296_v45  ;;  %2008 = vmatpush1.bf16.msra.mxu1 %v6299_v46  ;;  %v6382_v45 = vld [vmem:[%s9323_s3 + $0x724] ss:$16 sps:$4 sm:$0xff]   ;;  %v6385_v46 = vld [vmem:[%s9323_s3 + $0x72c] ss:$16 sps:$4 sm:$0xff]  }
  0xb1   :  { %1845 = vmatprep.subr.bf16.mxu0 %v6304_v47  ;;  %2009 = vmatprep.subr.bf16.mxu1 %v6307_v49  ;;  %v6380_v47 = vld [vmem:[%s9323_s3 + $0x720] ss:$16 sps:$4 sm:$0xff]   ;;  %v6383_v49 = vld [vmem:[%s9323_s3 + $0x728] ss:$16 sps:$4 sm:$0xff]  }
  0xb4   :  { %1846 = vmatpush1.bf16.msra.mxu0 %v6302_v50  ;;  %2010 = vmatpush1.bf16.msra.mxu1 %v6305_v53  ;;  %v6388_v50 = vld [vmem:[%s9323_s3 + $0x744] ss:$16 sps:$4 sm:$0xff]   ;;  %v6391_v53 = vld [vmem:[%s9323_s3 + $0x74c] ss:$16 sps:$4 sm:$0xff]  }
  0xb5   :  { %1847 = vmatprep.subr.bf16.mxu0 %v6310_v57  ;;  %2011 = vmatprep.subr.bf16.mxu1 %v6313_v58  ;;  %v6386_v57 = vld [vmem:[%s9323_s3 + $0x740] ss:$16 sps:$4 sm:$0xff]   ;;  %v6389_v58 = vld [vmem:[%s9323_s3 + $0x748] ss:$16 sps:$4 sm:$0xff]  }
  0xb8   :  { %1848 = vmatpush1.bf16.msra.mxu0 %v6308_v59  ;;  %2012 = vmatpush1.bf16.msra.mxu1 %v6311_v60  ;;  %v6394_v59 = vld [vmem:[%s9323_s3 + $0x764] ss:$16 sps:$4 sm:$0xff]   ;;  %v6397_v60 = vld [vmem:[%s9323_s3 + $0x76c] ss:$16 sps:$4 sm:$0xff]  }
  0xb9   :  { %1849 = vmatprep.subr.bf16.mxu0 %v6316_v61  ;;  %2013 = vmatprep.subr.bf16.mxu1 %v6319_v62  ;;  %v6392_v61 = vld [vmem:[%s9323_s3 + $0x760] ss:$16 sps:$4 sm:$0xff]   ;;  %v6395_v62 = vld [vmem:[%s9323_s3 + $0x768] ss:$16 sps:$4 sm:$0xff]  }
  0xbc   :  { %1850 = vmatpush1.bf16.msra.mxu0 %v6314_v23  ;;  %2014 = vmatpush1.bf16.msra.mxu1 %v6317_v1  ;;  %v6403_v23 = vld [vmem:[%s9323_s3 + $0x78c] ss:$16 sps:$4 sm:$0xff]   ;;  %v6398_v1 = vld [vmem:[%s9323_s3 + $0x780] ss:$16 sps:$4 sm:$0xff]  }
  0xbd   :  { %1851 = vmatprep.subr.bf16.mxu0 %v6322_v3  ;;  %2015 = vmatprep.subr.bf16.mxu1 %v6325_v0  ;;  %v6401_v3 = vld [vmem:[%s9323_s3 + $0x788] ss:$16 sps:$4 sm:$0xff]   ;;  %v6406_v0 = vld [vmem:[%s9323_s3 + $0x7a4] ss:$16 sps:$4 sm:$0xff]  }
  0xc0   :  { %1852 = vmatpush1.bf16.msra.mxu0 %v6320_v5  ;;  %2016 = vmatpush1.bf16.msra.mxu1 %v6323_v6  ;;  %v6409_v5 = vld [vmem:[%s9323_s3 + $0x7ac] ss:$16 sps:$4 sm:$0xff]   ;;  %v6404_v6 = vld [vmem:[%s9323_s3 + $0x7a0] ss:$16 sps:$4 sm:$0xff]  }
  0xc1   :  { %1862 = vmatprep.subr.bf16.mxu0 %v6328_v7  ;;  %2026 = vmatprep.subr.bf16.mxu1 %v6331_v56  ;;  %v6407_v7 = vld [vmem:[%s9323_s3 + $0x7a8] ss:$16 sps:$4 sm:$0xff]   ;;  %v6412_v56 = vld [vmem:[%s9323_s3 + $0x7c4] ss:$16 sps:$4 sm:$0xff]  }
  0xc3   :  { %1854 = vmatmul.mubr.bf16.vlgmr.msra.gmra.mrb[0].mxu0 %v177_v10  ;;  %2018 = vmatmul.mubr.bf16.vlgmr.msra.gmra.mrb[0].mxu1 %v177_v10  ;;  %v6413_v10 = vld [vmem:[%s9323_s3 + $0x7c8] ss:$16 sps:$4 sm:$0xff]  }
  0xc4   :  { %1863 = vmatpush1.bf16.msra.mxu0 %v6326_v9  ;;  %2027 = vmatpush1.bf16.msra.mxu1 %v6329_v11  ;;  %v6410_v9 = vld [vmem:[%s9323_s3 + $0x7c0] ss:$16 sps:$4 sm:$0xff]   ;;  %v7047_v11 = vmov 1966171168  }
  0xc5   :  { %1864 = vmatprep.subr.bf16.mxu0 %v6334_v12  ;;  %2028 = vmatprep.subr.bf16.mxu1 %v6337_v13  ;;  %v2168_v12 = vunpack.c.l.s4 %v7047_v11  ;;  %v6418_v13 = vld [vmem:[%s9323_s3 + $0x7e4] ss:$16 sps:$4 sm:$0xff]  }
  0xc6   :  { %1894 = vmatprep.mubr.bf16.mxu0 %v180_v14  ;;  %2058 = vmatprep.mubr.bf16.mxu1 %v180_v14  ;;  %v6421_v14 = vld [vmem:[%s9323_s3 + $0x7ec] ss:$16 sps:$4 sm:$0xff]   ;;  %v6496_v11 = vld [vmem:[%s9325_s5 + $0x184] ss:$16 sps:$4 sm:$0xff]  }
  0xc8   :  { %1865 = vmatpush1.bf16.msra.mxu0 %v6332_v2  ;;  %2029 = vmatpush1.bf16.msra.mxu1 %v6335_v15  ;;  %v7974_v2 = vld.sshfl [vmem:[%s9321_s1] sm:$0x11 pattern:$0x75316420] }
  0xc9   :  { %1866 = vmatprep.subr.bf16.mxu0 %v6340_v16  ;;  %2030 = vmatprep.subr.bf16.mxu1 %v6343_v17  ;;  %v6416_v15 = vld [vmem:[%s9323_s3 + $0x7e0] ss:$16 sps:$4 sm:$0xff]   ;;  %v6419_v16 = vld [vmem:[%s9323_s3 + $0x7e8] ss:$16 sps:$4 sm:$0xff]   ;;  %v2169_v17 = vunpack.c.0.s8 %v2168_v12  ;;  %v6499_v12 = vld [vmem:[%s9325_s5 + $0x18c] ss:$16 sps:$4 sm:$0xff]  }
  0xcc   :  { %1867 = vmatpush1.bf16.msra.mxu0 %v6338_v18  ;;  %2031 = vmatpush1.bf16.msra.mxu1 %v6341_v19  ;;  %v6424_v18 = vld [vmem:[%s9325_s5 + $0x4] ss:$16 sps:$4 sm:$0xff]   ;;  %v6427_v19 = vld [vmem:[%s9325_s5 + $0xc] ss:$16 sps:$4 sm:$0xff]  }
  0xcd   :  { %1868 = vmatprep.subr.bf16.mxu0 %v6346_v20  ;;  %2032 = vmatprep.subr.bf16.mxu1 %v6349_v21  ;;  %v6422_v20 = vld [vmem:[%s9325_s5] ss:$16 sps:$4 sm:$0xff]   ;;  %v6425_v21 = vld [vmem:[%s9325_s5 + $0x8] ss:$16 sps:$4 sm:$0xff]  }
  0xd0   :  { %1869 = vmatpush1.bf16.msra.mxu0 %v6344_v22  ;;  %2033 = vmatpush1.bf16.msra.mxu1 %v6347_v24  ;;  %v2166_v22 = vcombine.high %v7974_v2, %v7974_v2  ;;  %v7997_v24 = vsub.s32 %v2169_v17, %v7253_v40  ;;  %v6428_v40 = vld [vmem:[%s9325_s5 + $0x20] ss:$16 sps:$4 sm:$0xff]  }
  0xd1   :  { %1870 = vmatprep.subr.bf16.mxu0 %v6352_v25  ;;  %2034 = vmatprep.subr.bf16.mxu1 %v6355_v26  ;;  %v179_v25 = vpack.c.bf16 %v7773_v4, %v7773_v4  ;;  %v6430_v26 = vld [vmem:[%s9325_s5 + $0x24] ss:$16 sps:$4 sm:$0xff]   ;;  %v6431_v4 = vld [vmem:[%s9325_s5 + $0x28] ss:$16 sps:$4 sm:$0xff]   ;;  %v6500_v17 = vld [vmem:[%s9325_s5 + $0x1a0] ss:$16 sps:$4 sm:$0xff]  }
  0xd4   :  { %1871 = vmatpush1.bf16.msra.mxu0 %v6350_v27  ;;  %2035 = vmatpush1.bf16.msra.mxu1 %v6353_v28  ;;  %v6433_v27 = vld [vmem:[%s9325_s5 + $0x2c] ss:$16 sps:$4 sm:$0xff]   ;;  %v2180_v28 = vrot.slane %v2166_v22, %v7997_v24  ;;  %v6509_v22 = vld [vmem:[%s9325_s5 + $0x1c8] ss:$16 sps:$4 sm:$0xff]  }
  0xd5   :  { %1872 = vmatprep.subr.bf16.mxu0 %v6358_v29  ;;  %2036 = vmatprep.subr.bf16.mxu1 %v6361_v30  ;;  %v6436_v29 = vld [vmem:[%s9325_s5 + $0x44] ss:$16 sps:$4 sm:$0xff]   ;;  %v6439_v30 = vld [vmem:[%s9325_s5 + $0x4c] ss:$16 sps:$4 sm:$0xff]  }
  0xd8   :  { %1873 = vmatpush1.bf16.msra.mxu0 %v6356_v31  ;;  %2037 = vmatpush1.bf16.msra.mxu1 %v6359_v32  ;;  %v6434_v31 = vld [vmem:[%s9325_s5 + $0x40] ss:$16 sps:$4 sm:$0xff]   ;;  %v6437_v32 = vld [vmem:[%s9325_s5 + $0x48] ss:$16 sps:$4 sm:$0xff]  }
  0xd9   :  { %1874 = vmatprep.subr.bf16.mxu0 %v6364_v33  ;;  %2038 = vmatprep.subr.bf16.mxu1 %v6367_v34  ;;  %v6442_v33 = vld [vmem:[%s9325_s5 + $0x64] ss:$16 sps:$4 sm:$0xff]   ;;  %v6445_v34 = vld [vmem:[%s9325_s5 + $0x6c] ss:$16 sps:$4 sm:$0xff]  }
  0xdc   :  { %1875 = vmatpush1.bf16.msra.mxu0 %v6362_v35  ;;  %2039 = vmatpush1.bf16.msra.mxu1 %v6365_v36  ;;  %v6440_v35 = vld [vmem:[%s9325_s5 + $0x60] ss:$16 sps:$4 sm:$0xff]   ;;  %v6443_v36 = vld [vmem:[%s9325_s5 + $0x68] ss:$16 sps:$4 sm:$0xff]  }
  0xdd   :  { %1876 = vmatprep.subr.bf16.mxu0 %v6370_v37  ;;  %2040 = vmatprep.subr.bf16.mxu1 %v6373_v38  ;;  %v6448_v37 = vld [vmem:[%s9325_s5 + $0x84] ss:$16 sps:$4 sm:$0xff]   ;;  %v6451_v38 = vld [vmem:[%s9325_s5 + $0x8c] ss:$16 sps:$4 sm:$0xff]  }
  0xe0   :  { %1877 = vmatpush1.bf16.msra.mxu0 %v6368_v55  ;;  %2041 = vmatpush1.bf16.msra.mxu1 %v6371_v39  ;;  %v6446_v55 = vld [vmem:[%s9325_s5 + $0x80] ss:$16 sps:$4 sm:$0xff]   ;;  %v6449_v39 = vld [vmem:[%s9325_s5 + $0x88] ss:$16 sps:$4 sm:$0xff]  }
  0xe1   :  { %1878 = vmatprep.subr.bf16.mxu0 %v6376_v41  ;;  %2042 = vmatprep.subr.bf16.mxu1 %v6379_v42  ;;  %v6454_v41 = vld [vmem:[%s9325_s5 + $0xa4] ss:$16 sps:$4 sm:$0xff]   ;;  %v6457_v42 = vld [vmem:[%s9325_s5 + $0xac] ss:$16 sps:$4 sm:$0xff]  }
  0xe4   :  { %1879 = vmatpush1.bf16.msra.mxu0 %v6374_v43  ;;  %2043 = vmatpush1.bf16.msra.mxu1 %v6377_v44  ;;  %v6452_v43 = vld [vmem:[%s9325_s5 + $0xa0] ss:$16 sps:$4 sm:$0xff]   ;;  %v6455_v44 = vld [vmem:[%s9325_s5 + $0xa8] ss:$16 sps:$4 sm:$0xff]  }
  0xe5   :  { %1880 = vmatprep.subr.bf16.mxu0 %v6382_v45  ;;  %2044 = vmatprep.subr.bf16.mxu1 %v6385_v46  ;;  %v6460_v45 = vld [vmem:[%s9325_s5 + $0xc4] ss:$16 sps:$4 sm:$0xff]   ;;  %v6463_v46 = vld [vmem:[%s9325_s5 + $0xcc] ss:$16 sps:$4 sm:$0xff]  }
  0xe8   :  { %1881 = vmatpush1.bf16.msra.mxu0 %v6380_v47  ;;  %2045 = vmatpush1.bf16.msra.mxu1 %v6383_v49  ;;  %v6458_v47 = vld [vmem:[%s9325_s5 + $0xc0] ss:$16 sps:$4 sm:$0xff]   ;;  %v6461_v49 = vld [vmem:[%s9325_s5 + $0xc8] ss:$16 sps:$4 sm:$0xff]  }
  0xe9   :  { %1882 = vmatprep.subr.bf16.mxu0 %v6388_v50  ;;  %2046 = vmatprep.subr.bf16.mxu1 %v6391_v53  ;;  %v6466_v50 = vld [vmem:[%s9325_s5 + $0xe4] ss:$16 sps:$4 sm:$0xff]   ;;  %v6469_v53 = vld [vmem:[%s9325_s5 + $0xec] ss:$16 sps:$4 sm:$0xff]  }
  0xec   :  { %1883 = vmatpush1.bf16.msra.mxu0 %v6386_v57  ;;  %2047 = vmatpush1.bf16.msra.mxu1 %v6389_v58  ;;  %v6464_v57 = vld [vmem:[%s9325_s5 + $0xe0] ss:$16 sps:$4 sm:$0xff]   ;;  %v6467_v58 = vld [vmem:[%s9325_s5 + $0xe8] ss:$16 sps:$4 sm:$0xff]  }
  0xed   :  { %1884 = vmatprep.subr.bf16.mxu0 %v6394_v59  ;;  %2048 = vmatprep.subr.bf16.mxu1 %v6397_v60  ;;  %v6472_v59 = vld [vmem:[%s9325_s5 + $0x104] ss:$16 sps:$4 sm:$0xff]   ;;  %v6475_v60 = vld [vmem:[%s9325_s5 + $0x10c] ss:$16 sps:$4 sm:$0xff]  }
  0xf0   :  { %1885 = vmatpush1.bf16.msra.mxu0 %v6392_v61  ;;  %2049 = vmatpush1.bf16.msra.mxu1 %v6395_v62  ;;  %v6470_v61 = vld [vmem:[%s9325_s5 + $0x100] ss:$16 sps:$4 sm:$0xff]   ;;  %v6473_v62 = vld [vmem:[%s9325_s5 + $0x108] ss:$16 sps:$4 sm:$0xff]  }
  0xf1   :  { %1886 = vmatprep.subr.bf16.mxu0 %v6400_v63  ;;  %2050 = vmatprep.subr.bf16.mxu1 %v6403_v23  ;;  %v6478_v63 = vld [vmem:[%s9325_s5 + $0x124] ss:$16 sps:$4 sm:$0xff]   ;;  %v6481_v23 = vld [vmem:[%s9325_s5 + $0x12c] ss:$16 sps:$4 sm:$0xff]  }
  0xf4   :  { %1887 = vmatpush1.bf16.msra.mxu0 %v6398_v1  ;;  %2051 = vmatpush1.bf16.msra.mxu1 %v6401_v3  ;;  %v6476_v1 = vld [vmem:[%s9325_s5 + $0x120] ss:$16 sps:$4 sm:$0xff]   ;;  %v6479_v3 = vld [vmem:[%s9325_s5 + $0x128] ss:$16 sps:$4 sm:$0xff]  }
  0xf5   :  { %1888 = vmatprep.subr.bf16.mxu0 %v6406_v0  ;;  %2052 = vmatprep.subr.bf16.mxu1 %v6409_v5  ;;  %v6484_v0 = vld [vmem:[%s9325_s5 + $0x144] ss:$16 sps:$4 sm:$0xff]   ;;  %v6487_v5 = vld [vmem:[%s9325_s5 + $0x14c] ss:$16 sps:$4 sm:$0xff]  }
  0xf8   :  { %1889 = vmatpush1.bf16.msra.mxu0 %v6404_v6  ;;  %2053 = vmatpush1.bf16.msra.mxu1 %v6407_v7  ;;  %v6482_v6 = vld [vmem:[%s9325_s5 + $0x140] ss:$16 sps:$4 sm:$0xff]   ;;  %v6485_v7 = vld [vmem:[%s9325_s5 + $0x148] ss:$16 sps:$4 sm:$0xff]  }
  0xf9   :  { %1890 = vmatprep.subr.bf16.mxu0 %v6412_v56  ;;  %2054 = vmatprep.subr.bf16.mxu1 %v6415_v8  ;;  %v6490_v56 = vld [vmem:[%s9325_s5 + $0x164] ss:$16 sps:$4 sm:$0xff]   ;;  %v6493_v8 = vld [vmem:[%s9325_s5 + $0x16c] ss:$16 sps:$4 sm:$0xff]  }
  0xfc   :  { %1891 = vmatpush1.bf16.msra.mxu0 %v6410_v9  ;;  %2055 = vmatpush1.bf16.msra.mxu1 %v6413_v10  ;;  %v6488_v9 = vld [vmem:[%s9325_s5 + $0x160] ss:$16 sps:$4 sm:$0xff]   ;;  %v6491_v10 = vld [vmem:[%s9325_s5 + $0x168] ss:$16 sps:$4 sm:$0xff]  }
  0xfd   :  { %1892 = vmatprep.subr.bf16.mxu0 %v6418_v13  ;;  %2056 = vmatprep.subr.bf16.mxu1 %v6421_v14  ;;  %v6494_v13 = vld [vmem:[%s9325_s5 + $0x180] ss:$16 sps:$4 sm:$0xff]   ;;  %v6497_v14 = vld [vmem:[%s9325_s5 + $0x188] ss:$16 sps:$4 sm:$0xff]  }
 0x100   :  { %1893 = vmatpush1.bf16.msra.mxu0 %v6416_v15  ;;  %2057 = vmatpush1.bf16.msra.mxu1 %v6419_v16  ;;  %v6502_v15 = vld [vmem:[%s9325_s5 + $0x1a4] ss:$16 sps:$4 sm:$0xff]   ;;  %v6505_v16 = vld [vmem:[%s9325_s5 + $0x1ac] ss:$16 sps:$4 sm:$0xff]  }
 0x101   :  { %2503 = vmatprep.subr.bf16.mxu0 %v6424_v18  ;;  %2544 = vmatprep.subr.bf16.mxu1 %v6427_v19  ;;  %v6503_v18 = vld [vmem:[%s9325_s5 + $0x1a8] ss:$16 sps:$4 sm:$0xff]   ;;  %v6508_v19 = vld [vmem:[%s9325_s5 + $0x1c4] ss:$16 sps:$4 sm:$0xff]  }
 0x103   :  { %1895 = vmatmul.mubr.bf16.vlgmr.msra.gmra.mrb[0].mxu0 %v179_v25  ;;  %2059 = vmatmul.mubr.bf16.vlgmr.msra.gmra.mrb[0].mxu1 %v179_v25  ;;  %v6514_v25 = vld [vmem:[%s9325_s5 + $0x1e4] ss:$16 sps:$4 sm:$0xff]  }
 0x104   :  { %2504 = vmatpush1.bf16.msra.mxu0 %v6422_v20  ;;  %2545 = vmatpush1.bf16.msra.mxu1 %v6425_v21  ;;  %v6511_v20 = vld [vmem:[%s9325_s5 + $0x1cc] ss:$16 sps:$4 sm:$0xff]   ;;  %v6506_v21 = vld [vmem:[%s9325_s5 + $0x1c0] ss:$16 sps:$4 sm:$0xff]  }
 0x105   :  { %2505 = vmatprep.subr.bf16.mxu0 %v6430_v26  ;;  %2546 = vmatprep.subr.bf16.mxu1 %v6433_v27  ;;  %v6517_v26 = vld [vmem:[%s9325_s5 + $0x1ec] ss:$16 sps:$4 sm:$0xff]   ;;  %v6512_v27 = vld [vmem:[%s9325_s5 + $0x1e0] ss:$16 sps:$4 sm:$0xff]  }
 0x106   :  { %2535 = vmatprep.mubr.bf16.mxu0 %v2180_v28  ;;  %2576 = vmatprep.mubr.bf16.mxu1 %v2180_v28 }
 0x108   :  { %2506 = vmatpush1.bf16.msra.mxu0 %v6428_v40  ;;  %2547 = vmatpush1.bf16.msra.mxu1 %v6431_v4  ;;  %v6515_v40 = vld [vmem:[%s9325_s5 + $0x1e8] ss:$16 sps:$4 sm:$0xff]   ;;  %v2173_v4 = vrot.slane %v7974_v2, %v7997_v24 }
 0x109   :  { %2507 = vmatprep.subr.bf16.mxu0 %v6436_v29  ;;  %2548 = vmatprep.subr.bf16.mxu1 %v6439_v30 }
 0x10c   :  { %2508 = vmatpush1.bf16.msra.mxu0 %v6434_v31  ;;  %2549 = vmatpush1.bf16.msra.mxu1 %v6437_v32 }
 0x10d   :  { %2509 = vmatprep.subr.bf16.mxu0 %v6442_v33  ;;  %2550 = vmatprep.subr.bf16.mxu1 %v6445_v34 }
 0x110   :  { %2510 = vmatpush1.bf16.msra.mxu0 %v6440_v35  ;;  %2551 = vmatpush1.bf16.msra.mxu1 %v6443_v36 }
 0x111   :  { %2511 = vmatprep.subr.bf16.mxu0 %v6448_v37  ;;  %2552 = vmatprep.subr.bf16.mxu1 %v6451_v38 }
 0x114   :  { %2512 = vmatpush1.bf16.msra.mxu0 %v6446_v55  ;;  %2553 = vmatpush1.bf16.msra.mxu1 %v6449_v39 }
 0x115   :  { %2513 = vmatprep.subr.bf16.mxu0 %v6454_v41  ;;  %2554 = vmatprep.subr.bf16.mxu1 %v6457_v42 }
 0x118   :  { %2514 = vmatpush1.bf16.msra.mxu0 %v6452_v43  ;;  %2555 = vmatpush1.bf16.msra.mxu1 %v6455_v44 }
 0x119   :  { %2515 = vmatprep.subr.bf16.mxu0 %v6460_v45  ;;  %2556 = vmatprep.subr.bf16.mxu1 %v6463_v46 }
 0x11c   :  { %2516 = vmatpush1.bf16.msra.mxu0 %v6458_v47  ;;  %2557 = vmatpush1.bf16.msra.mxu1 %v6461_v49 }
 0x11d   :  { %2517 = vmatprep.subr.bf16.mxu0 %v6466_v50  ;;  %2558 = vmatprep.subr.bf16.mxu1 %v6469_v53 }
 0x120   :  { %2518 = vmatpush1.bf16.msra.mxu0 %v6464_v57  ;;  %2559 = vmatpush1.bf16.msra.mxu1 %v6467_v58 }
 0x121   :  { %2519 = vmatprep.subr.bf16.mxu0 %v6472_v59  ;;  %2560 = vmatprep.subr.bf16.mxu1 %v6475_v60 }
 0x124   :  { %2520 = vmatpush1.bf16.msra.mxu0 %v6470_v61  ;;  %2561 = vmatpush1.bf16.msra.mxu1 %v6473_v62 }
 0x125   :  { %2521 = vmatprep.subr.bf16.mxu0 %v6478_v63  ;;  %2562 = vmatprep.subr.bf16.mxu1 %v6481_v23 }
 0x128   :  { %2522 = vmatpush1.bf16.msra.mxu0 %v6476_v1  ;;  %2563 = vmatpush1.bf16.msra.mxu1 %v6479_v3 }
 0x129   :  { %2523 = vmatprep.subr.bf16.mxu0 %v6484_v0  ;;  %2564 = vmatprep.subr.bf16.mxu1 %v6487_v5 }
 0x12c   :  { %2524 = vmatpush1.bf16.msra.mxu0 %v6482_v6  ;;  %2565 = vmatpush1.bf16.msra.mxu1 %v6485_v7 }
 0x12d   :  { %2525 = vmatprep.subr.bf16.mxu0 %v6490_v56  ;;  %2566 = vmatprep.subr.bf16.mxu1 %v6493_v8 }
 0x130   :  { %2526 = vmatpush1.bf16.msra.mxu0 %v6488_v9  ;;  %2567 = vmatpush1.bf16.msra.mxu1 %v6491_v10 }
 0x131   :  { %2527 = vmatprep.subr.bf16.mxu0 %v6496_v11  ;;  %2568 = vmatprep.subr.bf16.mxu1 %v6499_v12 }
 0x134   :  { %2528 = vmatpush1.bf16.msra.mxu0 %v6494_v13  ;;  %2569 = vmatpush1.bf16.msra.mxu1 %v6497_v14 }
 0x135   :  { %2529 = vmatprep.subr.bf16.mxu0 %v6502_v15  ;;  %2570 = vmatprep.subr.bf16.mxu1 %v6505_v16 }
 0x138   :  { %2530 = vmatpush1.bf16.msra.mxu0 %v6500_v17  ;;  %2571 = vmatpush1.bf16.msra.mxu1 %v6503_v18 }
 0x139   :  { %2531 = vmatprep.subr.bf16.mxu0 %v6508_v19  ;;  %2572 = vmatprep.subr.bf16.mxu1 %v6511_v20 }
 0x13c   :  { %2532 = vmatpush1.bf16.msra.mxu0 %v6506_v21  ;;  %2573 = vmatpush1.bf16.msra.mxu1 %v6509_v22 }
 0x13d   :  { %2533 = vmatprep.subr.bf16.mxu0 %v6514_v25  ;;  %2574 = vmatprep.subr.bf16.mxu1 %v6517_v26 }
 0x140   :  { %2534 = vmatpush1.bf16.msra.mxu0 %v6512_v27  ;;  %2575 = vmatpush1.bf16.msra.mxu1 %v6515_v40 }
 0x143   :  { %2536 = vmatmul.mubr.bf16.vlgmr.msra.gmra.mrb[4].mxu0 %v2173_v4  ;;  %2577 = vmatmul.mubr.bf16.vlgmr.msra.gmra.mrb[4].mxu1 %v2173_v4 }
 0x144   :  { %21 = vsyncpa [#allocation3], 0  ;;  %v6518_v28 = vld [vmem:[%s9328_s8] ss:$16 sps:$4 sm:$0xff]   ;;  %v6520_v29 = vld [vmem:[%s9328_s8 + $0x4] ss:$16 sps:$4 sm:$0xff]  }
 0x145   :  { %v6521_v30 = vld [vmem:[%s9328_s8 + $0x200] ss:$16 sps:$4 sm:$0xff]   ;;  %v6523_v2 = vld [vmem:[%s9328_s8 + $0x204] ss:$16 sps:$4 sm:$0xff]   ;;  %3493 = vmatprep.subr.bf16.mxu0 %v6520_v29  ;;  %vm7049_vm0 = vmmov 0  }
 0x146   :  { %v6526_v24 = vld [vmem:[%s9328_s8 + $0x24] ss:$16 sps:$4 sm:$0xff]   ;;  %3534 = vmatprep.subr.bf16.mxu1 %v6523_v2  ;;  %3494 = vmatpush1.bf16.msra.mxu0 %v6518_v28  ;;  %v6524_v32 = vld [vmem:[%s9328_s8 + $0x20] ss:$16 sps:$4 sm:$0xff]  }
 0x147   :  { %v6529_v31 = vld [vmem:[%s9328_s8 + $0x224] ss:$16 sps:$4 sm:$0xff]   ;;  %3535 = vmatpush1.bf16.msra.mxu1 %v6521_v30  ;;  %3495 = vmatprep.subr.bf16.mxu0 %v6526_v24  ;;  %v6527_v33 = vld [vmem:[%s9328_s8 + $0x220] ss:$16 sps:$4 sm:$0xff]   ;;  %v6616_v24 = vld [vmem:[%s9328_s8 + $0xc] ss:$16 sps:$4 sm:$0xff]  }
 0x148   :  { %v6532_v34 = vld [vmem:[%s9328_s8 + $0x44] ss:$16 sps:$4 sm:$0xff]   ;;  %3536 = vmatprep.subr.bf16.mxu1 %v6529_v31  ;;  %v6530_v36 = vld [vmem:[%s9328_s8 + $0x40] ss:$16 sps:$4 sm:$0xff]   ;;  %v6619_v31 = vld [vmem:[%s9328_s8 + $0x20c] ss:$16 sps:$4 sm:$0xff]  }
 0x149   :  { %v6535_v35 = vld [vmem:[%s9328_s8 + $0x244] ss:$16 sps:$4 sm:$0xff]   ;;  %v6533_v37 = vld [vmem:[%s9328_s8 + $0x240] ss:$16 sps:$4 sm:$0xff]  }
 0x14a   :  { %3496 = vmatpush1.bf16.msra.mxu0 %v6524_v32  ;;  %v6538_v38 = vld [vmem:[%s9328_s8 + $0x64] ss:$16 sps:$4 sm:$0xff]   ;;  %v6536_v39 = vld [vmem:[%s9328_s8 + $0x60] ss:$16 sps:$4 sm:$0xff]  }
 0x14b   :  { %3537 = vmatpush1.bf16.msra.mxu1 %v6527_v33  ;;  %3497 = vmatprep.subr.bf16.mxu0 %v6532_v34  ;;  %v6541_v55 = vld [vmem:[%s9328_s8 + $0x264] ss:$16 sps:$4 sm:$0xff]   ;;  %v6539_v41 = vld [vmem:[%s9328_s8 + $0x260] ss:$16 sps:$4 sm:$0xff]  }
 0x14c   :  { %3538 = vmatprep.subr.bf16.mxu1 %v6535_v35  ;;  %v6544_v42 = vld [vmem:[%s9328_s8 + $0x84] ss:$16 sps:$4 sm:$0xff]   ;;  %v6542_v44 = vld [vmem:[%s9328_s8 + $0x80] ss:$16 sps:$4 sm:$0xff]  }
 0x14d   :  { %v6547_v43 = vld [vmem:[%s9328_s8 + $0x284] ss:$16 sps:$4 sm:$0xff]   ;;  %v6545_v45 = vld [vmem:[%s9328_s8 + $0x280] ss:$16 sps:$4 sm:$0xff]  }
 0x14e   :  { %3498 = vmatpush1.bf16.msra.mxu0 %v6530_v36  ;;  %v6550_v46 = vld [vmem:[%s9328_s8 + $0xa4] ss:$16 sps:$4 sm:$0xff]   ;;  %v6548_v49 = vld [vmem:[%s9328_s8 + $0xa0] ss:$16 sps:$4 sm:$0xff]  }
 0x14f   :  { %3539 = vmatpush1.bf16.msra.mxu1 %v6533_v37  ;;  %3499 = vmatprep.subr.bf16.mxu0 %v6538_v38  ;;  %v6553_v47 = vld [vmem:[%s9328_s8 + $0x2a4] ss:$16 sps:$4 sm:$0xff]   ;;  %v6551_v50 = vld [vmem:[%s9328_s8 + $0x2a0] ss:$16 sps:$4 sm:$0xff]  }
 0x150   :  { %3540 = vmatprep.subr.bf16.mxu1 %v6541_v55  ;;  %v6556_v53 = vld [vmem:[%s9328_s8 + $0xc4] ss:$16 sps:$4 sm:$0xff]   ;;  %v6554_v58 = vld [vmem:[%s9328_s8 + $0xc0] ss:$16 sps:$4 sm:$0xff]  }
 0x151   :  { %v6559_v57 = vld [vmem:[%s9328_s8 + $0x2c4] ss:$16 sps:$4 sm:$0xff]   ;;  %v6557_v59 = vld [vmem:[%s9328_s8 + $0x2c0] ss:$16 sps:$4 sm:$0xff]  }
 0x152   :  { %3500 = vmatpush1.bf16.msra.mxu0 %v6536_v39  ;;  %v6562_v60 = vld [vmem:[%s9328_s8 + $0xe4] ss:$16 sps:$4 sm:$0xff]   ;;  %v6560_v62 = vld [vmem:[%s9328_s8 + $0xe0] ss:$16 sps:$4 sm:$0xff]  }
 0x153   :  { %3541 = vmatpush1.bf16.msra.mxu1 %v6539_v41  ;;  %3501 = vmatprep.subr.bf16.mxu0 %v6544_v42  ;;  %v6565_v61 = vld [vmem:[%s9328_s8 + $0x2e4] ss:$16 sps:$4 sm:$0xff]   ;;  %v6563_v63 = vld [vmem:[%s9328_s8 + $0x2e0] ss:$16 sps:$4 sm:$0xff]  }
 0x154   :  { %3542 = vmatprep.subr.bf16.mxu1 %v6547_v43  ;;  %v6568_v23 = vld [vmem:[%s9328_s8 + $0x104] ss:$16 sps:$4 sm:$0xff]   ;;  %v6566_v3 = vld [vmem:[%s9328_s8 + $0x100] ss:$16 sps:$4 sm:$0xff]  }
 0x155   :  { %v6571_v1 = vld [vmem:[%s9328_s8 + $0x304] ss:$16 sps:$4 sm:$0xff]   ;;  %v6569_v0 = vld [vmem:[%s9328_s8 + $0x300] ss:$16 sps:$4 sm:$0xff]  }
 0x156   :  { %3502 = vmatpush1.bf16.msra.mxu0 %v6542_v44  ;;  %v6574_v5 = vld [vmem:[%s9328_s8 + $0x124] ss:$16 sps:$4 sm:$0xff]   ;;  %v6572_v7 = vld [vmem:[%s9328_s8 + $0x120] ss:$16 sps:$4 sm:$0xff]  }
 0x157   :  { %3543 = vmatpush1.bf16.msra.mxu1 %v6545_v45  ;;  %3503 = vmatprep.subr.bf16.mxu0 %v6550_v46  ;;  %v6577_v6 = vld [vmem:[%s9328_s8 + $0x324] ss:$16 sps:$4 sm:$0xff]   ;;  %v6575_v56 = vld [vmem:[%s9328_s8 + $0x320] ss:$16 sps:$4 sm:$0xff]  }
 0x158   :  { %3544 = vmatprep.subr.bf16.mxu1 %v6553_v47  ;;  %v6580_v8 = vld [vmem:[%s9328_s8 + $0x144] ss:$16 sps:$4 sm:$0xff]   ;;  %v6578_v10 = vld [vmem:[%s9328_s8 + $0x140] ss:$16 sps:$4 sm:$0xff]  }
 0x159   :  { %v6583_v9 = vld [vmem:[%s9328_s8 + $0x344] ss:$16 sps:$4 sm:$0xff]   ;;  %v6581_v11 = vld [vmem:[%s9328_s8 + $0x340] ss:$16 sps:$4 sm:$0xff]  }
 0x15a   :  { %3504 = vmatpush1.bf16.msra.mxu0 %v6548_v49  ;;  %v6586_v12 = vld [vmem:[%s9328_s8 + $0x164] ss:$16 sps:$4 sm:$0xff]   ;;  %v6584_v14 = vld [vmem:[%s9328_s8 + $0x160] ss:$16 sps:$4 sm:$0xff]  }
 0x15b   :  { %3545 = vmatpush1.bf16.msra.mxu1 %v6551_v50  ;;  %3505 = vmatprep.subr.bf16.mxu0 %v6556_v53  ;;  %v6589_v13 = vld [vmem:[%s9328_s8 + $0x364] ss:$16 sps:$4 sm:$0xff]   ;;  %v6587_v15 = vld [vmem:[%s9328_s8 + $0x360] ss:$16 sps:$4 sm:$0xff]  }
 0x15c   :  { %3546 = vmatprep.subr.bf16.mxu1 %v6559_v57  ;;  %v6592_v16 = vld [vmem:[%s9328_s8 + $0x184] ss:$16 sps:$4 sm:$0xff]   ;;  %v6590_v18 = vld [vmem:[%s9328_s8 + $0x180] ss:$16 sps:$4 sm:$0xff]  }
 0x15d   :  { %v6595_v17 = vld [vmem:[%s9328_s8 + $0x384] ss:$16 sps:$4 sm:$0xff]   ;;  %v6593_v19 = vld [vmem:[%s9328_s8 + $0x380] ss:$16 sps:$4 sm:$0xff]  }
 0x15e   :  { %3506 = vmatpush1.bf16.msra.mxu0 %v6554_v58  ;;  %v6598_v20 = vld [vmem:[%s9328_s8 + $0x1a4] ss:$16 sps:$4 sm:$0xff]   ;;  %v6596_v22 = vld [vmem:[%s9328_s8 + $0x1a0] ss:$16 sps:$4 sm:$0xff]  }
 0x15f   :  { %3547 = vmatpush1.bf16.msra.mxu1 %v6557_v59  ;;  %3507 = vmatprep.subr.bf16.mxu0 %v6562_v60  ;;  %v6601_v21 = vld [vmem:[%s9328_s8 + $0x3a4] ss:$16 sps:$4 sm:$0xff]   ;;  %v6599_v25 = vld [vmem:[%s9328_s8 + $0x3a0] ss:$16 sps:$4 sm:$0xff]  }
 0x160   :  { %3548 = vmatprep.subr.bf16.mxu1 %v6565_v61  ;;  %v6604_v26 = vld [vmem:[%s9328_s8 + $0x1c4] ss:$16 sps:$4 sm:$0xff]   ;;  %v6602_v40 = vld [vmem:[%s9328_s8 + $0x1c0] ss:$16 sps:$4 sm:$0xff]  }
 0x161   :  { %v6607_v27 = vld [vmem:[%s9328_s8 + $0x3c4] ss:$16 sps:$4 sm:$0xff]   ;;  %v6605_v4 = vld [vmem:[%s9328_s8 + $0x3c0] ss:$16 sps:$4 sm:$0xff]  }
 0x162   :  { %3508 = vmatpush1.bf16.msra.mxu0 %v6560_v62  ;;  %v6610_v28 = vld [vmem:[%s9328_s8 + $0x1e4] ss:$16 sps:$4 sm:$0xff]   ;;  %v6608_v30 = vld [vmem:[%s9328_s8 + $0x1e0] ss:$16 sps:$4 sm:$0xff]  }
 0x163   :  { %3549 = vmatpush1.bf16.msra.mxu1 %v6563_v63  ;;  %3509 = vmatprep.subr.bf16.mxu0 %v6568_v23  ;;  %v6613_v29 = vld [vmem:[%s9328_s8 + $0x3e4] ss:$16 sps:$4 sm:$0xff]   ;;  %v6611_v2 = vld [vmem:[%s9328_s8 + $0x3e0] ss:$16 sps:$4 sm:$0xff]  }
 0x164   :  { %3550 = vmatprep.subr.bf16.mxu1 %v6571_v1  ;;  %v8385_v32 = vld [vmem:[%s9324_s4] sm:$0xf] }
 0x165   :  { %v450_v33 = vrot.slane %v8385_v32, %v7280_v52  ;;  %v2136_v43 = vld [vmem:[%s9326_s6] sm:$0xf] }
 0x166   :  { %3510 = vmatpush1.bf16.msra.mxu0 %v6566_v3  ;;  %v2141_v44 = vrot.slane %v2136_v43, %v7271_v48  ;;  %v2149_v45 = vrot.slane %v2136_v43, %v7280_v52  ;;  %v2145_v46 = vrot.slane %v2136_v43, %v7277_v51  ;;  %v2153_v47 = vrot.slane %v2136_v43, %v7286_v54  ;;  %v6664_v43 = vld [vmem:[%s9328_s8 + $0x10c] ss:$16 sps:$4 sm:$0xff]  }
 0x167   :  { %3551 = vmatpush1.bf16.msra.mxu1 %v6569_v0  ;;  %3511 = vmatprep.subr.bf16.mxu0 %v6574_v5 }
 0x168   :  { %3552 = vmatprep.subr.bf16.mxu1 %v6577_v6 }
 0x16a   :  { %3512 = vmatpush1.bf16.msra.mxu0 %v6572_v7 }
 0x16b   :  { %3553 = vmatpush1.bf16.msra.mxu1 %v6575_v56  ;;  %3513 = vmatprep.subr.bf16.mxu0 %v6580_v8 }
 0x16c   :  { %3554 = vmatprep.subr.bf16.mxu1 %v6583_v9  ;;  %v6614_v9 = vld [vmem:[%s9328_s8 + $0x8] ss:$16 sps:$4 sm:$0xff]  }
 0x16e   :  { %3514 = vmatpush1.bf16.msra.mxu0 %v6578_v10  ;;  %v6617_v10 = vld [vmem:[%s9328_s8 + $0x208] ss:$16 sps:$4 sm:$0xff]  }
 0x16f   :  { %3555 = vmatpush1.bf16.msra.mxu1 %v6581_v11  ;;  %3515 = vmatprep.subr.bf16.mxu0 %v6586_v12  ;;  %v6622_v12 = vld [vmem:[%s9328_s8 + $0x2c] ss:$16 sps:$4 sm:$0xff]  }
 0x170   :  { %3556 = vmatprep.subr.bf16.mxu1 %v6589_v13  ;;  %v6625_v13 = vld [vmem:[%s9328_s8 + $0x22c] ss:$16 sps:$4 sm:$0xff]  }
 0x172   :  { %3516 = vmatpush1.bf16.msra.mxu0 %v6584_v14  ;;  %v6620_v14 = vld [vmem:[%s9328_s8 + $0x28] ss:$16 sps:$4 sm:$0xff]  }
 0x173   :  { %3557 = vmatpush1.bf16.msra.mxu1 %v6587_v15  ;;  %3517 = vmatprep.subr.bf16.mxu0 %v6592_v16  ;;  %v6623_v15 = vld [vmem:[%s9328_s8 + $0x228] ss:$16 sps:$4 sm:$0xff]   ;;  %v6628_v16 = vld [vmem:[%s9328_s8 + $0x4c] ss:$16 sps:$4 sm:$0xff]  }
 0x174   :  { %3558 = vmatprep.subr.bf16.mxu1 %v6595_v17  ;;  %v6631_v17 = vld [vmem:[%s9328_s8 + $0x24c] ss:$16 sps:$4 sm:$0xff]  }
 0x176   :  { %3518 = vmatpush1.bf16.msra.mxu0 %v6590_v18  ;;  %v6626_v18 = vld [vmem:[%s9328_s8 + $0x48] ss:$16 sps:$4 sm:$0xff]  }
 0x177   :  { %3559 = vmatpush1.bf16.msra.mxu1 %v6593_v19  ;;  %3519 = vmatprep.subr.bf16.mxu0 %v6598_v20  ;;  %v6629_v19 = vld [vmem:[%s9328_s8 + $0x248] ss:$16 sps:$4 sm:$0xff]   ;;  %v6634_v20 = vld [vmem:[%s9328_s8 + $0x6c] ss:$16 sps:$4 sm:$0xff]  }
 0x178   :  { %3560 = vmatprep.subr.bf16.mxu1 %v6601_v21  ;;  %v6637_v21 = vld [vmem:[%s9328_s8 + $0x26c] ss:$16 sps:$4 sm:$0xff]  }
 0x17a   :  { %3520 = vmatpush1.bf16.msra.mxu0 %v6596_v22  ;;  %v6632_v22 = vld [vmem:[%s9328_s8 + $0x68] ss:$16 sps:$4 sm:$0xff]  }
 0x17b   :  { %3561 = vmatpush1.bf16.msra.mxu1 %v6599_v25  ;;  %3521 = vmatprep.subr.bf16.mxu0 %v6604_v26  ;;  %v6635_v25 = vld [vmem:[%s9328_s8 + $0x268] ss:$16 sps:$4 sm:$0xff]   ;;  %v6640_v26 = vld [vmem:[%s9328_s8 + $0x8c] ss:$16 sps:$4 sm:$0xff]  }
 0x17c   :  { %3562 = vmatprep.subr.bf16.mxu1 %v6607_v27  ;;  %v6643_v27 = vld [vmem:[%s9328_s8 + $0x28c] ss:$16 sps:$4 sm:$0xff]  }
 0x17e   :  { %3522 = vmatpush1.bf16.msra.mxu0 %v6602_v40  ;;  %v6638_v40 = vld [vmem:[%s9328_s8 + $0x88] ss:$16 sps:$4 sm:$0xff]  }
 0x17f   :  { %3563 = vmatpush1.bf16.msra.mxu1 %v6605_v4  ;;  %3523 = vmatprep.subr.bf16.mxu0 %v6610_v28  ;;  %v6641_v4 = vld [vmem:[%s9328_s8 + $0x288] ss:$16 sps:$4 sm:$0xff]   ;;  %v6646_v28 = vld [vmem:[%s9328_s8 + $0xac] ss:$16 sps:$4 sm:$0xff]  }
 0x180   :  { %3564 = vmatprep.subr.bf16.mxu1 %v6613_v29  ;;  %v6649_v29 = vld [vmem:[%s9328_s8 + $0x2ac] ss:$16 sps:$4 sm:$0xff]  }
 0x182   :  { %3524 = vmatpush1.bf16.msra.mxu0 %v6608_v30  ;;  %v6644_v30 = vld [vmem:[%s9328_s8 + $0xa8] ss:$16 sps:$4 sm:$0xff]  }
 0x183   :  { %3565 = vmatpush1.bf16.msra.mxu1 %v6611_v2  ;;  %3575 = vmatprep.subr.bf16.mxu0 %v6616_v24  ;;  %v6647_v2 = vld [vmem:[%s9328_s8 + $0x2a8] ss:$16 sps:$4 sm:$0xff]   ;;  %v6652_v24 = vld [vmem:[%s9328_s8 + $0xcc] ss:$16 sps:$4 sm:$0xff]  }
 0x184   :  { %3616 = vmatprep.subr.bf16.mxu1 %v6619_v31  ;;  %v6655_v31 = vld [vmem:[%s9328_s8 + $0x2cc] ss:$16 sps:$4 sm:$0xff]  }
 0x1d6   :  { %v8389_v34 = vpop.f32.mrb[0].mxu0  ;;  %v2060_v35 = vpop.f32.mrb[0].mxu1 }
 0x1d7   :  { %v8391_v36 = vadd.f32 %v2060_v35, %v450_v33  ;;  %v8393_v37 = vpop.f32.mrb[1].mxu0  ;;  %v8395_v38 = vpop.f32.mrb[1].mxu1  ;;  %v6650_v33 = vld [vmem:[%s9328_s8 + $0xc8] ss:$16 sps:$4 sm:$0xff]  }
 0x1d8   :  { %v1900_v55 = vpop.f32.mrb[2].mxu0  ;;  %v2064_v39 = vpop.f32.mrb[2].mxu1  ;;  %v6653_v35 = vld [vmem:[%s9328_s8 + $0x2c8] ss:$16 sps:$4 sm:$0xff]  }
 0x1d9   :  { %v1901_v41 = vpop.f32.mrb[3].mxu0  ;;  %v2065_v42 = vpop.f32.mrb[3].mxu1  ;;  %v6658_v55 = vld [vmem:[%s9328_s8 + $0xec] ss:$16 sps:$4 sm:$0xff]  }
 0x1da   :  { %v6661_v39 = vld [vmem:[%s9328_s8 + $0x2ec] ss:$16 sps:$4 sm:$0xff]   ;;  %v6656_v41 = vld [vmem:[%s9328_s8 + $0xe8] ss:$16 sps:$4 sm:$0xff]  }
 0x1db   :  { %v6659_v42 = vld [vmem:[%s9328_s8 + $0x2e8] ss:$16 sps:$4 sm:$0xff]  }
 0x216   :  { %v2537_v49 = vpop.f32.mrb[4].mxu0  ;;  %v2578_v50 = vpop.f32.mrb[4].mxu1 }
 0x217   :  { %v2538_v53 = vadd.f32 %v2537_v49, %v2141_v44  ;;  %v2579_v57 = vadd.f32 %v2578_v50, %v2149_v45  ;;  %v2539_v58 = vpop.f32.mrb[5].mxu0  ;;  %v2580_v59 = vpop.f32.mrb[5].mxu1  ;;  %v6667_v44 = vld [vmem:[%s9328_s8 + $0x30c] ss:$16 sps:$4 sm:$0xff]   ;;  %v6662_v45 = vld [vmem:[%s9328_s8 + $0x108] ss:$16 sps:$4 sm:$0xff]  }
 0x218   :  { %v2540_v60 = vadd.f32 %v2539_v58, %v2145_v46  ;;  %v2581_v61 = vadd.f32 %v2580_v59, %v2153_v47  ;;  %v2541_v62 = vpop.f32.mrb[6].mxu0  ;;  %v2582_v63 = vpop.f32.mrb[6].mxu1  ;;  %v6665_v46 = vld [vmem:[%s9328_s8 + $0x308] ss:$16 sps:$4 sm:$0xff]   ;;  %v6670_v47 = vld [vmem:[%s9328_s8 + $0x12c] ss:$16 sps:$4 sm:$0xff]  }
 0x219   :  { %v2585_v23 = vmax.f32 %v2538_v53, 0.0  ;;  %v2587_v1 = vmax.f32 %v2579_v57, 0.0  ;;  %v2542_v3 = vpop.f32.mrb[7].mxu0  ;;  %v2583_v0 = vpop.f32.mrb[7].mxu1  ;;  %v6673_v49 = vld [vmem:[%s9328_s8 + $0x32c] ss:$16 sps:$4 sm:$0xff]  }
 0x21a   :  { %v2586_v5 = vmax.f32 %v2540_v60, 0.0  ;;  %v2588_v6 = vmax.f32 %v2581_v61, 0.0  ;;  %v6668_v50 = vld [vmem:[%s9328_s8 + $0x128] ss:$16 sps:$4 sm:$0xff]   ;;  %v6676_v57 = vld [vmem:[%s9328_s8 + $0x14c] ss:$16 sps:$4 sm:$0xff]  }
 0x21b   :  { %v8404_v7 = vpack.c.bf16 %v2587_v1, %v2587_v1  ;;  %v8412_v11 = vpack.c.bf16 %v2585_v23, %v2585_v23  ;;  %v6671_v53 = vld [vmem:[%s9328_s8 + $0x328] ss:$16 sps:$4 sm:$0xff]   ;;  %v6679_v58 = vld [vmem:[%s9328_s8 + $0x34c] ss:$16 sps:$4 sm:$0xff]  }
 0x21c   :  { %v2722_v56 = vpack.c.bf16 %v2586_v5, %v2586_v5  ;;  %v2724_v8 = vpack.c.bf16 %v2588_v6, %v2588_v6  ;;  %v6674_v59 = vld [vmem:[%s9328_s8 + $0x148] ss:$16 sps:$4 sm:$0xff]   ;;  %v6682_v61 = vld [vmem:[%s9328_s8 + $0x16c] ss:$16 sps:$4 sm:$0xff]  }
 0x21d   :  { %v6677_v60 = vld [vmem:[%s9328_s8 + $0x348] ss:$16 sps:$4 sm:$0xff]   ;;  %v6685_v62 = vld [vmem:[%s9328_s8 + $0x36c] ss:$16 sps:$4 sm:$0xff]  }
 0x21e   :  { %3525 = vmatprep.mubr.bf16.mxu0 %v2722_v56  ;;  %3566 = vmatprep.mubr.bf16.mxu1 %v2724_v8  ;;  %v6680_v63 = vld [vmem:[%s9328_s8 + $0x168] ss:$16 sps:$4 sm:$0xff]   ;;  %v6688_v1 = vld [vmem:[%s9328_s8 + $0x18c] ss:$16 sps:$4 sm:$0xff]  }
 0x21f   :  { %3526 = vmatmul.mubr.bf16.vlgmr.msra.gmra.mrb[8].mxu0 %v8412_v11  ;;  %3567 = vmatmul.mubr.bf16.vlgmr.msra.gmra.mrb[8].mxu1 %v8404_v7  ;;  %v6683_v23 = vld [vmem:[%s9328_s8 + $0x368] ss:$16 sps:$4 sm:$0xff]   ;;  %v6691_v3 = vld [vmem:[%s9328_s8 + $0x38c] ss:$16 sps:$4 sm:$0xff]  }
 0x220   :  { %3576 = vmatpush1.bf16.msra.mxu0 %v6614_v9  ;;  %3617 = vmatpush1.bf16.msra.mxu1 %v6617_v10  ;;  %v6686_v0 = vld [vmem:[%s9328_s8 + $0x188] ss:$16 sps:$4 sm:$0xff]   ;;  %v6694_v6 = vld [vmem:[%s9328_s8 + $0x1ac] ss:$16 sps:$4 sm:$0xff]  }
 0x221   :  { %3607 = vmatprep.mubr.bf16.mxu0 %v2722_v56  ;;  %3648 = vmatprep.mubr.bf16.mxu1 %v2724_v8  ;;  %v6689_v5 = vld [vmem:[%s9328_s8 + $0x388] ss:$16 sps:$4 sm:$0xff]   ;;  %v6697_v56 = vld [vmem:[%s9328_s8 + $0x3ac] ss:$16 sps:$4 sm:$0xff]  }
 0x222   :  { %3577 = vmatprep.subr.bf16.mxu0 %v6622_v12  ;;  %3618 = vmatprep.subr.bf16.mxu1 %v6625_v13  ;;  %v6692_v8 = vld [vmem:[%s9328_s8 + $0x1a8] ss:$16 sps:$4 sm:$0xff]   ;;  %v6700_v10 = vld [vmem:[%s9328_s8 + $0x1cc] ss:$16 sps:$4 sm:$0xff]   ;;  %v446_v13 = vrot.slane %v8385_v32, %v7277_v51 }
 0x223   :  { %v6695_v9 = vld [vmem:[%s9328_s8 + $0x3a8] ss:$16 sps:$4 sm:$0xff]   ;;  %v6703_v12 = vld [vmem:[%s9328_s8 + $0x3cc] ss:$16 sps:$4 sm:$0xff]  }
 0x224   :  { %3578 = vmatpush1.bf16.msra.mxu0 %v6620_v14  ;;  %3619 = vmatpush1.bf16.msra.mxu1 %v6623_v15  ;;  %v454_v14 = vrot.slane %v8385_v32, %v7286_v54  ;;  %v6698_v15 = vld [vmem:[%s9328_s8 + $0x1c8] ss:$16 sps:$4 sm:$0xff]  }
 0x225   :  { %3579 = vmatprep.subr.bf16.mxu0 %v6628_v16  ;;  %3620 = vmatprep.subr.bf16.mxu1 %v6631_v17  ;;  %v6701_v16 = vld [vmem:[%s9328_s8 + $0x3c8] ss:$16 sps:$4 sm:$0xff]   ;;  %v6706_v17 = vld [vmem:[%s9328_s8 + $0x1ec] ss:$16 sps:$4 sm:$0xff]  }
 0x228   :  { %3580 = vmatpush1.bf16.msra.mxu0 %v6626_v18  ;;  %3621 = vmatpush1.bf16.msra.mxu1 %v6629_v19  ;;  %v6709_v18 = vld [vmem:[%s9328_s8 + $0x3ec] ss:$16 sps:$4 sm:$0xff]   ;;  %v6000_v19 = vadd.f32 %v8393_v37, %v446_v13  ;;  %v6715_v37 = vld [vmem:[%s9327_s7 + $0x204] ss:$16 sps:$4 sm:$0xff]   ;;  %v6773_v13 = vld [vmem:[%s9327_s7 + $0x340] ss:$16 sps:$4 sm:$0xff]  }
 0x229   :  { %3581 = vmatprep.subr.bf16.mxu0 %v6634_v20  ;;  %3622 = vmatprep.subr.bf16.mxu1 %v6637_v21  ;;  %v6002_v20 = vadd.f32 %v8395_v38, %v454_v14  ;;  %v6704_v21 = vld [vmem:[%s9328_s8 + $0x1e8] ss:$16 sps:$4 sm:$0xff]   ;;  %v6778_v14 = vld [vmem:[%s9327_s7 + $0x164] ss:$16 sps:$4 sm:$0xff]  }
 0x22a   :  { %v2068_v38 = vmax.f32 %v6000_v19, 0.0  ;;  %v6787_v19 = vld [vmem:[%s9327_s7 + $0x384] ss:$16 sps:$4 sm:$0xff]  }
 0x22c   :  { %3582 = vmatpush1.bf16.msra.mxu0 %v6632_v22  ;;  %3623 = vmatpush1.bf16.msra.mxu1 %v6635_v25  ;;  %v6707_v22 = vld [vmem:[%s9328_s8 + $0x3e8] ss:$16 sps:$4 sm:$0xff]   ;;  %v6712_v25 = vld [vmem:[%s9327_s7 + $0x4] ss:$16 sps:$4 sm:$0xff]  }
 0x22d   :  { %3583 = vmatprep.subr.bf16.mxu0 %v6640_v26  ;;  %3624 = vmatprep.subr.bf16.mxu1 %v6643_v27  ;;  %v2070_v26 = vmax.f32 %v6002_v20, 0.0  ;;  %v6710_v27 = vld [vmem:[%s9327_s7] ss:$16 sps:$4 sm:$0xff]  }
 0x22e   :  { %v6782_v20 = vld [vmem:[%s9327_s7 + $0x180] ss:$16 sps:$4 sm:$0xff]  }
 0x230   :  { %3584 = vmatpush1.bf16.msra.mxu0 %v6638_v40  ;;  %3625 = vmatpush1.bf16.msra.mxu1 %v6641_v4  ;;  %v6713_v40 = vld [vmem:[%s9327_s7 + $0x200] ss:$16 sps:$4 sm:$0xff]   ;;  %v8614_v4 = vpack.c.bf16 %v2068_v38, %v2068_v38  ;;  %v442_v38 = vrot.slane %v8385_v32, %v7271_v48 }
 0x231   :  { %3585 = vmatprep.subr.bf16.mxu0 %v6646_v28  ;;  %3626 = vmatprep.subr.bf16.mxu1 %v6649_v29  ;;  %v6718_v28 = vld [vmem:[%s9327_s7 + $0x24] ss:$16 sps:$4 sm:$0xff]   ;;  %v6794_v32 = vld [vmem:[%s9327_s7 + $0x1c0] ss:$16 sps:$4 sm:$0xff]  }
 0x232   :  { %v6721_v29 = vld [vmem:[%s9327_s7 + $0x224] ss:$16 sps:$4 sm:$0xff]  }
 0x234   :  { %3586 = vmatpush1.bf16.msra.mxu0 %v6644_v30  ;;  %3627 = vmatpush1.bf16.msra.mxu1 %v6647_v2  ;;  %v8622_v30 = vpack.c.bf16 %v2070_v26, %v2070_v26  ;;  %v6716_v2 = vld [vmem:[%s9327_s7 + $0x20] ss:$16 sps:$4 sm:$0xff]  }
 0x235   :  { %3587 = vmatprep.subr.bf16.mxu0 %v6652_v24  ;;  %3628 = vmatprep.subr.bf16.mxu1 %v6655_v31  ;;  %v6719_v24 = vld [vmem:[%s9327_s7 + $0x220] ss:$16 sps:$4 sm:$0xff]  }
 0x236   :  { %v6722_v31 = vld [vmem:[%s9327_s7 + $0x40] ss:$16 sps:$4 sm:$0xff]  }
 0x237   :  { %v6791_v26 = vld [vmem:[%s9327_s7 + $0x3a0] ss:$16 sps:$4 sm:$0xff]  }
 0x238   :  { %3588 = vmatpush1.bf16.msra.mxu0 %v6650_v33  ;;  %3629 = vmatpush1.bf16.msra.mxu1 %v6653_v35  ;;  %v6725_v33 = vld [vmem:[%s9327_s7 + $0x240] ss:$16 sps:$4 sm:$0xff]   ;;  %v6730_v35 = vld [vmem:[%s9327_s7 + $0x64] ss:$16 sps:$4 sm:$0xff]  }
 0x239   :  { %3589 = vmatprep.subr.bf16.mxu0 %v6658_v55  ;;  %3630 = vmatprep.subr.bf16.mxu1 %v6661_v39  ;;  %v6733_v55 = vld [vmem:[%s9327_s7 + $0x264] ss:$16 sps:$4 sm:$0xff]   ;;  %v6728_v39 = vld [vmem:[%s9327_s7 + $0x60] ss:$16 sps:$4 sm:$0xff]  }
 0x23c   :  { %3590 = vmatpush1.bf16.msra.mxu0 %v6656_v41  ;;  %3631 = vmatpush1.bf16.msra.mxu1 %v6659_v42  ;;  %v6731_v41 = vld [vmem:[%s9327_s7 + $0x260] ss:$16 sps:$4 sm:$0xff]   ;;  %v6736_v42 = vld [vmem:[%s9327_s7 + $0x84] ss:$16 sps:$4 sm:$0xff]  }
 0x23d   :  { %3591 = vmatprep.subr.bf16.mxu0 %v6664_v43  ;;  %3632 = vmatprep.subr.bf16.mxu1 %v6667_v44  ;;  %v6739_v43 = vld [vmem:[%s9327_s7 + $0x284] ss:$16 sps:$4 sm:$0xff]   ;;  %v6734_v44 = vld [vmem:[%s9327_s7 + $0x80] ss:$16 sps:$4 sm:$0xff]  }
 0x240   :  { %3592 = vmatpush1.bf16.msra.mxu0 %v6662_v45  ;;  %3633 = vmatpush1.bf16.msra.mxu1 %v6665_v46  ;;  %v6737_v45 = vld [vmem:[%s9327_s7 + $0x280] ss:$16 sps:$4 sm:$0xff]   ;;  %v6742_v46 = vld [vmem:[%s9327_s7 + $0xa4] ss:$16 sps:$4 sm:$0xff]  }
 0x241   :  { %3593 = vmatprep.subr.bf16.mxu0 %v6670_v47  ;;  %3634 = vmatprep.subr.bf16.mxu1 %v6673_v49  ;;  %v6745_v47 = vld [vmem:[%s9327_s7 + $0x2a4] ss:$16 sps:$4 sm:$0xff]   ;;  %v6740_v49 = vld [vmem:[%s9327_s7 + $0xa0] ss:$16 sps:$4 sm:$0xff]  }
 0x244   :  { %3594 = vmatpush1.bf16.msra.mxu0 %v6668_v50  ;;  %3635 = vmatpush1.bf16.msra.mxu1 %v6671_v53  ;;  %v6743_v50 = vld [vmem:[%s9327_s7 + $0x2a0] ss:$16 sps:$4 sm:$0xff]   ;;  %v6748_v53 = vld [vmem:[%s9327_s7 + $0xc4] ss:$16 sps:$4 sm:$0xff]  }
 0x245   :  { %3595 = vmatprep.subr.bf16.mxu0 %v6676_v57  ;;  %3636 = vmatprep.subr.bf16.mxu1 %v6679_v58  ;;  %v6751_v57 = vld [vmem:[%s9327_s7 + $0x2c4] ss:$16 sps:$4 sm:$0xff]   ;;  %v6746_v58 = vld [vmem:[%s9327_s7 + $0xc0] ss:$16 sps:$4 sm:$0xff]  }
 0x248   :  { %3596 = vmatpush1.bf16.msra.mxu0 %v6674_v59  ;;  %3637 = vmatpush1.bf16.msra.mxu1 %v6677_v60  ;;  %v6749_v59 = vld [vmem:[%s9327_s7 + $0x2c0] ss:$16 sps:$4 sm:$0xff]   ;;  %v6754_v60 = vld [vmem:[%s9327_s7 + $0xe4] ss:$16 sps:$4 sm:$0xff]  }
 0x249   :  { %3597 = vmatprep.subr.bf16.mxu0 %v6682_v61  ;;  %3638 = vmatprep.subr.bf16.mxu1 %v6685_v62  ;;  %v6757_v61 = vld [vmem:[%s9327_s7 + $0x2e4] ss:$16 sps:$4 sm:$0xff]   ;;  %v6752_v62 = vld [vmem:[%s9327_s7 + $0xe0] ss:$16 sps:$4 sm:$0xff]  }
 0x24c   :  { %3598 = vmatpush1.bf16.msra.mxu0 %v6680_v63  ;;  %3639 = vmatpush1.bf16.msra.mxu1 %v6683_v23  ;;  %v6755_v63 = vld [vmem:[%s9327_s7 + $0x2e0] ss:$16 sps:$4 sm:$0xff]   ;;  %v6760_v23 = vld [vmem:[%s9327_s7 + $0x104] ss:$16 sps:$4 sm:$0xff]  }
 0x24d   :  { %3599 = vmatprep.subr.bf16.mxu0 %v6688_v1  ;;  %3640 = vmatprep.subr.bf16.mxu1 %v6691_v3  ;;  %v6763_v1 = vld [vmem:[%s9327_s7 + $0x304] ss:$16 sps:$4 sm:$0xff]   ;;  %v6758_v3 = vld [vmem:[%s9327_s7 + $0x100] ss:$16 sps:$4 sm:$0xff]  }
 0x250   :  { %3600 = vmatpush1.bf16.msra.mxu0 %v6686_v0  ;;  %3641 = vmatpush1.bf16.msra.mxu1 %v6689_v5  ;;  %v6761_v0 = vld [vmem:[%s9327_s7 + $0x300] ss:$16 sps:$4 sm:$0xff]   ;;  %v6766_v5 = vld [vmem:[%s9327_s7 + $0x124] ss:$16 sps:$4 sm:$0xff]  }
 0x251   :  { %3601 = vmatprep.subr.bf16.mxu0 %v6694_v6  ;;  %3642 = vmatprep.subr.bf16.mxu1 %v6697_v56  ;;  %v6769_v6 = vld [vmem:[%s9327_s7 + $0x324] ss:$16 sps:$4 sm:$0xff]   ;;  %v6764_v56 = vld [vmem:[%s9327_s7 + $0x120] ss:$16 sps:$4 sm:$0xff]  }
 0x254   :  { %3602 = vmatpush1.bf16.msra.mxu0 %v6692_v8  ;;  %3643 = vmatpush1.bf16.msra.mxu1 %v6695_v9  ;;  %v6767_v8 = vld [vmem:[%s9327_s7 + $0x320] ss:$16 sps:$4 sm:$0xff]   ;;  %v6772_v9 = vld [vmem:[%s9327_s7 + $0x144] ss:$16 sps:$4 sm:$0xff]  }
 0x255   :  { %3603 = vmatprep.subr.bf16.mxu0 %v6700_v10  ;;  %3644 = vmatprep.subr.bf16.mxu1 %v6703_v12  ;;  %v6775_v10 = vld [vmem:[%s9327_s7 + $0x344] ss:$16 sps:$4 sm:$0xff]   ;;  %v6770_v12 = vld [vmem:[%s9327_s7 + $0x140] ss:$16 sps:$4 sm:$0xff]  }
 0x258   :  { %3604 = vmatpush1.bf16.msra.mxu0 %v6698_v15  ;;  %3645 = vmatpush1.bf16.msra.mxu1 %v6701_v16  ;;  %v6781_v15 = vld [vmem:[%s9327_s7 + $0x364] ss:$16 sps:$4 sm:$0xff]   ;;  %v6776_v16 = vld [vmem:[%s9327_s7 + $0x160] ss:$16 sps:$4 sm:$0xff]  }
 0x259   :  { %3605 = vmatprep.subr.bf16.mxu0 %v6706_v17  ;;  %3646 = vmatprep.subr.bf16.mxu1 %v6709_v18  ;;  %v6779_v17 = vld [vmem:[%s9327_s7 + $0x360] ss:$16 sps:$4 sm:$0xff]   ;;  %v6784_v18 = vld [vmem:[%s9327_s7 + $0x184] ss:$16 sps:$4 sm:$0xff]  }
 0x25c   :  { %3606 = vmatpush1.bf16.msra.mxu0 %v6704_v21  ;;  %3647 = vmatpush1.bf16.msra.mxu1 %v6707_v22  ;;  %v6785_v21 = vld [vmem:[%s9327_s7 + $0x380] ss:$16 sps:$4 sm:$0xff]   ;;  %v6790_v22 = vld [vmem:[%s9327_s7 + $0x1a4] ss:$16 sps:$4 sm:$0xff]  }
 0x25d   :  { %4297 = vmatprep.subr.bf16.mxu0 %v6712_v25  ;;  %4338 = vmatprep.subr.bf16.mxu1 %v6715_v37  ;;  %v6793_v25 = vld [vmem:[%s9327_s7 + $0x3a4] ss:$16 sps:$4 sm:$0xff]   ;;  %v6788_v37 = vld [vmem:[%s9327_s7 + $0x1a0] ss:$16 sps:$4 sm:$0xff]  }
 0x25f   :  { %3608 = vmatmul.mubr.bf16.vlgmr.msra.gmra.mrb[12].mxu0 %v8412_v11  ;;  %3649 = vmatmul.mubr.bf16.vlgmr.msra.gmra.mrb[12].mxu1 %v8404_v7  ;;  %v6724_v11 = vld [vmem:[%s9327_s7 + $0x44] ss:$16 sps:$4 sm:$0xff]  }
 0x260   :  { %4298 = vmatpush1.bf16.msra.mxu0 %v6710_v27  ;;  %4329 = vmatprep.mubr.bf16.mxu0 %v8614_v4  ;;  %v6727_v7 = vld [vmem:[%s9327_s7 + $0x244] ss:$16 sps:$4 sm:$0xff]  }
 0x261   :  { %4339 = vmatpush1.bf16.msra.mxu1 %v6713_v40  ;;  %4370 = vmatprep.mubr.bf16.mxu1 %v8622_v30  ;;  %v6796_v27 = vld [vmem:[%s9327_s7 + $0x1c4] ss:$16 sps:$4 sm:$0xff]  }
 0x262   :  { %4299 = vmatprep.subr.bf16.mxu0 %v6718_v28  ;;  %4340 = vmatprep.subr.bf16.mxu1 %v6721_v29  ;;  %v6799_v40 = vld [vmem:[%s9327_s7 + $0x3c4] ss:$16 sps:$4 sm:$0xff]   ;;  %v5999_v28 = vadd.f32 %v8389_v34, %v442_v38  ;;  %v6797_v29 = vld [vmem:[%s9327_s7 + $0x3c0] ss:$16 sps:$4 sm:$0xff]   ;;  %v6877_v38 = vld [vmem:[%s9327_s7 + $0x36c] ss:$16 sps:$4 sm:$0xff]  }
 0x263   :  { %v6800_v34 = vld [vmem:[%s9327_s7 + $0x1e0] ss:$16 sps:$4 sm:$0xff]  }
 0x264   :  { %4300 = vmatpush1.bf16.msra.mxu0 %v6716_v2  ;;  %v6802_v2 = vld [vmem:[%s9327_s7 + $0x1e4] ss:$16 sps:$4 sm:$0xff]  }
 0x265   :  { %4341 = vmatpush1.bf16.msra.mxu1 %v6719_v24  ;;  %4301 = vmatprep.subr.bf16.mxu0 %v6724_v11  ;;  %v6805_v24 = vld [vmem:[%s9327_s7 + $0x3e4] ss:$16 sps:$4 sm:$0xff]   ;;  %v2067_v11 = vmax.f32 %v5999_v28, 0.0  ;;  %v6878_v28 = vld [vmem:[%s9327_s7 + $0x188] ss:$16 sps:$4 sm:$0xff]  }
 0x266   :  { %4342 = vmatprep.subr.bf16.mxu1 %v6727_v7  ;;  %v6803_v7 = vld [vmem:[%s9327_s7 + $0x3e0] ss:$16 sps:$4 sm:$0xff]  }
 0x268   :  { %4302 = vmatpush1.bf16.msra.mxu0 %v6722_v31  ;;  %v6808_v31 = vld [vmem:[%s9327_s7 + $0xc] ss:$16 sps:$4 sm:$0xff]  }
 0x269   :  { %4343 = vmatpush1.bf16.msra.mxu1 %v6725_v33  ;;  %4303 = vmatprep.subr.bf16.mxu0 %v6730_v35  ;;  %v2069_v33 = vmax.f32 %v8391_v36, 0.0  ;;  %v6811_v35 = vld [vmem:[%s9327_s7 + $0x20c] ss:$16 sps:$4 sm:$0xff]  }
 0x26a   :  { %4344 = vmatprep.subr.bf16.mxu1 %v6733_v55  ;;  %v6806_v55 = vld [vmem:[%s9327_s7 + $0x8] ss:$16 sps:$4 sm:$0xff]   ;;  %v6814_v36 = vld [vmem:[%s9327_s7 + $0x2c] ss:$16 sps:$4 sm:$0xff]  }
 0x26c   :  { %4304 = vmatpush1.bf16.msra.mxu0 %v6728_v39  ;;  %v8815_v39 = vpack.c.bf16 %v2067_v11, %v2067_v11  ;;  %v6887_v11 = vld [vmem:[%s9327_s7 + $0x3a8] ss:$16 sps:$4 sm:$0xff]  }
 0x26d   :  { %4345 = vmatpush1.bf16.msra.mxu1 %v6731_v41  ;;  %4305 = vmatprep.subr.bf16.mxu0 %v6736_v42  ;;  %v6809_v41 = vld [vmem:[%s9327_s7 + $0x208] ss:$16 sps:$4 sm:$0xff]   ;;  %v8820_v42 = vpack.c.bf16 %v2069_v33, %v2069_v33 }
 0x26e   :  { %4346 = vmatprep.subr.bf16.mxu1 %v6739_v43  ;;  %v6817_v43 = vld [vmem:[%s9327_s7 + $0x22c] ss:$16 sps:$4 sm:$0xff]   ;;  %v6890_v33 = vld [vmem:[%s9327_s7 + $0x1c8] ss:$16 sps:$4 sm:$0xff]  }
 0x270   :  { %4306 = vmatpush1.bf16.msra.mxu0 %v6734_v44  ;;  %v6812_v44 = vld [vmem:[%s9327_s7 + $0x28] ss:$16 sps:$4 sm:$0xff]  }
 0x271   :  { %4347 = vmatpush1.bf16.msra.mxu1 %v6737_v45  ;;  %4307 = vmatprep.subr.bf16.mxu0 %v6742_v46  ;;  %v6815_v45 = vld [vmem:[%s9327_s7 + $0x228] ss:$16 sps:$4 sm:$0xff]   ;;  %v6820_v46 = vld [vmem:[%s9327_s7 + $0x4c] ss:$16 sps:$4 sm:$0xff]  }
 0x272   :  { %4348 = vmatprep.subr.bf16.mxu1 %v6745_v47  ;;  %v6823_v47 = vld [vmem:[%s9327_s7 + $0x24c] ss:$16 sps:$4 sm:$0xff]  }
 0x274   :  { %4308 = vmatpush1.bf16.msra.mxu0 %v6740_v49  ;;  %v6821_v49 = vld [vmem:[%s9327_s7 + $0x248] ss:$16 sps:$4 sm:$0xff]  }
 0x275   :  { %4349 = vmatpush1.bf16.msra.mxu1 %v6743_v50  ;;  %4309 = vmatprep.subr.bf16.mxu0 %v6748_v53  ;;  %v6829_v50 = vld [vmem:[%s9327_s7 + $0x26c] ss:$16 sps:$4 sm:$0xff]   ;;  %v6824_v53 = vld [vmem:[%s9327_s7 + $0x68] ss:$16 sps:$4 sm:$0xff]  }
 0x276   :  { %4350 = vmatprep.subr.bf16.mxu1 %v6751_v57  ;;  %v6827_v57 = vld [vmem:[%s9327_s7 + $0x268] ss:$16 sps:$4 sm:$0xff]  }
 0x278   :  { %4310 = vmatpush1.bf16.msra.mxu0 %v6746_v58  ;;  %v6832_v58 = vld [vmem:[%s9327_s7 + $0x8c] ss:$16 sps:$4 sm:$0xff]  }
 0x279   :  { %4351 = vmatpush1.bf16.msra.mxu1 %v6749_v59  ;;  %4311 = vmatprep.subr.bf16.mxu0 %v6754_v60  ;;  %v6835_v59 = vld [vmem:[%s9327_s7 + $0x28c] ss:$16 sps:$4 sm:$0xff]   ;;  %v6830_v60 = vld [vmem:[%s9327_s7 + $0x88] ss:$16 sps:$4 sm:$0xff]  }
 0x27a   :  { %4352 = vmatprep.subr.bf16.mxu1 %v6757_v61  ;;  %v6833_v61 = vld [vmem:[%s9327_s7 + $0x288] ss:$16 sps:$4 sm:$0xff]  }
 0x27c   :  { %4312 = vmatpush1.bf16.msra.mxu0 %v6752_v62  ;;  %v6838_v62 = vld [vmem:[%s9327_s7 + $0xac] ss:$16 sps:$4 sm:$0xff]  }
 0x27d   :  { %4353 = vmatpush1.bf16.msra.mxu1 %v6755_v63  ;;  %4313 = vmatprep.subr.bf16.mxu0 %v6760_v23  ;;  %v6841_v63 = vld [vmem:[%s9327_s7 + $0x2ac] ss:$16 sps:$4 sm:$0xff]   ;;  %v6836_v23 = vld [vmem:[%s9327_s7 + $0xa8] ss:$16 sps:$4 sm:$0xff]  }
 0x27e   :  { %4354 = vmatprep.subr.bf16.mxu1 %v6763_v1  ;;  %v6839_v1 = vld [vmem:[%s9327_s7 + $0x2a8] ss:$16 sps:$4 sm:$0xff]  }
 0x280   :  { %4314 = vmatpush1.bf16.msra.mxu0 %v6758_v3  ;;  %v6844_v3 = vld [vmem:[%s9327_s7 + $0xcc] ss:$16 sps:$4 sm:$0xff]  }
 0x281   :  { %4355 = vmatpush1.bf16.msra.mxu1 %v6761_v0  ;;  %4315 = vmatprep.subr.bf16.mxu0 %v6766_v5  ;;  %v6847_v0 = vld [vmem:[%s9327_s7 + $0x2cc] ss:$16 sps:$4 sm:$0xff]   ;;  %v6842_v5 = vld [vmem:[%s9327_s7 + $0xc8] ss:$16 sps:$4 sm:$0xff]  }
 0x282   :  { %4356 = vmatprep.subr.bf16.mxu1 %v6769_v6  ;;  %v6845_v6 = vld [vmem:[%s9327_s7 + $0x2c8] ss:$16 sps:$4 sm:$0xff]  }
 0x284   :  { %4316 = vmatpush1.bf16.msra.mxu0 %v6764_v56  ;;  %v6850_v56 = vld [vmem:[%s9327_s7 + $0xec] ss:$16 sps:$4 sm:$0xff]  }
 0x285   :  { %4357 = vmatpush1.bf16.msra.mxu1 %v6767_v8  ;;  %4317 = vmatprep.subr.bf16.mxu0 %v6772_v9  ;;  %v6853_v8 = vld [vmem:[%s9327_s7 + $0x2ec] ss:$16 sps:$4 sm:$0xff]   ;;  %v6848_v9 = vld [vmem:[%s9327_s7 + $0xe8] ss:$16 sps:$4 sm:$0xff]  }
 0x286   :  { %4358 = vmatprep.subr.bf16.mxu1 %v6775_v10  ;;  %v6851_v10 = vld [vmem:[%s9327_s7 + $0x2e8] ss:$16 sps:$4 sm:$0xff]  }
 0x288   :  { %4318 = vmatpush1.bf16.msra.mxu0 %v6770_v12  ;;  %v6856_v12 = vld [vmem:[%s9327_s7 + $0x10c] ss:$16 sps:$4 sm:$0xff]  }
 0x289   :  { %4359 = vmatpush1.bf16.msra.mxu1 %v6773_v13  ;;  %4319 = vmatprep.subr.bf16.mxu0 %v6778_v14  ;;  %v6859_v13 = vld [vmem:[%s9327_s7 + $0x30c] ss:$16 sps:$4 sm:$0xff]   ;;  %v6854_v14 = vld [vmem:[%s9327_s7 + $0x108] ss:$16 sps:$4 sm:$0xff]  }
 0x28a   :  { %4360 = vmatprep.subr.bf16.mxu1 %v6781_v15  ;;  %v6857_v15 = vld [vmem:[%s9327_s7 + $0x308] ss:$16 sps:$4 sm:$0xff]  }
 0x28c   :  { %4320 = vmatpush1.bf16.msra.mxu0 %v6776_v16  ;;  %v6862_v16 = vld [vmem:[%s9327_s7 + $0x12c] ss:$16 sps:$4 sm:$0xff]  }
 0x28d   :  { %4361 = vmatpush1.bf16.msra.mxu1 %v6779_v17  ;;  %4321 = vmatprep.subr.bf16.mxu0 %v6784_v18  ;;  %v6865_v17 = vld [vmem:[%s9327_s7 + $0x32c] ss:$16 sps:$4 sm:$0xff]   ;;  %v6860_v18 = vld [vmem:[%s9327_s7 + $0x128] ss:$16 sps:$4 sm:$0xff]  }
 0x28e   :  { %4362 = vmatprep.subr.bf16.mxu1 %v6787_v19  ;;  %v6863_v19 = vld [vmem:[%s9327_s7 + $0x328] ss:$16 sps:$4 sm:$0xff]  }
 0x290   :  { %4322 = vmatpush1.bf16.msra.mxu0 %v6782_v20  ;;  %v6868_v20 = vld [vmem:[%s9327_s7 + $0x14c] ss:$16 sps:$4 sm:$0xff]  }
 0x291   :  { %4363 = vmatpush1.bf16.msra.mxu1 %v6785_v21  ;;  %4323 = vmatprep.subr.bf16.mxu0 %v6790_v22  ;;  %v6871_v21 = vld [vmem:[%s9327_s7 + $0x34c] ss:$16 sps:$4 sm:$0xff]   ;;  %v6866_v22 = vld [vmem:[%s9327_s7 + $0x148] ss:$16 sps:$4 sm:$0xff]  }
 0x292   :  { %4364 = vmatprep.subr.bf16.mxu1 %v6793_v25  ;;  %v6869_v25 = vld [vmem:[%s9327_s7 + $0x348] ss:$16 sps:$4 sm:$0xff]  }
 0x294   :  { %4324 = vmatpush1.bf16.msra.mxu0 %v6788_v37  ;;  %v6874_v37 = vld [vmem:[%s9327_s7 + $0x16c] ss:$16 sps:$4 sm:$0xff]  }
 0x295   :  { %4365 = vmatpush1.bf16.msra.mxu1 %v6791_v26  ;;  %4325 = vmatprep.subr.bf16.mxu0 %v6796_v27  ;;  %v6872_v26 = vld [vmem:[%s9327_s7 + $0x168] ss:$16 sps:$4 sm:$0xff]  }
 0x296   :  { %4366 = vmatprep.subr.bf16.mxu1 %v6799_v40  ;;  %v6875_v27 = vld [vmem:[%s9327_s7 + $0x368] ss:$16 sps:$4 sm:$0xff]   ;;  %v6880_v40 = vld [vmem:[%s9327_s7 + $0x18c] ss:$16 sps:$4 sm:$0xff]  }
 0x298   :  { %4326 = vmatpush1.bf16.msra.mxu0 %v6794_v32  ;;  %v6883_v32 = vld [vmem:[%s9327_s7 + $0x38c] ss:$16 sps:$4 sm:$0xff]  }
 0x299   :  { %4367 = vmatpush1.bf16.msra.mxu1 %v6797_v29  ;;  %4327 = vmatprep.subr.bf16.mxu0 %v6802_v2  ;;  %v6881_v29 = vld [vmem:[%s9327_s7 + $0x388] ss:$16 sps:$4 sm:$0xff]   ;;  %v6886_v2 = vld [vmem:[%s9327_s7 + $0x1ac] ss:$16 sps:$4 sm:$0xff]  }
 0x29a   :  { %4368 = vmatprep.subr.bf16.mxu1 %v6805_v24  ;;  %v6889_v24 = vld [vmem:[%s9327_s7 + $0x3ac] ss:$16 sps:$4 sm:$0xff]  }
 0x29c   :  { %4328 = vmatpush1.bf16.msra.mxu0 %v6800_v34  ;;  %v6884_v34 = vld [vmem:[%s9327_s7 + $0x1a8] ss:$16 sps:$4 sm:$0xff]  }
 0x29d   :  { %4369 = vmatpush1.bf16.msra.mxu1 %v6803_v7  ;;  %4379 = vmatprep.subr.bf16.mxu0 %v6808_v31  ;;  %v6892_v7 = vld [vmem:[%s9327_s7 + $0x1cc] ss:$16 sps:$4 sm:$0xff]  }
 0x29e   :  { %4420 = vmatprep.subr.bf16.mxu1 %v6811_v35  ;;  %v6895_v31 = vld [vmem:[%s9327_s7 + $0x3cc] ss:$16 sps:$4 sm:$0xff]   ;;  %v6893_v35 = vld [vmem:[%s9327_s7 + $0x3c8] ss:$16 sps:$4 sm:$0xff]  }
 0x29f   :  { %4330 = vmatmul.mubr.bf16.vlgmr.msra.gmra.mrb[16].mxu0 %v8815_v39 }
 0x2a0   :  { %4371 = vmatmul.mubr.bf16.vlgmr.msra.gmra.mrb[16].mxu1 %v8820_v42  ;;  %4380 = vmatpush1.bf16.msra.mxu0 %v6806_v55  ;;  %v6898_v55 = vld [vmem:[%s9327_s7 + $0x1ec] ss:$16 sps:$4 sm:$0xff]  }
 0x2a1   :  { %4411 = vmatprep.mubr.bf16.mxu0 %v8614_v4  ;;  %4421 = vmatpush1.bf16.msra.mxu1 %v6809_v41  ;;  %v6818_v4 = vld [vmem:[%s9327_s7 + $0x48] ss:$16 sps:$4 sm:$0xff]   ;;  %v6901_v41 = vld [vmem:[%s9327_s7 + $0x3ec] ss:$16 sps:$4 sm:$0xff]  }
 0x2a2   :  { %4452 = vmatprep.mubr.bf16.mxu1 %v8622_v30  ;;  %4381 = vmatprep.subr.bf16.mxu0 %v6814_v36  ;;  %v6826_v30 = vld [vmem:[%s9327_s7 + $0x6c] ss:$16 sps:$4 sm:$0xff]   ;;  %v6896_v36 = vld [vmem:[%s9327_s7 + $0x1e8] ss:$16 sps:$4 sm:$0xff]  }
 0x2a3   :  { %4422 = vmatprep.subr.bf16.mxu1 %v6817_v43  ;;  %v6899_v43 = vld [vmem:[%s9327_s7 + $0x3e8] ss:$16 sps:$4 sm:$0xff]  }
 0x2a4   :  { %4382 = vmatpush1.bf16.msra.mxu0 %v6812_v44  ;;  %v6904_v44 = vld [vmem:[%s9330_s10 + $0x4] ss:$8 sps:$4 sm:$0xff]  }
 0x2a5   :  { %4423 = vmatpush1.bf16.msra.mxu1 %v6815_v45  ;;  %4383 = vmatprep.subr.bf16.mxu0 %v6820_v46  ;;  %v6902_v45 = vld [vmem:[%s9330_s10] ss:$8 sps:$4 sm:$0xff]   ;;  %v6907_v46 = vld [vmem:[%s9330_s10 + $0x14] ss:$8 sps:$4 sm:$0xff]  }
 0x2a6   :  { %4424 = vmatprep.subr.bf16.mxu1 %v6823_v47  ;;  %v6905_v47 = vld [vmem:[%s9330_s10 + $0x10] ss:$8 sps:$4 sm:$0xff]  }
 0x2a8   :  { %4384 = vmatpush1.bf16.msra.mxu0 %v6818_v4  ;;  %v6910_v4 = vld [vmem:[%s9330_s10 + $0x24] ss:$8 sps:$4 sm:$0xff]  }
 0x2a9   :  { %4425 = vmatpush1.bf16.msra.mxu1 %v6821_v49  ;;  %4385 = vmatprep.subr.bf16.mxu0 %v6826_v30  ;;  %v6908_v49 = vld [vmem:[%s9330_s10 + $0x20] ss:$8 sps:$4 sm:$0xff]   ;;  %v6916_v30 = vld [vmem:[%s9330_s10 + $0x44] ss:$8 sps:$4 sm:$0xff]  }
 0x2aa   :  { %4426 = vmatprep.subr.bf16.mxu1 %v6829_v50  ;;  %v6914_v50 = vld [vmem:[%s9330_s10 + $0x40] ss:$8 sps:$4 sm:$0xff]  }
 0x2ac   :  { %4386 = vmatpush1.bf16.msra.mxu0 %v6824_v53  ;;  %v6919_v53 = vld [vmem:[%s9330_s10 + $0x54] ss:$8 sps:$4 sm:$0xff]  }
 0x2ad   :  { %4427 = vmatpush1.bf16.msra.mxu1 %v6827_v57  ;;  %4387 = vmatprep.subr.bf16.mxu0 %v6832_v58  ;;  %v6917_v57 = vld [vmem:[%s9330_s10 + $0x50] ss:$8 sps:$4 sm:$0xff]   ;;  %v6922_v58 = vld [vmem:[%s9330_s10 + $0x64] ss:$8 sps:$4 sm:$0xff]  }
 0x2ae   :  { %4428 = vmatprep.subr.bf16.mxu1 %v6835_v59 }
 0x2b0   :  { %4388 = vmatpush1.bf16.msra.mxu0 %v6830_v60 }
 0x2b1   :  { %4429 = vmatpush1.bf16.msra.mxu1 %v6833_v61  ;;  %4389 = vmatprep.subr.bf16.mxu0 %v6838_v62 }
 0x2b2   :  { %4430 = vmatprep.subr.bf16.mxu1 %v6841_v63 }
 0x2b4   :  { %4390 = vmatpush1.bf16.msra.mxu0 %v6836_v23 }
 0x2b5   :  { %4431 = vmatpush1.bf16.msra.mxu1 %v6839_v1  ;;  %4391 = vmatprep.subr.bf16.mxu0 %v6844_v3 }
 0x2b6   :  { %4432 = vmatprep.subr.bf16.mxu1 %v6847_v0  ;;  %v6920_v0 = vld [vmem:[%s9330_s10 + $0x60] ss:$8 sps:$4 sm:$0xff]  }
 0x2b8   :  { %4392 = vmatpush1.bf16.msra.mxu0 %v6842_v5 }
 0x2b9   :  { %4433 = vmatpush1.bf16.msra.mxu1 %v6845_v6  ;;  %4393 = vmatprep.subr.bf16.mxu0 %v6850_v56  ;;  %v6925_v56 = vld [vmem:[%s9330_s10 + $0x74] ss:$8 sps:$4 sm:$0xff]  }
 0x2ba   :  { %4434 = vmatprep.subr.bf16.mxu1 %v6853_v8  ;;  %v6923_v8 = vld [vmem:[%s9330_s10 + $0x70] ss:$8 sps:$4 sm:$0xff]  }
 0x2bc   :  { %4394 = vmatpush1.bf16.msra.mxu0 %v6848_v9  ;;  %v6928_v9 = vld [vmem:[%s9330_s10 + $0x84] ss:$8 sps:$4 sm:$0xff]  }
 0x2bd   :  { %4435 = vmatpush1.bf16.msra.mxu1 %v6851_v10  ;;  %4395 = vmatprep.subr.bf16.mxu0 %v6856_v12  ;;  %v6926_v10 = vld [vmem:[%s9330_s10 + $0x80] ss:$8 sps:$4 sm:$0xff]   ;;  %v6931_v12 = vld [vmem:[%s9330_s10 + $0x94] ss:$8 sps:$4 sm:$0xff]  }
 0x2be   :  { %4436 = vmatprep.subr.bf16.mxu1 %v6859_v13  ;;  %v6929_v13 = vld [vmem:[%s9330_s10 + $0x90] ss:$8 sps:$4 sm:$0xff]  }
 0x2c0   :  { %4396 = vmatpush1.bf16.msra.mxu0 %v6854_v14  ;;  %v6934_v14 = vld [vmem:[%s9330_s10 + $0xa4] ss:$8 sps:$4 sm:$0xff]  }
 0x2c1   :  { %4437 = vmatpush1.bf16.msra.mxu1 %v6857_v15  ;;  %4397 = vmatprep.subr.bf16.mxu0 %v6862_v16  ;;  %v6932_v15 = vld [vmem:[%s9330_s10 + $0xa0] ss:$8 sps:$4 sm:$0xff]   ;;  %v6937_v16 = vld [vmem:[%s9330_s10 + $0xb4] ss:$8 sps:$4 sm:$0xff]  }
 0x2c2   :  { %4438 = vmatprep.subr.bf16.mxu1 %v6865_v17  ;;  %v6935_v17 = vld [vmem:[%s9330_s10 + $0xb0] ss:$8 sps:$4 sm:$0xff]  }
 0x2c4   :  { %4398 = vmatpush1.bf16.msra.mxu0 %v6860_v18  ;;  %v6940_v18 = vld [vmem:[%s9330_s10 + $0xc4] ss:$8 sps:$4 sm:$0xff]  }
 0x2c5   :  { %4439 = vmatpush1.bf16.msra.mxu1 %v6863_v19  ;;  %4399 = vmatprep.subr.bf16.mxu0 %v6868_v20  ;;  %v6938_v19 = vld [vmem:[%s9330_s10 + $0xc0] ss:$8 sps:$4 sm:$0xff]   ;;  %v6943_v20 = vld [vmem:[%s9330_s10 + $0xd4] ss:$8 sps:$4 sm:$0xff]  }
 0x2c6   :  { %4440 = vmatprep.subr.bf16.mxu1 %v6871_v21  ;;  %v6941_v21 = vld [vmem:[%s9330_s10 + $0xd0] ss:$8 sps:$4 sm:$0xff]  }
 0x2c8   :  { %4400 = vmatpush1.bf16.msra.mxu0 %v6866_v22  ;;  %v6946_v22 = vld [vmem:[%s9330_s10 + $0xe4] ss:$8 sps:$4 sm:$0xff]  }
 0x2c9   :  { %4441 = vmatpush1.bf16.msra.mxu1 %v6869_v25  ;;  %4401 = vmatprep.subr.bf16.mxu0 %v6874_v37  ;;  %v6944_v25 = vld [vmem:[%s9330_s10 + $0xe0] ss:$8 sps:$4 sm:$0xff]   ;;  %v6949_v37 = vld [vmem:[%s9330_s10 + $0xf4] ss:$8 sps:$4 sm:$0xff]  }
 0x2ca   :  { %4442 = vmatprep.subr.bf16.mxu1 %v6877_v38  ;;  %v6947_v38 = vld [vmem:[%s9330_s10 + $0xf0] ss:$8 sps:$4 sm:$0xff]  }
 0x2cc   :  { %4402 = vmatpush1.bf16.msra.mxu0 %v6872_v26  ;;  %v6952_v26 = vld [vmem:[%s9330_s10 + $0x104] ss:$8 sps:$4 sm:$0xff]  }
 0x2cd   :  { %4443 = vmatpush1.bf16.msra.mxu1 %v6875_v27  ;;  %4403 = vmatprep.subr.bf16.mxu0 %v6880_v40 }
 0x2ce   :  { %4444 = vmatprep.subr.bf16.mxu1 %v6883_v32 }
 0x2d0   :  { %4404 = vmatpush1.bf16.msra.mxu0 %v6878_v28 }
 0x2d1   :  { %4445 = vmatpush1.bf16.msra.mxu1 %v6881_v29  ;;  %4405 = vmatprep.subr.bf16.mxu0 %v6886_v2 }
 0x2d2   :  { %4446 = vmatprep.subr.bf16.mxu1 %v6889_v24 }
 0x2d4   :  { %4406 = vmatpush1.bf16.msra.mxu0 %v6884_v34 }
 0x2d5   :  { %4447 = vmatpush1.bf16.msra.mxu1 %v6887_v11  ;;  %4407 = vmatprep.subr.bf16.mxu0 %v6892_v7 }
 0x2d6   :  { %4448 = vmatprep.subr.bf16.mxu1 %v6895_v31  ;;  %v6998_v31 = vld [vmem:[%s9332_s12 + $0x40] sm:$0xff]  }
 0x2d8   :  { %4408 = vmatpush1.bf16.msra.mxu0 %v6890_v33  ;;  %v6999_v33 = vld [vmem:[%s9332_s12] sm:$0xff]  }
 0x2d9   :  { %4449 = vmatpush1.bf16.msra.mxu1 %v6893_v35  ;;  %4409 = vmatprep.subr.bf16.mxu0 %v6898_v55  ;;  %v7000_v35 = vld [vmem:[%s9332_s12 + $0x48] sm:$0xff]  }
 0x2da   :  { %4450 = vmatprep.subr.bf16.mxu1 %v6901_v41  ;;  %v7001_v55 = vld [vmem:[%s9332_s12 + $0x8] sm:$0xff]   ;;  %v7002_v41 = vld [vmem:[%s9332_s12 + $0x50] sm:$0xff]  }
 0x2dc   :  { %4410 = vmatpush1.bf16.msra.mxu0 %v6896_v36  ;;  %v7003_v36 = vld [vmem:[%s9332_s12 + $0x10] sm:$0xff]  }
 0x2dd   :  { %4451 = vmatpush1.bf16.msra.mxu1 %v6899_v43  ;;  %4891 = vmatprep.subr.bf16.mxu0 %v6904_v44  ;;  %v7004_v43 = vld [vmem:[%s9332_s12 + $0x58] sm:$0xff]  }
 0x2de   :  { %5948 = vmatprep.subr.bf16.mxu1 %v6998_v31  ;;  %v7005_v44 = vld [vmem:[%s9332_s12 + $0x18] sm:$0xff]  }
 0x2df   :  { %4412 = vmatmul.mubr.bf16.vlgmr.msra.gmra.mrb[20].mxu0 %v8815_v39  ;;  %v6913_v39 = vld [vmem:[%s9330_s10 + $0x34] ss:$8 sps:$4 sm:$0xff]  }
 0x2e0   :  { %4453 = vmatmul.mubr.bf16.vlgmr.msra.gmra.mrb[20].mxu1 %v8820_v42  ;;  %4892 = vmatpush1.bf16.msra.mxu0 %v6902_v45  ;;  %v6911_v42 = vld [vmem:[%s9330_s10 + $0x30] ss:$8 sps:$4 sm:$0xff]   ;;  %v7006_v45 = vld [vmem:[%s9332_s12 + $0x60] sm:$0xff]   ;;  %v6991_v31 = vld [vmem:[%s9330_s10 + $0x1d4] ss:$8 sps:$4 sm:$0xff]  }
 0x2e1   :  { %4893 = vmatprep.subr.bf16.mxu0 %v6907_v46  ;;  %5949 = vmatpush3.bf16.msra.mxu1 %v6999_v33  ;;  %v7007_v46 = vld [vmem:[%s9332_s12 + $0x20] sm:$0xff]   ;;  %v6989_v33 = vld [vmem:[%s9330_s10 + $0x1d0] ss:$8 sps:$4 sm:$0xff]  }
 0x2e2   :  { %5950 = vmatprep.subr.bf16.mxu1 %v7000_v35  ;;  %v6994_v35 = vld [vmem:[%s9330_s10 + $0x1e4] ss:$8 sps:$4 sm:$0xff]  }
 0x2e4   :  { %4894 = vmatpush1.bf16.msra.mxu0 %v6905_v47  ;;  %v7008_v47 = vld [vmem:[%s9332_s12 + $0x68] sm:$0xff]  }
 0x2e5   :  { %4895 = vmatprep.subr.bf16.mxu0 %v6910_v4  ;;  %5951 = vmatpush3.bf16.msra.mxu1 %v7001_v55  ;;  %v7009_v4 = vld [vmem:[%s9332_s12 + $0x28] sm:$0xff]  }
 0x2e6   :  { %5952 = vmatprep.subr.bf16.mxu1 %v7002_v41 }
 0x2e8   :  { %4896 = vmatpush1.bf16.msra.mxu0 %v6908_v49  ;;  %v9154_v49 = vld [vmem:[%s9329_s9] sm:$0xf] }
 0x2e9   :  { %4897 = vmatprep.subr.bf16.mxu0 %v6913_v39  ;;  %5953 = vmatpush3.bf16.msra.mxu1 %v7003_v36 }
 0x2ea   :  { %5954 = vmatprep.subr.bf16.mxu1 %v7004_v43  ;;  %v4474_v43 = vrot.slane %v9154_v49, %v7280_v52  ;;  %v6997_v52 = vld [vmem:[%s9330_s10 + $0x1f4] ss:$8 sps:$4 sm:$0xff]  }
 0x2ec   :  { %4898 = vmatpush1.bf16.msra.mxu0 %v6911_v42 }
 0x2ed   :  { %4899 = vmatprep.subr.bf16.mxu0 %v6916_v30  ;;  %5955 = vmatpush3.bf16.msra.mxu1 %v7005_v44 }
 0x2ee   :  { %5956 = vmatprep.subr.bf16.mxu1 %v7006_v45 }
 0x2f0   :  { %4900 = vmatpush1.bf16.msra.mxu0 %v6914_v50  ;;  %v4466_v50 = vrot.slane %v9154_v49, %v7271_v48 }
 0x2f1   :  { %4901 = vmatprep.subr.bf16.mxu0 %v6919_v53  ;;  %5957 = vmatpush3.bf16.msra.mxu1 %v7007_v46 }
 0x2f2   :  { %v3527_v59 = vpop.f32.mrb[8].mxu0  ;;  %v3568_v60 = vpop.f32.mrb[8].mxu1  ;;  %5958 = vmatprep.subr.bf16.mxu1 %v7008_v47  ;;  %v4478_v47 = vrot.slane %v9154_v49, %v7286_v54  ;;  %v6995_v54 = vld [vmem:[%s9330_s10 + $0x1f0] ss:$8 sps:$4 sm:$0xff]  }
 0x2f3   :  { %v9047_v61 = vadd.f32 %v3568_v60, %v3527_v59  ;;  %v3529_v62 = vpop.f32.mrb[9].mxu0  ;;  %v3570_v63 = vpop.f32.mrb[9].mxu1  ;;  %v4470_v59 = vrot.slane %v9154_v49, %v7277_v51 }
 0x2f4   :  { %v9049_v23 = vadd.f32 %v3570_v63, %v3529_v62  ;;  %v3531_v1 = vpop.f32.mrb[10].mxu0  ;;  %v3572_v3 = vpop.f32.mrb[10].mxu1  ;;  %4902 = vmatpush1.bf16.msra.mxu0 %v6917_v57 }
 0x2f5   :  { %v3532_v5 = vpop.f32.mrb[11].mxu0  ;;  %v3573_v6 = vpop.f32.mrb[11].mxu1  ;;  %4903 = vmatprep.subr.bf16.mxu0 %v6922_v58  ;;  %5959 = vmatpush3.bf16.msra.mxu1 %v7009_v4 }
 0x2f8   :  { %4904 = vmatpush1.bf16.msra.mxu0 %v6920_v0 }
 0x2f9   :  { %4905 = vmatprep.subr.bf16.mxu0 %v6925_v56 }
 0x2fc   :  { %4906 = vmatpush1.bf16.msra.mxu0 %v6923_v8 }
 0x2fd   :  { %4907 = vmatprep.subr.bf16.mxu0 %v6928_v9  ;;  %v6950_v9 = vld [vmem:[%s9330_s10 + $0x100] ss:$8 sps:$4 sm:$0xff]  }
 0x300   :  { %4908 = vmatpush1.bf16.msra.mxu0 %v6926_v10  ;;  %v6955_v10 = vld [vmem:[%s9330_s10 + $0x114] ss:$8 sps:$4 sm:$0xff]  }
 0x301   :  { %4909 = vmatprep.subr.bf16.mxu0 %v6931_v12  ;;  %v6953_v12 = vld [vmem:[%s9330_s10 + $0x110] ss:$8 sps:$4 sm:$0xff]  }
 0x304   :  { %4910 = vmatpush1.bf16.msra.mxu0 %v6929_v13  ;;  %v6958_v13 = vld [vmem:[%s9330_s10 + $0x124] ss:$8 sps:$4 sm:$0xff]  }
 0x305   :  { %4911 = vmatprep.subr.bf16.mxu0 %v6934_v14  ;;  %v6956_v14 = vld [vmem:[%s9330_s10 + $0x120] ss:$8 sps:$4 sm:$0xff]  }
 0x308   :  { %4912 = vmatpush1.bf16.msra.mxu0 %v6932_v15  ;;  %v6961_v15 = vld [vmem:[%s9330_s10 + $0x134] ss:$8 sps:$4 sm:$0xff]  }
 0x309   :  { %4913 = vmatprep.subr.bf16.mxu0 %v6937_v16  ;;  %v6959_v16 = vld [vmem:[%s9330_s10 + $0x130] ss:$8 sps:$4 sm:$0xff]  }
 0x30c   :  { %4914 = vmatpush1.bf16.msra.mxu0 %v6935_v17  ;;  %v6964_v17 = vld [vmem:[%s9330_s10 + $0x144] ss:$8 sps:$4 sm:$0xff]  }
 0x30d   :  { %4915 = vmatprep.subr.bf16.mxu0 %v6940_v18  ;;  %v6962_v18 = vld [vmem:[%s9330_s10 + $0x140] ss:$8 sps:$4 sm:$0xff]  }
 0x310   :  { %4916 = vmatpush1.bf16.msra.mxu0 %v6938_v19  ;;  %v6967_v19 = vld [vmem:[%s9330_s10 + $0x154] ss:$8 sps:$4 sm:$0xff]  }
 0x311   :  { %4917 = vmatprep.subr.bf16.mxu0 %v6943_v20  ;;  %v6965_v20 = vld [vmem:[%s9330_s10 + $0x150] ss:$8 sps:$4 sm:$0xff]  }
 0x314   :  { %4918 = vmatpush1.bf16.msra.mxu0 %v6941_v21  ;;  %v6970_v21 = vld [vmem:[%s9330_s10 + $0x164] ss:$8 sps:$4 sm:$0xff]  }
 0x315   :  { %4919 = vmatprep.subr.bf16.mxu0 %v6946_v22  ;;  %v6968_v22 = vld [vmem:[%s9330_s10 + $0x160] ss:$8 sps:$4 sm:$0xff]  }
 0x318   :  { %4920 = vmatpush1.bf16.msra.mxu0 %v6944_v25  ;;  %v6973_v25 = vld [vmem:[%s9330_s10 + $0x174] ss:$8 sps:$4 sm:$0xff]  }
 0x319   :  { %4921 = vmatprep.subr.bf16.mxu0 %v6949_v37  ;;  %v6971_v37 = vld [vmem:[%s9330_s10 + $0x170] ss:$8 sps:$4 sm:$0xff]  }
 0x31c   :  { %4922 = vmatpush1.bf16.msra.mxu0 %v6947_v38  ;;  %v6976_v38 = vld [vmem:[%s9330_s10 + $0x184] ss:$8 sps:$4 sm:$0xff]  }
 0x31d   :  { %4932 = vmatprep.subr.bf16.mxu0 %v6952_v26  ;;  %v6974_v26 = vld [vmem:[%s9330_s10 + $0x180] ss:$8 sps:$4 sm:$0xff]  }
 0x332   :  { %v3609_v27 = vpop.f32.mrb[12].mxu0  ;;  %v3650_v40 = vpop.f32.mrb[12].mxu1 }
 0x333   :  { %v9111_v32 = vadd.f32 %v3650_v40, %v3609_v27  ;;  %v3611_v28 = vpop.f32.mrb[13].mxu0  ;;  %v3652_v29 = vpop.f32.mrb[13].mxu1  ;;  %v6979_v27 = vld [vmem:[%s9330_s10 + $0x194] ss:$8 sps:$4 sm:$0xff]   ;;  %v6977_v40 = vld [vmem:[%s9330_s10 + $0x190] ss:$8 sps:$4 sm:$0xff]  }
 0x334   :  { %v9113_v2 = vadd.f32 %v3652_v29, %v3611_v28  ;;  %v3613_v24 = vpop.f32.mrb[14].mxu0  ;;  %v3654_v34 = vpop.f32.mrb[14].mxu1  ;;  %v6982_v28 = vld [vmem:[%s9330_s10 + $0x1a4] ss:$8 sps:$4 sm:$0xff]   ;;  %v6980_v29 = vld [vmem:[%s9330_s10 + $0x1a0] ss:$8 sps:$4 sm:$0xff]  }
 0x335   :  { %v3614_v11 = vpop.f32.mrb[15].mxu0  ;;  %v3655_v7 = vpop.f32.mrb[15].mxu1  ;;  %v6985_v24 = vld [vmem:[%s9330_s10 + $0x1b4] ss:$8 sps:$4 sm:$0xff]   ;;  %v6983_v34 = vld [vmem:[%s9330_s10 + $0x1b0] ss:$8 sps:$4 sm:$0xff]  }
 0x336   :  { %v6988_v11 = vld [vmem:[%s9330_s10 + $0x1c4] ss:$8 sps:$4 sm:$0xff]   ;;  %v6986_v7 = vld [vmem:[%s9330_s10 + $0x1c0] ss:$8 sps:$4 sm:$0xff]  }
 0x372   :  { %v4331_v39 = vpop.f32.mrb[16].mxu0 }
 0x373   :  { %v4332_v42 = vadd.f32 %v4331_v39, %v9047_v61  ;;  %v4372_v30 = vpop.f32.mrb[16].mxu1  ;;  %v4333_v53 = vpop.f32.mrb[17].mxu0  ;;  %v6992_v39 = vld [vmem:[%s9330_s10 + $0x1e0] ss:$8 sps:$4 sm:$0xff]  }
 0x374   :  { %v4334_v57 = vadd.f32 %v4333_v53, %v9049_v23  ;;  %v4374_v58 = vpop.f32.mrb[17].mxu1  ;;  %v4335_v60 = vpop.f32.mrb[18].mxu0 }
 0x375   :  { %v4373_v62 = vadd.f32 %v4372_v30, %v4332_v42  ;;  %v4376_v63 = vpop.f32.mrb[18].mxu1  ;;  %v4336_v1 = vpop.f32.mrb[19].mxu0 }
 0x376   :  { %v4375_v3 = vadd.f32 %v4374_v58, %v4334_v57  ;;  %v4377_v0 = vpop.f32.mrb[19].mxu1  ;;  %v7011_v63 = vld [vmem:[%s9332_s12 + $0x30] sm:$0xff]   ;;  %v7012_v1 = vld [vmem:[%s9332_s12 + $0x78] sm:$0xff]  }
 0x377   :  { %v4483_v5 = vadd.f32 %v4466_v50, %v4373_v62  ;;  %v7010_v62 = vld [vmem:[%s9332_s12 + $0x70] sm:$0xff]   ;;  %v7048_v0 = vmov 0.0  }
 0x378   :  { %v4484_v6 = vadd.f32 %v4470_v59, %v4375_v3  ;;  %5960 = vmatprep.subr.bf16.mxu1 %v7010_v62  ;;  %v7013_v3 = vld [vmem:[%s9332_s12 + $0x38] sm:$0xff]  }
 0x379   :  { %v4487_v61 = vmax.f32 %v4483_v5, 0.0  ;;  %5961 = vmatpush3.bf16.msra.mxu1 %v7011_v63  ;;  %v4559_v5 = vld [vmem:[%s9331_s11] sm:$0x3] }
 0x37a   :  { %v4488_v56 = vmax.f32 %v4484_v6, 0.0  ;;  %5962 = vmatprep.subr.bf16.mxu1 %v7012_v1  ;;  %v4564_v6 = vrot.slane %v4559_v5, %v7271_v48  ;;  %v7015_v48 = vld [vmem:[%s9334_s14 + $0x8] sm:$0xff]  }
 0x37b   :  { %v4491_v23 = vpack.c.bf16 %v4487_v61, %v4487_v61  ;;  %v4568_v61 = vrot.slane %v4559_v5, %v7277_v51  ;;  %v7016_v51 = vld [vmem:[%s9334_s14 + $0x10] sm:$0xff]  }
 0x37c   :  { %v4492_v8 = vpack.c.bf16 %v4488_v56, %v4488_v56 }
 0x37d   :  { %5963 = vmatpush3.bf16.msra.mxu1 %v7013_v3 }
 0x37e   :  { %4923 = vmatprep.mubr.bf16.mxu0 %v4492_v8  ;;  %5979 = vmatprep.subr.bf16.mxu1 %v7048_v0 }
 0x37f   :  { %4924 = vmatmul.mubr.bf16.vlgmr.msra.gmra.mrb[24].mxu0 %v4491_v23 }
 0x380   :  { %4933 = vmatpush1.bf16.msra.mxu0 %v6950_v9 }
 0x381   :  { %4934 = vmatprep.subr.bf16.mxu0 %v6955_v10 }
 0x384   :  { %4935 = vmatpush1.bf16.msra.mxu0 %v6953_v12 }
 0x385   :  { %4936 = vmatprep.subr.bf16.mxu0 %v6958_v13 }
 0x388   :  { %4937 = vmatpush1.bf16.msra.mxu0 %v6956_v14 }
 0x389   :  { %4938 = vmatprep.subr.bf16.mxu0 %v6961_v15 }
 0x38c   :  { %4939 = vmatpush1.bf16.msra.mxu0 %v6959_v16  ;;  %v7014_v16 = vld [vmem:[%s9334_s14] sm:$0xff]  }
 0x38d   :  { %4940 = vmatprep.subr.bf16.mxu0 %v6964_v17 }
 0x390   :  { %4941 = vmatpush1.bf16.msra.mxu0 %v6962_v18  ;;  %v7017_v18 = vld [vmem:[%s9334_s14 + $0x18] sm:$0xff]  }
 0x391   :  { %4942 = vmatprep.subr.bf16.mxu0 %v6967_v19  ;;  %v7018_v19 = vld [vmem:[%s9334_s14 + $0x20] sm:$0xff]  }
 0x394   :  { %4943 = vmatpush1.bf16.msra.mxu0 %v6965_v20  ;;  %v7019_v20 = vld [vmem:[%s9334_s14 + $0x28] sm:$0xff]  }
 0x395   :  { %4944 = vmatprep.subr.bf16.mxu0 %v6970_v21  ;;  %v7020_v21 = vld [vmem:[%s9334_s14 + $0x30] sm:$0xff]  }
 0x398   :  { %4945 = vmatpush1.bf16.msra.mxu0 %v6968_v22  ;;  %v7021_v22 = vld [vmem:[%s9334_s14 + $0x38] sm:$0xff]   ;;  %s7050_s14 = smov [#allocation2]  }
 0x399   :  { %4946 = vmatprep.subr.bf16.mxu0 %v6973_v25  ;;  %s5273_s19 = sshll.u32 %s7050_s14, 4  ;;  %s5274_s19 = int_to_ptr.vmem [resolvable:$true] %s5273_s19 }
 0x39a   :  { %p7027_p1 = scmp.lt.s32.totalorder %s5274_s19, %s5274_s19 }
 0x39c   :  { %4947 = vmatpush1.bf16.msra.mxu0 %v6971_v37  ;;  %v5922_v37 = vld [vmem:[%s9333_s13] ss:$0 sm:$0xff]  ;;  %s7022_s13 = scalar_lea.vmem %s5274_s19, 32 }
 0x39d   :  { %4948 = vmatprep.subr.bf16.mxu0 %v6976_v38  ;;  %p7023_p0 = scmp.ne.s32.totalorder %s5274_s19, %s7022_s13  ;;  %p7028_p2 = scmp.lt.s32.totalorder %s7022_s13, %s7022_s13 }
 0x39f   :  { %p7029_p3 = por %p7028_p2, %p7027_p1 }
 0x3a0   :  { %4949 = vmatpush1.bf16.msra.mxu0 %v6974_v26 }
 0x3a1   :  { %4950 = vmatprep.subr.bf16.mxu0 %v6979_v27  ;;  %p7030_p4 = pnand %p7029_p3, %p7023_p0 }
 0x3a4   :  { %4951 = vmatpush1.bf16.msra.mxu0 %v6977_v40 }
 0x3a5   :  { %4952 = vmatprep.subr.bf16.mxu0 %v6982_v28 }
 0x3a8   :  { %4953 = vmatpush1.bf16.msra.mxu0 %v6980_v29 }
 0x3a9   :  { %4954 = vmatprep.subr.bf16.mxu0 %v6985_v24 }
 0x3ac   :  { %4955 = vmatpush1.bf16.msra.mxu0 %v6983_v34  ;;  %v5939_v34 = vld [vmem:[%s9335_s15] ss:$0 sm:$0xff] }
 0x3ad   :  { %4956 = vmatprep.subr.bf16.mxu0 %v6988_v11 }
 0x3b0   :  { %4957 = vmatpush1.bf16.msra.mxu0 %v6986_v7 }
 0x3b1   :  { %4958 = vmatprep.subr.bf16.mxu0 %v6991_v31 }
 0x3b2   :  { %v4413_v55 = vpop.f32.mrb[20].mxu0 }
 0x3b3   :  { %v4414_v41 = vadd.f32 %v4413_v55, %v9111_v32  ;;  %v4454_v36 = vpop.f32.mrb[20].mxu1  ;;  %v4415_v44 = vpop.f32.mrb[21].mxu0 }
 0x3b4   :  { %v4416_v45 = vadd.f32 %v4415_v44, %v9113_v2  ;;  %v4456_v46 = vpop.f32.mrb[21].mxu1  ;;  %v4417_v4 = vpop.f32.mrb[22].mxu0  ;;  %4959 = vmatpush1.bf16.msra.mxu0 %v6989_v33 }
 0x3b5   :  { %v4455_v42 = vadd.f32 %v4454_v36, %v4414_v41  ;;  %v4458_v30 = vpop.f32.mrb[22].mxu1  ;;  %v4418_v32 = vpop.f32.mrb[23].mxu0  ;;  %4960 = vmatprep.subr.bf16.mxu0 %v6994_v35 }
 0x3b6   :  { %v4457_v50 = vadd.f32 %v4456_v46, %v4416_v45  ;;  %v4459_v2 = vpop.f32.mrb[23].mxu1 }
 0x3b7   :  { %v4485_v53 = vadd.f32 %v4474_v43, %v4455_v42 }
 0x3b8   :  { %v4486_v57 = vadd.f32 %v4478_v47, %v4457_v50  ;;  %4961 = vmatpush1.bf16.msra.mxu0 %v6992_v39 }
 0x3b9   :  { %v4489_v49 = vmax.f32 %v4485_v53, 0.0  ;;  %4962 = vmatprep.subr.bf16.mxu0 %v6997_v52 }
 0x3ba   :  { %v4490_v58 = vmax.f32 %v4486_v57, 0.0 }
 0x3bb   :  { %v4493_v60 = vpack.c.bf16 %v4489_v49, %v4489_v49 }
 0x3bc   :  { %v4494_v59 = vpack.c.bf16 %v4490_v58, %v4490_v58  ;;  %4963 = vmatpush1.bf16.msra.mxu0 %v6995_v54 }
 0x3be   :  { %4964 = vmatprep.mubr.bf16.mxu0 %v4494_v59 }
 0x3bf   :  { %4965 = vmatmul.mubr.bf16.vlgmr.msra.gmra.mrb[24].mxu0 %v4493_v60 }
 0x492   :  { %v4966_v56 = vpop.f32.mrb[24].mxu0 }
 0x493   :  { %v6003_v8 = vadd.f32 %v4966_v56, %v4564_v6  ;;  %v4968_v9 = vpop.f32.mrb[25].mxu0 }
 0x494   :  { %v6004_v23 = vadd.f32 %v4968_v9, %v4568_v61  ;;  %v4970_v10 = vpop.f32.mrb[26].mxu0 }
 0x495   :  { %v4973_v12 = vmax.f32 %v6003_v8, 0.0  ;;  %v4971_v13 = vpop.f32.mrb[27].mxu0 }
 0x496   :  { %v4974_v14 = vmax.f32 %v6004_v23, 0.0 }
 0x497   :  { %v4975_v17 = vpack.c.bf16 %v4973_v12, %v4973_v12 }
 0x498   :  { %v4976_v15 = vpack.c.bf16 %v4974_v14, %v4974_v14 }
 0x49a   :  { %5144 = vmatprep.mubr.bf16.mxu1 %v4976_v15 }
 0x49b   :  { %5145 = vmatmul.mubr.bf16.vlgmr.msra.gmra.mrb[24].mxu1 %v4975_v17 }
 0x49c   :  { %5980 = vmatpush3.bf16.msra.mxu1 %v7014_v16  ;;  %5995 = vmatprep.mubr.msk.bf16.mxu1 %vm7049_vm0, %v7048_v0 }
 0x49d   :  { %5981 = vmatprep.subr.bf16.mxu1 %v7048_v0 }
 0x4a0   :  { %5982 = vmatpush3.bf16.msra.mxu1 %v7015_v48 }
 0x4a1   :  { %5983 = vmatprep.subr.bf16.mxu1 %v7048_v0 }
 0x4a4   :  { %5984 = vmatpush3.bf16.msra.mxu1 %v7016_v51 }
 0x4a5   :  { %5985 = vmatprep.subr.bf16.mxu1 %v7048_v0 }
 0x4a8   :  { %5986 = vmatpush3.bf16.msra.mxu1 %v7017_v18 }
 0x4a9   :  { %5987 = vmatprep.subr.bf16.mxu1 %v7048_v0 }
 0x4ac   :  { %5988 = vmatpush3.bf16.msra.mxu1 %v7018_v19 }
 0x4ad   :  { %5989 = vmatprep.subr.bf16.mxu1 %v7048_v0 }
 0x4b0   :  { %5990 = vmatpush3.bf16.msra.mxu1 %v7019_v20 }
 0x4b1   :  { %5991 = vmatprep.subr.bf16.mxu1 %v7048_v0 }
 0x4b4   :  { %5992 = vmatpush3.bf16.msra.mxu1 %v7020_v21 }
 0x4b5   :  { %5993 = vmatprep.subr.bf16.mxu1 %v7048_v0 }
 0x4b8   :  { %5994 = vmatpush3.bf16.msra.mxu1 %v7021_v22 }
 0x56e   :  { %v5964_v25 = vpop.f32.mrb[24].mxu1 }
 0x56f   :  { %v5965_v38 = vpop.f32.mrb[25].mxu1 }
 0x570   :  { %v5966_v26 = vadd.f32 %v5965_v38, %v5964_v25  ;;  %v5967_v27 = vpop.f32.mrb[26].mxu1 }
 0x571   :  { %v5968_v40 = vpop.f32.mrb[27].mxu1 }
 0x572   :  { %v5147_v28 = vadd.f32 %v5966_v26, %v5922_v37 }
 0x574   :  { %v5152_v29 = vmax.f32 %v5147_v28, 0.0 }
 0x576   :  { %v5153_v24 = vpack.c.bf16 %v5152_v29, %v5152_v29 }
 0x578   :  { %5996 = vmatmul.mubr.bf16.vlgmr.msra.gmra.mrb[28].mxu1 %v5153_v24 }
 0x64b   :  { %v5259_v11 = vpop.f32.mrb[28].mxu1 }
 0x64c   :  { %v5260_v7 = vadd.f32 %v5939_v34, %v5259_v11  ;;  %v5997_v31 = vpop.f32.mrb[29].mxu1 }
 0x64d   :  { %v5262_v33 = vpop.f32.mrb[30].mxu1 }
 0x64e   :  { %v5265_v35 = vmax.f32 %v5260_v7, 0.0  ;;  %v5998_v55 = vpop.f32.mrb[31].mxu1 }
 0x650   :  { %5266 = vst [vmem:[#allocation2] sm:$0x3] %v5265_v35 }
 0x651   :  { %7033 = shalt.err (!%p7030_p4)
}
 0x652   :  { %s7034_s15 = scalar_lea.hbm %s9336_s16, 32 }
 0x653   :  { %p7035_p5 = scmp.ne.s32.totalorder %s9336_s16, %s7034_s15  ;;  %p7038_p6 = scmp.lt.u32.totalorder %s7034_s15, %s9336_s16 }
 0x655   :  { %p7040_p7 = pnand %p7038_p6, %p7035_p5 }
 0x657   :  { %7043 = shalt.err (!%p7040_p7)
}
 0x658   :  { %5276 = dma.vmem_to_hbm [thread:$0]  %s5274_s19, 32, %s9336_s16, [#allocation3]  }
 0x659   :  { %7044 = dma.done.wait [#allocation3], 32  }
 0x65a   :  { %7045 = vsyncadd [#allocation3], 4294967264 }
 0x65b   :  { %5280 = vsyncpa [#allocation3], 1 }

</bundles_post_ra>
